<compile_context>
chip_gen: v7x
topology: tpu7x:2x2x1
jax: 0.10.0
libtpu: 0.0.40
codegen_flags: <defaults>
</compile_context>

<pallas_src>
import functools

import jax
import jax.numpy as jnp
from jax.experimental import pallas as pl
from jax.experimental.pallas import tpu as pltpu


def _round_up8(n: int) -> int:
    return -(-n // 8) * 8


# ------------------------------ Pallas kernel -------------------------------

def _disc_kernel(xp_ref, w1, w2, w3, w4, w5, wc_ref, logit_ref, latent_ref,
                 s1, s2, s3, s4, *, bb, lens, louts, lpads, regs, l_lat):
    """One grid step == forward pass for a block of `bb` samples.

    xp_ref     : (bb*R0, C0)   zero-padded inputs, (length, channel) rows,
                               one R0-row region per sample (halo included)
    w1..w5     : (4*C_in, C_out) conv weights, rows ordered (k, c_in)
    wc_ref     : (10, C5)      classifier weight, (length, channel) layout
    logit_ref  : (bb, 1)       per-block output
    latent_ref : (bb*10, C5)   per-block latent rows, (length, channel) layout
    s1..s4     : VMEM scratch, (bb*R_j, C_j) padded activation buffers
    """
    w_refs = (w1, w2, w3, w4, w5)
    in_bufs = (xp_ref, s1, s2, s3, s4)

    # Zero the per-sample halo + slack rows of the scratch activation buffers.
    # Done unconditionally every step (cheap) so the batch grid axis is safe
    # to mark "parallel" on multi-TensorCore chips.
    for j in range(1, 5):
        buf = in_bufs[j]
        c = buf.shape[1]
        lj, rj = lens[j], regs[j]
        top = jnp.zeros((1, c), jnp.float32)
        bot = jnp.zeros((rj - lj - 1, c), jnp.float32)
        for b in range(bb):
            base = b * rj
            buf[pl.ds(base, 1), :] = top
            buf[pl.ds(base + lj + 1, rj - lj - 1), :] = bot

    # Five conv blocks: in-kernel im2col (stride-2 sublane views), batch folded
    # into the matmul M dimension, fused LeakyReLU(0.2).
    y = None
    for j in range(5):
        buf = in_bufs[j]
        rj, lp, lo = regs[j], lpads[j], louts[j]
        patches = []
        for b in range(bb):
            base = b * rj
            # Tap k of output position t reads padded_x[2*t + k].
            taps = [buf[pl.ds(base + k, lp, stride=2), :] for k in range(4)]
            patches.append(jnp.concatenate(taps, axis=1))         # (lp, 4*cin)
        pm = patches[0] if bb == 1 else jnp.concatenate(patches, axis=0)
        acc = jnp.dot(pm, w_refs[j][...],
                      preferred_element_type=jnp.float32)          # (bb*lp, cout)
        y = jnp.where(acc >= 0.0, acc, 0.2 * acc)                  # LeakyReLU(0.2)
        if j < 4:
            nrj = regs[j + 1]
            nxt = in_bufs[j + 1]
            for b in range(bb):
                nxt[pl.ds(b * nrj + 1, lo), :] = y[b * lp:b * lp + lo, :]

    # Latent rows for this block + classifier Conv1d(C5, 1, 10): the kernel
    # spans the whole latent, so it's a multiply + reduce + sigmoid.
    wc = wc_ref[...]
    lp5 = lpads[4]
    for b in range(bb):
        yb = y[b * lp5:b * lp5 + l_lat, :]                         # (10, C5)
        latent_ref[pl.ds(b * l_lat, l_lat), :] = yb
        z = jnp.sum(yb * wc, axis=1, keepdims=True)                # (10, 1)
        z = jnp.sum(z, axis=0, keepdims=True)                      # (1, 1)
        logit_ref[pl.ds(b, 1), :] = 1.0 / (1.0 + jnp.exp(-z))


# --------------------------------- wrapper ----------------------------------

def discriminator_forward(x, enc_weights, w_cls):
    """Matches Discriminator.forward: returns (logit, latent).

    x           : (B, C_in, L)          -- PyTorch NCW layout
    enc_weights : 5 x (C_out, C_in, 4)  -- Conv1d weights (bias=False, no BN)
    w_cls       : (1, 16*hc, 10)        -- classifier Conv1d weight
    """
    B, c0, l0 = x.shape
    assert len(enc_weights) == 5 and l0 % 32 == 0
    lens = [l0 >> i for i in range(5)]                # input length per layer
    louts = [l // 2 for l in lens]                    # output length per layer
    cins = [w.shape[1] for w in enc_weights]          # input channels per layer
    c_lat = enc_weights[-1].shape[0]                  # 16 * hidden_c
    l_lat = louts[-1]                                 # 10
    assert cins[0] == c0 and w_cls.shape == (1, c_lat, l_lat)

    # Samples per grid step.  Whole batch for small B; otherwise blocks of 8
    # (keeps every BlockSpec sublane dimension 8-aligned).  Padded per-sample
    # VMEM footprint is ~0.4 MiB, so even bb=8 stays far under scoped VMEM.
    bb = B if (B <= 8 or B % 8 != 0) else 8
    nblk = B // bb

    lpads = [_round_up8(l) for l in louts]            # 8-aligned patch heights
    regs = [2 * lp + 2 for lp in lpads]               # per-sample region rows
    regs[0] = _round_up8(regs[0])

    # Wrapper-side layout glue (single tiny fused XLA op each):
    #   x : NCW -> (length, channel) rows with p=1 zero halo baked in.
    x_lc = jnp.transpose(x, (0, 2, 1)).astype(jnp.float32)          # (B, L, C)
    xp = jnp.pad(x_lc, ((0, 0), (1, regs[0] - l0 - 1), (0, 0)))     # (B, R0, C)
    xp = xp.reshape(B * regs[0], c0)
    #   conv weights -> (4*C_in, C_out), rows ordered (k, c_in).
    w_mats = [jnp.transpose(w, (2, 1, 0)).reshape(4 * w.shape[1], w.shape[0])
              for w in enc_weights]
    wc_mat = jnp.transpose(w_cls[0])                                # (10, C5)

    kernel = functools.partial(
        _disc_kernel, bb=bb, lens=tuple(lens), louts=tuple(louts),
        lpads=tuple(lpads), regs=tuple(regs), l_lat=l_lat)

    logit, latent2d = pl.pallas_call(
        kernel,
        out_shape=(
            jax.ShapeDtypeStruct((B, 1), jnp.float32),
            jax.ShapeDtypeStruct((B * l_lat, c_lat), jnp.float32),
        ),
        grid=(nblk,),
        in_specs=(
            [pl.BlockSpec((bb * regs[0], c0), lambda i: (i, 0))]
            + [pl.BlockSpec(wm.shape, lambda i: (0, 0)) for wm in w_mats]
            + [pl.BlockSpec(wc_mat.shape, lambda i: (0, 0))]
        ),
        out_specs=(
            pl.BlockSpec((bb, 1), lambda i: (i, 0)),
            pl.BlockSpec((bb * l_lat, c_lat), lambda i: (i, 0)),
        ),
        scratch_shapes=[pltpu.VMEM((bb * regs[j], cins[j]), jnp.float32)
                        for j in range(1, 5)],
        compiler_params=pltpu.CompilerParams(
            dimension_semantics=("parallel",),       # per-block outputs -> safe
            vmem_limit_bytes=32 * 1024 * 1024),
    )(xp, *w_mats, wc_mat)

    latent = jnp.transpose(latent2d.reshape(B, l_lat, c_lat), (0, 2, 1))
    return logit, latent


# --------------------------- pure-JAX reference -----------------------------

def discriminator_ref(x, enc_weights, w_cls):
    h = x
    for w in enc_weights:
        h = jax.lax.conv_general_dilated(
            h, w, (2,), [(1, 1)], dimension_numbers=("NCH", "OIH", "NCH"),
            precision=jax.lax.Precision.HIGHEST)
        h = jnp.where(h >= 0, h, 0.2 * h)
    latent = h
    logit = jax.lax.conv_general_dilated(
        latent, w_cls, (1,), [(0, 0)], dimension_numbers=("NCH", "OIH", "NCH"),
        precision=jax.lax.Precision.HIGHEST)
    logit = jnp.squeeze(logit, axis=2)
    logit = jax.nn.sigmoid(logit)
    return logit, latent


# ---------------------------------- main ------------------------------------

if __name__ == "__main__":
    # The encoder halves the length five times and the classifier has kernel
    # 10, so L must be 320 -> 10 -> 1 (same constraint as the BeatGAN input).
    B, in_c, hidden_c, L = 2, 4, 4, 320
    chans = [in_c, hidden_c, hidden_c * 2, hidden_c * 4, hidden_c * 8,
             hidden_c * 16]

    key = jax.random.PRNGKey(0)
    keys = jax.random.split(key, 7)
    x = jax.random.normal(keys[0], (B, in_c, L), dtype=jnp.float32)

    enc_weights = []
    for i in range(5):
        w = 0.2 * jax.random.normal(
            keys[i + 1], (chans[i + 1], chans[i], 4), dtype=jnp.float32)
        enc_weights.append(w)
    w_cls = 0.2 * jax.random.normal(keys[6], (1, chans[5], 10),
                                    dtype=jnp.float32)

    fwd = jax.jit(discriminator_forward)
    logit, latent = fwd(x, enc_weights, w_cls)
    jax.block_until_ready((logit, latent))

    assert logit.shape == (B, 1)
    assert latent.shape == (B, hidden_c * 16, 10)

    logit_ref, latent_ref = discriminator_ref(x, enc_weights, w_cls)
    assert jnp.allclose(latent, latent_ref, rtol=5e-3, atol=5e-4), "latent mismatch"
    assert jnp.allclose(logit, logit_ref, rtol=5e-3, atol=5e-4), "logit mismatch"

    print("KERNEL_OK")
</pallas_src>

<mosaic_0001>
module attributes {stable_mosaic.version = 11 : i64} {
  func.func @_disc_kernel(%arg0: i32, %arg1: memref<656x4xf32, #tpu.memory_space<vmem>>, %arg2: memref<16x4xf32, #tpu.memory_space<vmem>>, %arg3: memref<16x8xf32, #tpu.memory_space<vmem>>, %arg4: memref<32x16xf32, #tpu.memory_space<vmem>>, %arg5: memref<64x32xf32, #tpu.memory_space<vmem>>, %arg6: memref<128x64xf32, #tpu.memory_space<vmem>>, %arg7: memref<10x64xf32, #tpu.memory_space<vmem>>, %arg8: memref<2x1xf32, #tpu.memory_space<vmem>>, %arg9: memref<20x64xf32, #tpu.memory_space<vmem>>, %arg10: memref<324x4xf32, #tpu.memory_space<vmem>>, %arg11: memref<164x8xf32, #tpu.memory_space<vmem>>, %arg12: memref<100x16xf32, #tpu.memory_space<vmem>>, %arg13: memref<68x32xf32, #tpu.memory_space<vmem>>) attributes {dimension_semantics = [#tpu.dimension_semantics<parallel>], iteration_bounds = array<i64: 1>, scalar_prefetch = 0 : i64, scratch_operands = 4 : i64, tpu.core_type = #tpu.core_type<tc>, window_params = [{transform_indices = @transform_0, window_bounds = array<i64: 656, 4>}, {pipeline_mode = #tpu.pipeline_mode<synchronous>, transform_indices = @transform_1, window_bounds = array<i64: 16, 4>}, {pipeline_mode = #tpu.pipeline_mode<synchronous>, transform_indices = @transform_2, window_bounds = array<i64: 16, 8>}, {pipeline_mode = #tpu.pipeline_mode<synchronous>, transform_indices = @transform_3, window_bounds = array<i64: 32, 16>}, {pipeline_mode = #tpu.pipeline_mode<synchronous>, transform_indices = @transform_4, window_bounds = array<i64: 64, 32>}, {pipeline_mode = #tpu.pipeline_mode<synchronous>, transform_indices = @transform_5, window_bounds = array<i64: 128, 64>}, {pipeline_mode = #tpu.pipeline_mode<synchronous>, transform_indices = @transform_6, window_bounds = array<i64: 10, 64>}, {transform_indices = @transform_7, window_bounds = array<i64: 2, 1>}, {transform_indices = @transform_8, window_bounds = array<i64: 20, 64>}]} {
    %cst = arith.constant 0.000000e+00 : f32
    %0 = vector.broadcast %cst : f32 to vector<1x4xf32>
    %cst_0 = arith.constant 0.000000e+00 : f32
    %1 = vector.broadcast %cst_0 : f32 to vector<1x4xf32>
    %c0 = arith.constant 0 : index
    %c0_1 = arith.constant 0 : index
    %2 = vector.load %arg10[%c0, %c0_1] : memref<324x4xf32, #tpu.memory_space<vmem>>, vector<1x4xf32>
    tpu.vector_store %arg10[%c0, %c0_1], %0 {strides = array<i32>} : memref<324x4xf32, #tpu.memory_space<vmem>>, vector<1x4xf32>,
    %c161 = arith.constant 161 : index
    %c0_2 = arith.constant 0 : index
    %3 = vector.load %arg10[%c161, %c0_2] : memref<324x4xf32, #tpu.memory_space<vmem>>, vector<1x4xf32>
    tpu.vector_store %arg10[%c161, %c0_2], %1 {strides = array<i32>} : memref<324x4xf32, #tpu.memory_space<vmem>>, vector<1x4xf32>,
    %c162 = arith.constant 162 : index
    %c0_3 = arith.constant 0 : index
    %4 = vector.load %arg10[%c162, %c0_3] : memref<324x4xf32, #tpu.memory_space<vmem>>, vector<1x4xf32>
    tpu.vector_store %arg10[%c162, %c0_3], %0 {strides = array<i32>} : memref<324x4xf32, #tpu.memory_space<vmem>>, vector<1x4xf32>,
    %c323 = arith.constant 323 : index
    %c0_4 = arith.constant 0 : index
    %5 = vector.load %arg10[%c323, %c0_4] : memref<324x4xf32, #tpu.memory_space<vmem>>, vector<1x4xf32>
    tpu.vector_store %arg10[%c323, %c0_4], %1 {strides = array<i32>} : memref<324x4xf32, #tpu.memory_space<vmem>>, vector<1x4xf32>,
    %cst_5 = arith.constant 0.000000e+00 : f32
    %6 = vector.broadcast %cst_5 : f32 to vector<1x8xf32>
    %cst_6 = arith.constant 0.000000e+00 : f32
    %7 = vector.broadcast %cst_6 : f32 to vector<1x8xf32>
    %c0_7 = arith.constant 0 : index
    %c0_8 = arith.constant 0 : index
    %8 = vector.load %arg11[%c0_7, %c0_8] : memref<164x8xf32, #tpu.memory_space<vmem>>, vector<1x8xf32>
    tpu.vector_store %arg11[%c0_7, %c0_8], %6 {strides = array<i32>} : memref<164x8xf32, #tpu.memory_space<vmem>>, vector<1x8xf32>,
    %c81 = arith.constant 81 : index
    %c0_9 = arith.constant 0 : index
    %9 = vector.load %arg11[%c81, %c0_9] : memref<164x8xf32, #tpu.memory_space<vmem>>, vector<1x8xf32>
    tpu.vector_store %arg11[%c81, %c0_9], %7 {strides = array<i32>} : memref<164x8xf32, #tpu.memory_space<vmem>>, vector<1x8xf32>,
    %c82 = arith.constant 82 : index
    %c0_10 = arith.constant 0 : index
    %10 = vector.load %arg11[%c82, %c0_10] : memref<164x8xf32, #tpu.memory_space<vmem>>, vector<1x8xf32>
    tpu.vector_store %arg11[%c82, %c0_10], %6 {strides = array<i32>} : memref<164x8xf32, #tpu.memory_space<vmem>>, vector<1x8xf32>,
    %c163 = arith.constant 163 : index
    %c0_11 = arith.constant 0 : index
    %11 = vector.load %arg11[%c163, %c0_11] : memref<164x8xf32, #tpu.memory_space<vmem>>, vector<1x8xf32>
    tpu.vector_store %arg11[%c163, %c0_11], %7 {strides = array<i32>} : memref<164x8xf32, #tpu.memory_space<vmem>>, vector<1x8xf32>,
    %cst_12 = arith.constant 0.000000e+00 : f32
    %12 = vector.broadcast %cst_12 : f32 to vector<1x16xf32>
    %cst_13 = arith.constant 0.000000e+00 : f32
    %13 = vector.broadcast %cst_13 : f32 to vector<9x16xf32>
    %c0_14 = arith.constant 0 : index
    %c0_15 = arith.constant 0 : index
    %14 = vector.load %arg12[%c0_14, %c0_15] : memref<100x16xf32, #tpu.memory_space<vmem>>, vector<1x16xf32>
    tpu.vector_store %arg12[%c0_14, %c0_15], %12 {strides = array<i32>} : memref<100x16xf32, #tpu.memory_space<vmem>>, vector<1x16xf32>,
    %c41 = arith.constant 41 : index
    %c0_16 = arith.constant 0 : index
    %15 = vector.load %arg12[%c41, %c0_16] : memref<100x16xf32, #tpu.memory_space<vmem>>, vector<9x16xf32>
    tpu.vector_store %arg12[%c41, %c0_16], %13 {strides = array<i32>} : memref<100x16xf32, #tpu.memory_space<vmem>>, vector<9x16xf32>,
    %c50 = arith.constant 50 : index
    %c0_17 = arith.constant 0 : index
    %16 = vector.load %arg12[%c50, %c0_17] : memref<100x16xf32, #tpu.memory_space<vmem>>, vector<1x16xf32>
    tpu.vector_store %arg12[%c50, %c0_17], %12 {strides = array<i32>} : memref<100x16xf32, #tpu.memory_space<vmem>>, vector<1x16xf32>,
    %c91 = arith.constant 91 : index
    %c0_18 = arith.constant 0 : index
    %17 = vector.load %arg12[%c91, %c0_18] : memref<100x16xf32, #tpu.memory_space<vmem>>, vector<9x16xf32>
    tpu.vector_store %arg12[%c91, %c0_18], %13 {strides = array<i32>} : memref<100x16xf32, #tpu.memory_space<vmem>>, vector<9x16xf32>,
    %cst_19 = arith.constant 0.000000e+00 : f32
    %18 = vector.broadcast %cst_19 : f32 to vector<1x32xf32>
    %cst_20 = arith.constant 0.000000e+00 : f32
    %19 = vector.broadcast %cst_20 : f32 to vector<13x32xf32>
    %c0_21 = arith.constant 0 : index
    %c0_22 = arith.constant 0 : index
    %20 = vector.load %arg13[%c0_21, %c0_22] : memref<68x32xf32, #tpu.memory_space<vmem>>, vector<1x32xf32>
    tpu.vector_store %arg13[%c0_21, %c0_22], %18 {strides = array<i32>} : memref<68x32xf32, #tpu.memory_space<vmem>>, vector<1x32xf32>,
    %c21 = arith.constant 21 : index
    %c0_23 = arith.constant 0 : index
    %21 = vector.load %arg13[%c21, %c0_23] : memref<68x32xf32, #tpu.memory_space<vmem>>, vector<13x32xf32>
    tpu.vector_store %arg13[%c21, %c0_23], %19 {strides = array<i32>} : memref<68x32xf32, #tpu.memory_space<vmem>>, vector<13x32xf32>,
    %c34 = arith.constant 34 : index
    %c0_24 = arith.constant 0 : index
    %22 = vector.load %arg13[%c34, %c0_24] : memref<68x32xf32, #tpu.memory_space<vmem>>, vector<1x32xf32>
    tpu.vector_store %arg13[%c34, %c0_24], %18 {strides = array<i32>} : memref<68x32xf32, #tpu.memory_space<vmem>>, vector<1x32xf32>,
    %c55 = arith.constant 55 : index
    %c0_25 = arith.constant 0 : index
    %23 = vector.load %arg13[%c55, %c0_25] : memref<68x32xf32, #tpu.memory_space<vmem>>, vector<13x32xf32>
    tpu.vector_store %arg13[%c55, %c0_25], %19 {strides = array<i32>} : memref<68x32xf32, #tpu.memory_space<vmem>>, vector<13x32xf32>,
    %c0_26 = arith.constant 0 : index
    %c0_27 = arith.constant 0 : index
    %24 = tpu.strided_load %arg1[%c0_26, %c0_27] {strides = array<i32: 2, 1>} : memref<656x4xf32, #tpu.memory_space<vmem>>, vector<160x4xf32>
    %c1 = arith.constant 1 : index
    %c0_28 = arith.constant 0 : index
    %25 = tpu.strided_load %arg1[%c1, %c0_28] {strides = array<i32: 2, 1>} : memref<656x4xf32, #tpu.memory_space<vmem>>, vector<160x4xf32>
    %c2 = arith.constant 2 : index
    %c0_29 = arith.constant 0 : index
    %26 = tpu.strided_load %arg1[%c2, %c0_29] {strides = array<i32: 2, 1>} : memref<656x4xf32, #tpu.memory_space<vmem>>, vector<160x4xf32>
    %c3 = arith.constant 3 : index
    %c0_30 = arith.constant 0 : index
    %27 = tpu.strided_load %arg1[%c3, %c0_30] {strides = array<i32: 2, 1>} : memref<656x4xf32, #tpu.memory_space<vmem>>, vector<160x4xf32>
    %28 = tpu.concatenate %24, %25, %26, %27 in 1 : vector<160x4xf32>, vector<160x4xf32>, vector<160x4xf32>, vector<160x4xf32> -> vector<160x16xf32>
    %c328 = arith.constant 328 : index
    %c0_31 = arith.constant 0 : index
    %29 = tpu.strided_load %arg1[%c328, %c0_31] {strides = array<i32: 2, 1>} : memref<656x4xf32, #tpu.memory_space<vmem>>, vector<160x4xf32>
    %c329 = arith.constant 329 : index
    %c0_32 = arith.constant 0 : index
    %30 = tpu.strided_load %arg1[%c329, %c0_32] {strides = array<i32: 2, 1>} : memref<656x4xf32, #tpu.memory_space<vmem>>, vector<160x4xf32>
    %c330 = arith.constant 330 : index
    %c0_33 = arith.constant 0 : index
    %31 = tpu.strided_load %arg1[%c330, %c0_33] {strides = array<i32: 2, 1>} : memref<656x4xf32, #tpu.memory_space<vmem>>, vector<160x4xf32>
    %c331 = arith.constant 331 : index
    %c0_34 = arith.constant 0 : index
    %32 = tpu.strided_load %arg1[%c331, %c0_34] {strides = array<i32: 2, 1>} : memref<656x4xf32, #tpu.memory_space<vmem>>, vector<160x4xf32>
    %33 = tpu.concatenate %29, %30, %31, %32 in 1 : vector<160x4xf32>, vector<160x4xf32>, vector<160x4xf32>, vector<160x4xf32> -> vector<160x16xf32>
    %34 = tpu.concatenate %28, %33 in 0 : vector<160x16xf32>, vector<160x16xf32> -> vector<320x16xf32>
    %c0_35 = arith.constant 0 : index
    %c0_36 = arith.constant 0 : index
    %35 = vector.load %arg2[%c0_35, %c0_36] : memref<16x4xf32, #tpu.memory_space<vmem>>, vector<16x4xf32>
    %cst_37 = arith.constant dense<0.000000e+00> : vector<320x4xf32>
    %36 = tpu.matmul %34, %35, %cst_37 {dimension_numbers = #tpu.dot_dimension_numbers<[1], [0], [0], [1], [0, 0, 1, 1], [], []>} : vector<320x16xf32>, vector<16x4xf32>, vector<320x4xf32> -> vector<320x4xf32>
    %cst_38 = arith.constant 0.000000e+00 : f32
    %37 = vector.broadcast %cst_38 : f32 to vector<320x4xf32>
    %38 = arith.cmpf oge, %36, %37 : vector<320x4xf32>
    %cst_39 = arith.constant 2.000000e-01 : f32
    %39 = vector.broadcast %cst_39 : f32 to vector<320x4xf32>
    %40 = arith.mulf %39, %36 : vector<320x4xf32>
    %41 = arith.select %38, %36, %40 : vector<320x4xi1>, vector<320x4xf32>
    %42 = vector.extract_strided_slice %41 {offsets = [0, 0], sizes = [160, 4], strides = [1, 1]} : vector<320x4xf32> to vector<160x4xf32>
    %c1_40 = arith.constant 1 : index
    %c0_41 = arith.constant 0 : index
    %43 = vector.load %arg10[%c1_40, %c0_41] : memref<324x4xf32, #tpu.memory_space<vmem>>, vector<160x4xf32>
    tpu.vector_store %arg10[%c1_40, %c0_41], %42 {strides = array<i32>} : memref<324x4xf32, #tpu.memory_space<vmem>>, vector<160x4xf32>,
    %44 = vector.extract_strided_slice %41 {offsets = [160, 0], sizes = [160, 4], strides = [1, 1]} : vector<320x4xf32> to vector<160x4xf32>
    %c163_42 = arith.constant 163 : index
    %c0_43 = arith.constant 0 : index
    %45 = vector.load %arg10[%c163_42, %c0_43] : memref<324x4xf32, #tpu.memory_space<vmem>>, vector<160x4xf32>
    tpu.vector_store %arg10[%c163_42, %c0_43], %44 {strides = array<i32>} : memref<324x4xf32, #tpu.memory_space<vmem>>, vector<160x4xf32>,
    %c0_44 = arith.constant 0 : index
    %c0_45 = arith.constant 0 : index
    %46 = tpu.strided_load %arg10[%c0_44, %c0_45] {strides = array<i32: 2, 1>} : memref<324x4xf32, #tpu.memory_space<vmem>>, vector<80x4xf32>
    %c1_46 = arith.constant 1 : index
    %c0_47 = arith.constant 0 : index
    %47 = tpu.strided_load %arg10[%c1_46, %c0_47] {strides = array<i32: 2, 1>} : memref<324x4xf32, #tpu.memory_space<vmem>>, vector<80x4xf32>
    %c2_48 = arith.constant 2 : index
    %c0_49 = arith.constant 0 : index
    %48 = tpu.strided_load %arg10[%c2_48, %c0_49] {strides = array<i32: 2, 1>} : memref<324x4xf32, #tpu.memory_space<vmem>>, vector<80x4xf32>
    %c3_50 = arith.constant 3 : index
    %c0_51 = arith.constant 0 : index
    %49 = tpu.strided_load %arg10[%c3_50, %c0_51] {strides = array<i32: 2, 1>} : memref<324x4xf32, #tpu.memory_space<vmem>>, vector<80x4xf32>
    %50 = tpu.concatenate %46, %47, %48, %49 in 1 : vector<80x4xf32>, vector<80x4xf32>, vector<80x4xf32>, vector<80x4xf32> -> vector<80x16xf32>
    %c162_52 = arith.constant 162 : index
    %c0_53 = arith.constant 0 : index
    %51 = tpu.strided_load %arg10[%c162_52, %c0_53] {strides = array<i32: 2, 1>} : memref<324x4xf32, #tpu.memory_space<vmem>>, vector<80x4xf32>
    %c163_54 = arith.constant 163 : index
    %c0_55 = arith.constant 0 : index
    %52 = tpu.strided_load %arg10[%c163_54, %c0_55] {strides = array<i32: 2, 1>} : memref<324x4xf32, #tpu.memory_space<vmem>>, vector<80x4xf32>
    %c164 = arith.constant 164 : index
    %c0_56 = arith.constant 0 : index
    %53 = tpu.strided_load %arg10[%c164, %c0_56] {strides = array<i32: 2, 1>} : memref<324x4xf32, #tpu.memory_space<vmem>>, vector<80x4xf32>
    %c165 = arith.constant 165 : index
    %c0_57 = arith.constant 0 : index
    %54 = tpu.strided_load %arg10[%c165, %c0_57] {strides = array<i32: 2, 1>} : memref<324x4xf32, #tpu.memory_space<vmem>>, vector<80x4xf32>
    %55 = tpu.concatenate %51, %52, %53, %54 in 1 : vector<80x4xf32>, vector<80x4xf32>, vector<80x4xf32>, vector<80x4xf32> -> vector<80x16xf32>
    %56 = tpu.concatenate %50, %55 in 0 : vector<80x16xf32>, vector<80x16xf32> -> vector<160x16xf32>
    %c0_58 = arith.constant 0 : index
    %c0_59 = arith.constant 0 : index
    %57 = vector.load %arg3[%c0_58, %c0_59] : memref<16x8xf32, #tpu.memory_space<vmem>>, vector<16x8xf32>
    %cst_60 = arith.constant dense<0.000000e+00> : vector<160x8xf32>
    %58 = tpu.matmul %56, %57, %cst_60 {dimension_numbers = #tpu.dot_dimension_numbers<[1], [0], [0], [1], [0, 0, 1, 1], [], []>} : vector<160x16xf32>, vector<16x8xf32>, vector<160x8xf32> -> vector<160x8xf32>
    %cst_61 = arith.constant 0.000000e+00 : f32
    %59 = vector.broadcast %cst_61 : f32 to vector<160x8xf32>
    %60 = arith.cmpf oge, %58, %59 : vector<160x8xf32>
    %cst_62 = arith.constant 2.000000e-01 : f32
    %61 = vector.broadcast %cst_62 : f32 to vector<160x8xf32>
    %62 = arith.mulf %61, %58 : vector<160x8xf32>
    %63 = arith.select %60, %58, %62 : vector<160x8xi1>, vector<160x8xf32>
    %64 = vector.extract_strided_slice %63 {offsets = [0, 0], sizes = [80, 8], strides = [1, 1]} : vector<160x8xf32> to vector<80x8xf32>
    %c1_63 = arith.constant 1 : index
    %c0_64 = arith.constant 0 : index
    %65 = vector.load %arg11[%c1_63, %c0_64] : memref<164x8xf32, #tpu.memory_space<vmem>>, vector<80x8xf32>
    tpu.vector_store %arg11[%c1_63, %c0_64], %64 {strides = array<i32>} : memref<164x8xf32, #tpu.memory_space<vmem>>, vector<80x8xf32>,
    %66 = vector.extract_strided_slice %63 {offsets = [80, 0], sizes = [80, 8], strides = [1, 1]} : vector<160x8xf32> to vector<80x8xf32>
    %c83 = arith.constant 83 : index
    %c0_65 = arith.constant 0 : index
    %67 = vector.load %arg11[%c83, %c0_65] : memref<164x8xf32, #tpu.memory_space<vmem>>, vector<80x8xf32>
    tpu.vector_store %arg11[%c83, %c0_65], %66 {strides = array<i32>} : memref<164x8xf32, #tpu.memory_space<vmem>>, vector<80x8xf32>,
    %c0_66 = arith.constant 0 : index
    %c0_67 = arith.constant 0 : index
    %68 = tpu.strided_load %arg11[%c0_66, %c0_67] {strides = array<i32: 2, 1>} : memref<164x8xf32, #tpu.memory_space<vmem>>, vector<40x8xf32>
    %c1_68 = arith.constant 1 : index
    %c0_69 = arith.constant 0 : index
    %69 = tpu.strided_load %arg11[%c1_68, %c0_69] {strides = array<i32: 2, 1>} : memref<164x8xf32, #tpu.memory_space<vmem>>, vector<40x8xf32>
    %c2_70 = arith.constant 2 : index
    %c0_71 = arith.constant 0 : index
    %70 = tpu.strided_load %arg11[%c2_70, %c0_71] {strides = array<i32: 2, 1>} : memref<164x8xf32, #tpu.memory_space<vmem>>, vector<40x8xf32>
    %c3_72 = arith.constant 3 : index
    %c0_73 = arith.constant 0 : index
    %71 = tpu.strided_load %arg11[%c3_72, %c0_73] {strides = array<i32: 2, 1>} : memref<164x8xf32, #tpu.memory_space<vmem>>, vector<40x8xf32>
    %72 = tpu.concatenate %68, %69, %70, %71 in 1 : vector<40x8xf32>, vector<40x8xf32>, vector<40x8xf32>, vector<40x8xf32> -> vector<40x32xf32>
    %c82_74 = arith.constant 82 : index
    %c0_75 = arith.constant 0 : index
    %73 = tpu.strided_load %arg11[%c82_74, %c0_75] {strides = array<i32: 2, 1>} : memref<164x8xf32, #tpu.memory_space<vmem>>, vector<40x8xf32>
    %c83_76 = arith.constant 83 : index
    %c0_77 = arith.constant 0 : index
    %74 = tpu.strided_load %arg11[%c83_76, %c0_77] {strides = array<i32: 2, 1>} : memref<164x8xf32, #tpu.memory_space<vmem>>, vector<40x8xf32>
    %c84 = arith.constant 84 : index
    %c0_78 = arith.constant 0 : index
    %75 = tpu.strided_load %arg11[%c84, %c0_78] {strides = array<i32: 2, 1>} : memref<164x8xf32, #tpu.memory_space<vmem>>, vector<40x8xf32>
    %c85 = arith.constant 85 : index
    %c0_79 = arith.constant 0 : index
    %76 = tpu.strided_load %arg11[%c85, %c0_79] {strides = array<i32: 2, 1>} : memref<164x8xf32, #tpu.memory_space<vmem>>, vector<40x8xf32>
    %77 = tpu.concatenate %73, %74, %75, %76 in 1 : vector<40x8xf32>, vector<40x8xf32>, vector<40x8xf32>, vector<40x8xf32> -> vector<40x32xf32>
    %78 = tpu.concatenate %72, %77 in 0 : vector<40x32xf32>, vector<40x32xf32> -> vector<80x32xf32>
    %c0_80 = arith.constant 0 : index
    %c0_81 = arith.constant 0 : index
    %79 = vector.load %arg4[%c0_80, %c0_81] : memref<32x16xf32, #tpu.memory_space<vmem>>, vector<32x16xf32>
    %cst_82 = arith.constant dense<0.000000e+00> : vector<80x16xf32>
    %80 = tpu.matmul %78, %79, %cst_82 {dimension_numbers = #tpu.dot_dimension_numbers<[1], [0], [0], [1], [0, 0, 1, 1], [], []>} : vector<80x32xf32>, vector<32x16xf32>, vector<80x16xf32> -> vector<80x16xf32>
    %cst_83 = arith.constant 0.000000e+00 : f32
    %81 = vector.broadcast %cst_83 : f32 to vector<80x16xf32>
    %82 = arith.cmpf oge, %80, %81 : vector<80x16xf32>
    %cst_84 = arith.constant 2.000000e-01 : f32
    %83 = vector.broadcast %cst_84 : f32 to vector<80x16xf32>
    %84 = arith.mulf %83, %80 : vector<80x16xf32>
    %85 = arith.select %82, %80, %84 : vector<80x16xi1>, vector<80x16xf32>
    %86 = vector.extract_strided_slice %85 {offsets = [0, 0], sizes = [40, 16], strides = [1, 1]} : vector<80x16xf32> to vector<40x16xf32>
    %c1_85 = arith.constant 1 : index
    %c0_86 = arith.constant 0 : index
    %87 = vector.load %arg12[%c1_85, %c0_86] : memref<100x16xf32, #tpu.memory_space<vmem>>, vector<40x16xf32>
    tpu.vector_store %arg12[%c1_85, %c0_86], %86 {strides = array<i32>} : memref<100x16xf32, #tpu.memory_space<vmem>>, vector<40x16xf32>,
    %88 = vector.extract_strided_slice %85 {offsets = [40, 0], sizes = [40, 16], strides = [1, 1]} : vector<80x16xf32> to vector<40x16xf32>
    %c51 = arith.constant 51 : index
    %c0_87 = arith.constant 0 : index
    %89 = vector.load %arg12[%c51, %c0_87] : memref<100x16xf32, #tpu.memory_space<vmem>>, vector<40x16xf32>
    tpu.vector_store %arg12[%c51, %c0_87], %88 {strides = array<i32>} : memref<100x16xf32, #tpu.memory_space<vmem>>, vector<40x16xf32>,
    %c0_88 = arith.constant 0 : index
    %c0_89 = arith.constant 0 : index
    %90 = tpu.strided_load %arg12[%c0_88, %c0_89] {strides = array<i32: 2, 1>} : memref<100x16xf32, #tpu.memory_space<vmem>>, vector<24x16xf32>
    %c1_90 = arith.constant 1 : index
    %c0_91 = arith.constant 0 : index
    %91 = tpu.strided_load %arg12[%c1_90, %c0_91] {strides = array<i32: 2, 1>} : memref<100x16xf32, #tpu.memory_space<vmem>>, vector<24x16xf32>
    %c2_92 = arith.constant 2 : index
    %c0_93 = arith.constant 0 : index
    %92 = tpu.strided_load %arg12[%c2_92, %c0_93] {strides = array<i32: 2, 1>} : memref<100x16xf32, #tpu.memory_space<vmem>>, vector<24x16xf32>
    %c3_94 = arith.constant 3 : index
    %c0_95 = arith.constant 0 : index
    %93 = tpu.strided_load %arg12[%c3_94, %c0_95] {strides = array<i32: 2, 1>} : memref<100x16xf32, #tpu.memory_space<vmem>>, vector<24x16xf32>
    %94 = tpu.concatenate %90, %91, %92, %93 in 1 : vector<24x16xf32>, vector<24x16xf32>, vector<24x16xf32>, vector<24x16xf32> -> vector<24x64xf32>
    %c50_96 = arith.constant 50 : index
    %c0_97 = arith.constant 0 : index
    %95 = tpu.strided_load %arg12[%c50_96, %c0_97] {strides = array<i32: 2, 1>} : memref<100x16xf32, #tpu.memory_space<vmem>>, vector<24x16xf32>
    %c51_98 = arith.constant 51 : index
    %c0_99 = arith.constant 0 : index
    %96 = tpu.strided_load %arg12[%c51_98, %c0_99] {strides = array<i32: 2, 1>} : memref<100x16xf32, #tpu.memory_space<vmem>>, vector<24x16xf32>
    %c52 = arith.constant 52 : index
    %c0_100 = arith.constant 0 : index
    %97 = tpu.strided_load %arg12[%c52, %c0_100] {strides = array<i32: 2, 1>} : memref<100x16xf32, #tpu.memory_space<vmem>>, vector<24x16xf32>
    %c53 = arith.constant 53 : index
    %c0_101 = arith.constant 0 : index
    %98 = tpu.strided_load %arg12[%c53, %c0_101] {strides = array<i32: 2, 1>} : memref<100x16xf32, #tpu.memory_space<vmem>>, vector<24x16xf32>
    %99 = tpu.concatenate %95, %96, %97, %98 in 1 : vector<24x16xf32>, vector<24x16xf32>, vector<24x16xf32>, vector<24x16xf32> -> vector<24x64xf32>
    %100 = tpu.concatenate %94, %99 in 0 : vector<24x64xf32>, vector<24x64xf32> -> vector<48x64xf32>
    %c0_102 = arith.constant 0 : index
    %c0_103 = arith.constant 0 : index
    %101 = vector.load %arg5[%c0_102, %c0_103] : memref<64x32xf32, #tpu.memory_space<vmem>>, vector<64x32xf32>
    %cst_104 = arith.constant dense<0.000000e+00> : vector<48x32xf32>
    %102 = tpu.matmul %100, %101, %cst_104 {dimension_numbers = #tpu.dot_dimension_numbers<[1], [0], [0], [1], [0, 0, 1, 1], [], []>} : vector<48x64xf32>, vector<64x32xf32>, vector<48x32xf32> -> vector<48x32xf32>
    %cst_105 = arith.constant 0.000000e+00 : f32
    %103 = vector.broadcast %cst_105 : f32 to vector<48x32xf32>
    %104 = arith.cmpf oge, %102, %103 : vector<48x32xf32>
    %cst_106 = arith.constant 2.000000e-01 : f32
    %105 = vector.broadcast %cst_106 : f32 to vector<48x32xf32>
    %106 = arith.mulf %105, %102 : vector<48x32xf32>
    %107 = arith.select %104, %102, %106 : vector<48x32xi1>, vector<48x32xf32>
    %108 = vector.extract_strided_slice %107 {offsets = [0, 0], sizes = [20, 32], strides = [1, 1]} : vector<48x32xf32> to vector<20x32xf32>
    %c1_107 = arith.constant 1 : index
    %c0_108 = arith.constant 0 : index
    %109 = vector.load %arg13[%c1_107, %c0_108] : memref<68x32xf32, #tpu.memory_space<vmem>>, vector<20x32xf32>
    tpu.vector_store %arg13[%c1_107, %c0_108], %108 {strides = array<i32>} : memref<68x32xf32, #tpu.memory_space<vmem>>, vector<20x32xf32>,
    %110 = vector.extract_strided_slice %107 {offsets = [24, 0], sizes = [20, 32], strides = [1, 1]} : vector<48x32xf32> to vector<20x32xf32>
    %c35 = arith.constant 35 : index
    %c0_109 = arith.constant 0 : index
    %111 = vector.load %arg13[%c35, %c0_109] : memref<68x32xf32, #tpu.memory_space<vmem>>, vector<20x32xf32>
    tpu.vector_store %arg13[%c35, %c0_109], %110 {strides = array<i32>} : memref<68x32xf32, #tpu.memory_space<vmem>>, vector<20x32xf32>,
    %c0_110 = arith.constant 0 : index
    %c0_111 = arith.constant 0 : index
    %112 = tpu.strided_load %arg13[%c0_110, %c0_111] {strides = array<i32: 2, 1>} : memref<68x32xf32, #tpu.memory_space<vmem>>, vector<16x32xf32>
    %c1_112 = arith.constant 1 : index
    %c0_113 = arith.constant 0 : index
    %113 = tpu.strided_load %arg13[%c1_112, %c0_113] {strides = array<i32: 2, 1>} : memref<68x32xf32, #tpu.memory_space<vmem>>, vector<16x32xf32>
    %c2_114 = arith.constant 2 : index
    %c0_115 = arith.constant 0 : index
    %114 = tpu.strided_load %arg13[%c2_114, %c0_115] {strides = array<i32: 2, 1>} : memref<68x32xf32, #tpu.memory_space<vmem>>, vector<16x32xf32>
    %c3_116 = arith.constant 3 : index
    %c0_117 = arith.constant 0 : index
    %115 = tpu.strided_load %arg13[%c3_116, %c0_117] {strides = array<i32: 2, 1>} : memref<68x32xf32, #tpu.memory_space<vmem>>, vector<16x32xf32>
    %116 = tpu.concatenate %112, %113, %114, %115 in 1 : vector<16x32xf32>, vector<16x32xf32>, vector<16x32xf32>, vector<16x32xf32> -> vector<16x128xf32>
    %c34_118 = arith.constant 34 : index
    %c0_119 = arith.constant 0 : index
    %117 = tpu.strided_load %arg13[%c34_118, %c0_119] {strides = array<i32: 2, 1>} : memref<68x32xf32, #tpu.memory_space<vmem>>, vector<16x32xf32>
    %c35_120 = arith.constant 35 : index
    %c0_121 = arith.constant 0 : index
    %118 = tpu.strided_load %arg13[%c35_120, %c0_121] {strides = array<i32: 2, 1>} : memref<68x32xf32, #tpu.memory_space<vmem>>, vector<16x32xf32>
    %c36 = arith.constant 36 : index
    %c0_122 = arith.constant 0 : index
    %119 = tpu.strided_load %arg13[%c36, %c0_122] {strides = array<i32: 2, 1>} : memref<68x32xf32, #tpu.memory_space<vmem>>, vector<16x32xf32>
    %c37 = arith.constant 37 : index
    %c0_123 = arith.constant 0 : index
    %120 = tpu.strided_load %arg13[%c37, %c0_123] {strides = array<i32: 2, 1>} : memref<68x32xf32, #tpu.memory_space<vmem>>, vector<16x32xf32>
    %121 = tpu.concatenate %117, %118, %119, %120 in 1 : vector<16x32xf32>, vector<16x32xf32>, vector<16x32xf32>, vector<16x32xf32> -> vector<16x128xf32>
    %122 = tpu.concatenate %116, %121 in 0 : vector<16x128xf32>, vector<16x128xf32> -> vector<32x128xf32>
    %c0_124 = arith.constant 0 : index
    %c0_125 = arith.constant 0 : index
    %123 = vector.load %arg6[%c0_124, %c0_125] : memref<128x64xf32, #tpu.memory_space<vmem>>, vector<128x64xf32>
    %cst_126 = arith.constant dense<0.000000e+00> : vector<32x64xf32>
    %124 = tpu.matmul %122, %123, %cst_126 {dimension_numbers = #tpu.dot_dimension_numbers<[1], [0], [0], [1], [0, 0, 1, 1], [], []>} : vector<32x128xf32>, vector<128x64xf32>, vector<32x64xf32> -> vector<32x64xf32>
    %cst_127 = arith.constant 0.000000e+00 : f32
    %125 = vector.broadcast %cst_127 : f32 to vector<32x64xf32>
    %126 = arith.cmpf oge, %124, %125 : vector<32x64xf32>
    %cst_128 = arith.constant 2.000000e-01 : f32
    %127 = vector.broadcast %cst_128 : f32 to vector<32x64xf32>
    %128 = arith.mulf %127, %124 : vector<32x64xf32>
    %129 = arith.select %126, %124, %128 : vector<32x64xi1>, vector<32x64xf32>
    %c0_129 = arith.constant 0 : index
    %c0_130 = arith.constant 0 : index
    %130 = vector.load %arg7[%c0_129, %c0_130] : memref<10x64xf32, #tpu.memory_space<vmem>>, vector<10x64xf32>
    %131 = vector.extract_strided_slice %129 {offsets = [0, 0], sizes = [10, 64], strides = [1, 1]} : vector<32x64xf32> to vector<10x64xf32>
    %c0_131 = arith.constant 0 : index
    %c0_132 = arith.constant 0 : index
    %132 = vector.load %arg9[%c0_131, %c0_132] : memref<20x64xf32, #tpu.memory_space<vmem>>, vector<10x64xf32>
    tpu.vector_store %arg9[%c0_131, %c0_132], %131 {strides = array<i32>} : memref<20x64xf32, #tpu.memory_space<vmem>>, vector<10x64xf32>,
    %133 = arith.mulf %131, %130 : vector<10x64xf32>
    %cst_133 = arith.constant dense<0.000000e+00> : vector<10xf32>
    %134 = vector.multi_reduction <add>, %133, %cst_133 [1] : vector<10x64xf32> to vector<10xf32>
    %135 = vector.shape_cast %134 : vector<10xf32> to vector<10x1xf32>
    %cst_134 = arith.constant dense<0.000000e+00> : vector<1xf32>
    %136 = vector.multi_reduction <add>, %135, %cst_134 [0] : vector<10x1xf32> to vector<1xf32>
    %137 = vector.shape_cast %136 : vector<1xf32> to vector<1x1xf32>
    %cst_135 = arith.constant 0.000000e+00 : f32
    %138 = vector.broadcast %cst_135 : f32 to vector<1x1xf32>
    %139 = arith.subf %138, %137 : vector<1x1xf32>
    %140 = math.exp %139 : vector<1x1xf32>
    %cst_136 = arith.constant 1.000000e+00 : f32
    %141 = vector.broadcast %cst_136 : f32 to vector<1x1xf32>
    %142 = arith.addf %141, %140 : vector<1x1xf32>
    %cst_137 = arith.constant 1.000000e+00 : f32
    %143 = vector.broadcast %cst_137 : f32 to vector<1x1xf32>
    %144 = arith.divf %143, %142 : vector<1x1xf32>
    %c0_138 = arith.constant 0 : index
    %c0_139 = arith.constant 0 : index
    %145 = vector.load %arg8[%c0_138, %c0_139] : memref<2x1xf32, #tpu.memory_space<vmem>>, vector<1x1xf32>
    tpu.vector_store %arg8[%c0_138, %c0_139], %144 {strides = array<i32>} : memref<2x1xf32, #tpu.memory_space<vmem>>, vector<1x1xf32>,
    %146 = vector.extract_strided_slice %129 {offsets = [16, 0], sizes = [10, 64], strides = [1, 1]} : vector<32x64xf32> to vector<10x64xf32>
    %c10 = arith.constant 10 : index
    %c0_140 = arith.constant 0 : index
    %147 = vector.load %arg9[%c10, %c0_140] : memref<20x64xf32, #tpu.memory_space<vmem>>, vector<10x64xf32>
    tpu.vector_store %arg9[%c10, %c0_140], %146 {strides = array<i32>} : memref<20x64xf32, #tpu.memory_space<vmem>>, vector<10x64xf32>,
    %148 = arith.mulf %146, %130 : vector<10x64xf32>
    %cst_141 = arith.constant dense<0.000000e+00> : vector<10xf32>
    %149 = vector.multi_reduction <add>, %148, %cst_141 [1] : vector<10x64xf32> to vector<10xf32>
    %150 = vector.shape_cast %149 : vector<10xf32> to vector<10x1xf32>
    %cst_142 = arith.constant dense<0.000000e+00> : vector<1xf32>
    %151 = vector.multi_reduction <add>, %150, %cst_142 [0] : vector<10x1xf32> to vector<1xf32>
    %152 = vector.shape_cast %151 : vector<1xf32> to vector<1x1xf32>
    %cst_143 = arith.constant 0.000000e+00 : f32
    %153 = vector.broadcast %cst_143 : f32 to vector<1x1xf32>
    %154 = arith.subf %153, %152 : vector<1x1xf32>
    %155 = math.exp %154 : vector<1x1xf32>
    %cst_144 = arith.constant 1.000000e+00 : f32
    %156 = vector.broadcast %cst_144 : f32 to vector<1x1xf32>
    %157 = arith.addf %156, %155 : vector<1x1xf32>
    %cst_145 = arith.constant 1.000000e+00 : f32
    %158 = vector.broadcast %cst_145 : f32 to vector<1x1xf32>
    %159 = arith.divf %158, %157 : vector<1x1xf32>
    %c1_146 = arith.constant 1 : index
    %c0_147 = arith.constant 0 : index
    %160 = vector.load %arg8[%c1_146, %c0_147] : memref<2x1xf32, #tpu.memory_space<vmem>>, vector<1x1xf32>
    tpu.vector_store %arg8[%c1_146, %c0_147], %159 {strides = array<i32>} : memref<2x1xf32, #tpu.memory_space<vmem>>, vector<1x1xf32>,
    return
  }
  func.func @transform_0(%arg0: i32) -> (i32, i32) {
    %c0_i32 = arith.constant 0 : i32
    %c0_i32_0 = arith.constant 0 : i32
    return %arg0, %c0_i32 : i32, i32
  }
  func.func @transform_1(%arg0: i32) -> (i32, i32) {
    %c0_i32 = arith.constant 0 : i32
    %c0_i32_0 = arith.constant 0 : i32
    %c0_i32_1 = arith.constant 0 : i32
    return %c0_i32, %c0_i32_0 : i32, i32
  }
  func.func @transform_2(%arg0: i32) -> (i32, i32) {
    %c0_i32 = arith.constant 0 : i32
    %c0_i32_0 = arith.constant 0 : i32
    %c0_i32_1 = arith.constant 0 : i32
    return %c0_i32, %c0_i32_0 : i32, i32
  }
  func.func @transform_3(%arg0: i32) -> (i32, i32) {
    %c0_i32 = arith.constant 0 : i32
    %c0_i32_0 = arith.constant 0 : i32
    %c0_i32_1 = arith.constant 0 : i32
    return %c0_i32, %c0_i32_0 : i32, i32
  }
  func.func @transform_4(%arg0: i32) -> (i32, i32) {
    %c0_i32 = arith.constant 0 : i32
    %c0_i32_0 = arith.constant 0 : i32
    %c0_i32_1 = arith.constant 0 : i32
    return %c0_i32, %c0_i32_0 : i32, i32
  }
  func.func @transform_5(%arg0: i32) -> (i32, i32) {
    %c0_i32 = arith.constant 0 : i32
    %c0_i32_0 = arith.constant 0 : i32
    %c0_i32_1 = arith.constant 0 : i32
    return %c0_i32, %c0_i32_0 : i32, i32
  }
  func.func @transform_6(%arg0: i32) -> (i32, i32) {
    %c0_i32 = arith.constant 0 : i32
    %c0_i32_0 = arith.constant 0 : i32
    %c0_i32_1 = arith.constant 0 : i32
    return %c0_i32, %c0_i32_0 : i32, i32
  }
  func.func @transform_7(%arg0: i32) -> (i32, i32) {
    %c0_i32 = arith.constant 0 : i32
    %c0_i32_0 = arith.constant 0 : i32
    return %arg0, %c0_i32 : i32, i32
  }
  func.func @transform_8(%arg0: i32) -> (i32, i32) {
    %c0_i32 = arith.constant 0 : i32
    %c0_i32_0 = arith.constant 0 : i32
    return %arg0, %c0_i32 : i32, i32
  }
}

</mosaic_0001>

<bundles_post_ra>
// kernel: discriminator_forward.1
= control target key start
LH: loop header
LB: loop body
LE: loop exit
PB: predicated region body
PF: predicated region fallthrough
CT: control target
= control target key end

     0   :  { %s3907_s9 = smov 8   ;;  %s3908_s10 = smov 4   ;;  %vm454_vm0 = vcmask 31744   ;;  %vm475_vm1 = vcmask 64512   ;;  %vm496_vm2 = vcmask 97280   ;;  %vm40_vm3 = vcmask 130048   ;;  %s5228_s0 = inlined_call_operand.vmem [shape: f32[656,4], index: 0, kind: input, shape index: {}]   ;;  %s5229_s1 = inlined_call_operand.vmem [shape: f32[16,4], index: 1, kind: input, shape index: {}]   ;;  %s5230_s2 = inlined_call_operand.vmem [shape: f32[16,8], index: 2, kind: input, shape index: {}]   ;;  %s5231_s3 = inlined_call_operand.vmem [shape: f32[32,16], index: 3, kind: input, shape index: {}]   ;;  %s5232_s4 = inlined_call_operand.vmem [shape: f32[64,32], index: 4, kind: input, shape index: {}]   ;;  %s5233_s5 = inlined_call_operand.vmem [shape: f32[128,64], index: 5, kind: input, shape index: {}]   ;;  %s5234_s6 = inlined_call_operand.vmem [shape: f32[10,64], index: 6, kind: input, shape index: {}]   ;;  %s5235_s8 = inlined_call_operand.vmem [shape: f32[20,64], index: 8, kind: output, shape index: {1}]   ;;  %s5236_s7 = inlined_call_operand.vmem [shape: f32[2,1], index: 7, kind: output, shape index: {0}]  }
   0x1   :  { %v3301_v0 = vld [vmem:[%s5228_s0 + $0x2] ss:$2 sm:$0xff]  ;;  %v3281_v1 = vld [vmem:[%s5228_s0 + $0x1] ss:$2 sm:$0xff]  ;;  %v3302_v2 = vld [vmem:[%s5228_s0 + $0x12] ss:$2 sm:$0xff] }
   0x2   :  { %314 = vrot.lane.b32.xlu1 %v3301_v0, %s3907_s9  ;;  %234 = vrot.lane.b32.xlu0 %v3281_v1, %s3908_s10  ;;  %v3282_v3 = vld [vmem:[%s5228_s0 + $0x11] ss:$2 sm:$0xff]  ;;  %s3909_s19 = smov 12   ;;  %v3283_v7 = vld [vmem:[%s5228_s0 + $0x21] ss:$2 sm:$0xff]  ;;  %vm28_vm4 = vcmask 24576  }
   0x3   :  { %v3322_v4 = vld [vmem:[%s5228_s0 + $0x13] ss:$2 sm:$0xff]  ;;  %v3321_v5 = vld [vmem:[%s5228_s0 + $0x3] ss:$2 sm:$0xff]  ;;  %v3304_v8 = vld [vmem:[%s5228_s0 + $0x32] ss:$2 sm:$0xff] }
   0x4   :  { %v3284_v6 = vld [vmem:[%s5228_s0 + $0x31] ss:$2 sm:$0xff]  ;;  %v3303_v9 = vld [vmem:[%s5228_s0 + $0x22] ss:$2 sm:$0xff]  ;;  %v3285_v13 = vld [vmem:[%s5228_s0 + $0x41] ss:$2 sm:$0xff] }
   0x5   :  { %v3324_v10 = vld [vmem:[%s5228_s0 + $0x33] ss:$2 sm:$0xff]  ;;  %v3323_v11 = vld [vmem:[%s5228_s0 + $0x23] ss:$2 sm:$0xff]  ;;  %v3306_v17 = vld [vmem:[%s5228_s0 + $0x52] ss:$2 sm:$0xff] }
   0x6   :  { %316 = vrot.lane.b32.xlu1 %v3302_v2, %s3907_s9  ;;  %236 = vrot.lane.b32.xlu0 %v3282_v3, %s3908_s10  ;;  %v3286_v12 = vld [vmem:[%s5228_s0 + $0x51] ss:$2 sm:$0xff]  ;;  %v977_v14 = vld [vmem:[%s5229_s1] sm:$0xff]  ;;  %s3912_s22 = smov 24   ;;  %s3915_s20 = smov 64  }
   0x7   :  { %v978_v15 = vld [vmem:[%s5229_s1 + $0x8] sm:$0xff]  ;;  %v3326_v19 = vld [vmem:[%s5228_s0 + $0x53] ss:$2 sm:$0xff]  ;;  %v3308_v23 = vld [vmem:[%s5228_s0 + $0x72] ss:$2 sm:$0xff] }
   0x8   :  { %v3793_v16 = vpack.c.bf16 %v978_v15, %v977_v14  ;;  %v3305_v18 = vld [vmem:[%s5228_s0 + $0x42] ss:$2 sm:$0xff]  ;;  %v3325_v20 = vld [vmem:[%s5228_s0 + $0x43] ss:$2 sm:$0xff]  ;;  %v3328_v25 = vld [vmem:[%s5228_s0 + $0x73] ss:$2 sm:$0xff] }
   0x9   :  { %v3288_v21 = vld [vmem:[%s5228_s0 + $0x71] ss:$2 sm:$0xff]  ;;  %v3287_v22 = vld [vmem:[%s5228_s0 + $0x61] ss:$2 sm:$0xff]  ;;  %v3307_v24 = vld [vmem:[%s5228_s0 + $0x62] ss:$2 sm:$0xff] }
   0xa   :  { %396 = vrot.lane.b32.xlu1 %v3322_v4, %s3909_s19  ;;  %394 = vrot.lane.b32.xlu0 %v3321_v5, %s3909_s19  ;;  %v3327_v26 = vld [vmem:[%s5228_s0 + $0x63] ss:$2 sm:$0xff]  ;;  %v3310_v29 = vld [vmem:[%s5228_s0 + $0x92] ss:$2 sm:$0xff] }
   0xb   :  { %3794 = vmatprep.subr.bf16.mxu0 %v3793_v16  ;;  %3857 = vmatprep.subr.bf16.mxu1 %v3793_v16  ;;  %v3290_v27 = vld [vmem:[%s5228_s0 + $0x91] ss:$2 sm:$0xff]  ;;  %v3289_v28 = vld [vmem:[%s5228_s0 + $0x81] ss:$2 sm:$0xff]  ;;  %v3309_v30 = vld [vmem:[%s5228_s0 + $0x82] ss:$2 sm:$0xff] }
   0xc   :  { %3796 = vmatpush3.bf16.msra.mxu0 %v3793_v16  ;;  %3858 = vmatpush3.bf16.msra.mxu1 %v3793_v16  ;;  %v3330_v31 = vld [vmem:[%s5228_s0 + $0x93] ss:$2 sm:$0xff]  ;;  %v3329_v32 = vld [vmem:[%s5228_s0 + $0x83] ss:$2 sm:$0xff]  ;;  %v3312_v35 = vld [vmem:[%s5228_s0 + $0xb2] ss:$2 sm:$0xff] }
   0xd   :  { %v3292_v33 = vld [vmem:[%s5228_s0 + $0xb1] ss:$2 sm:$0xff]  ;;  %v3291_v34 = vld [vmem:[%s5228_s0 + $0xa1] ss:$2 sm:$0xff]  ;;  %v3311_v36 = vld [vmem:[%s5228_s0 + $0xa2] ss:$2 sm:$0xff] }
   0xe   :  { %240 = vrot.lane.b32.xlu1 %v3284_v6, %s3908_s10  ;;  %238 = vrot.lane.b32.xlu0 %v3283_v7, %s3908_s10  ;;  %v3332_v37 = vld [vmem:[%s5228_s0 + $0xb3] ss:$2 sm:$0xff]  ;;  %v3331_v38 = vld [vmem:[%s5228_s0 + $0xa3] ss:$2 sm:$0xff] }
   0xf   :  { %v3294_v39 = vld [vmem:[%s5228_s0 + $0xd1] ss:$2 sm:$0xff]  ;;  %v3293_v40 = vld [vmem:[%s5228_s0 + $0xc1] ss:$2 sm:$0xff]  ;;  %v3314_v41 = vld [vmem:[%s5228_s0 + $0xd2] ss:$2 sm:$0xff] }
  0x10   :  { %v3313_v42 = vld [vmem:[%s5228_s0 + $0xc2] ss:$2 sm:$0xff]  ;;  %v3334_v43 = vld [vmem:[%s5228_s0 + $0xd3] ss:$2 sm:$0xff]  ;;  %v3333_v44 = vld [vmem:[%s5228_s0 + $0xc3] ss:$2 sm:$0xff] }
  0x11   :  { %v3296_v45 = vld [vmem:[%s5228_s0 + $0xf1] ss:$2 sm:$0xff]  ;;  %v3295_v46 = vld [vmem:[%s5228_s0 + $0xe1] ss:$2 sm:$0xff]  ;;  %v3316_v47 = vld [vmem:[%s5228_s0 + $0xf2] ss:$2 sm:$0xff] }
  0x12   :  { %320 = vrot.lane.b32.xlu1 %v3304_v8, %s3907_s9  ;;  %318 = vrot.lane.b32.xlu0 %v3303_v9, %s3907_s9  ;;  %v3315_v48 = vld [vmem:[%s5228_s0 + $0xe2] ss:$2 sm:$0xff]  ;;  %v3336_v49 = vld [vmem:[%s5228_s0 + $0xf3] ss:$2 sm:$0xff] }
  0x13   :  { %v3335_v50 = vld [vmem:[%s5228_s0 + $0xe3] ss:$2 sm:$0xff]  ;;  %v3318_v53 = vld [vmem:[%s5228_s0 + $0x112] ss:$2 sm:$0xff]  ;;  %v3317_v54 = vld [vmem:[%s5228_s0 + $0x102] ss:$2 sm:$0xff] }
  0x14   :  { %v3298_v51 = vld [vmem:[%s5228_s0 + $0x111] ss:$2 sm:$0xff]  ;;  %v3297_v52 = vld [vmem:[%s5228_s0 + $0x101] ss:$2 sm:$0xff]  ;;  %v3320_v59 = vld [vmem:[%s5228_s0 + $0x132] ss:$2 sm:$0xff] }
  0x15   :  { %v3338_v55 = vld [vmem:[%s5228_s0 + $0x113] ss:$2 sm:$0xff]  ;;  %v3337_v56 = vld [vmem:[%s5228_s0 + $0x103] ss:$2 sm:$0xff]  ;;  %v3319_v60 = vld [vmem:[%s5228_s0 + $0x122] ss:$2 sm:$0xff] }
  0x16   :  { %400 = vrot.lane.b32.xlu1 %v3324_v10, %s3909_s19  ;;  %398 = vrot.lane.b32.xlu0 %v3323_v11, %s3909_s19  ;;  %v3300_v57 = vld [vmem:[%s5228_s0 + $0x131] ss:$2 sm:$0xff]  ;;  %v3299_v58 = vld [vmem:[%s5228_s0 + $0x121] ss:$2 sm:$0xff] }
  0x17   :  { %v3340_v61 = vld [vmem:[%s5228_s0 + $0x133] ss:$2 sm:$0xff]  ;;  %v3339_v62 = vld [vmem:[%s5228_s0 + $0x123] ss:$2 sm:$0xff]  ;;  %v55_v1 = vld [vmem:[%s5228_s0] ss:$2 sm:$0xff] }
  0x18   :  { %v3262_v2 = vld [vmem:[%s5228_s0 + $0x10] ss:$2 sm:$0xff]  ;;  %v3362_v3 = vld [vmem:[%s5228_s0 + $0x159] ss:$2 sm:$0xff]  ;;  %v3361_v4 = vld [vmem:[%s5228_s0 + $0x149] ss:$2 sm:$0xff] }
  0x19   :  { %v3382_v9 = vld [vmem:[%s5228_s0 + $0x15a] ss:$2 sm:$0xff]  ;;  %v3381_v10 = vld [vmem:[%s5228_s0 + $0x14a] ss:$2 sm:$0xff] }
  0x1a   :  { %244 = vrot.lane.b32.xlu1 %v3286_v12, %s3908_s10  ;;  %242 = vrot.lane.b32.xlu0 %v3285_v13, %s3908_s10 }
  0x1e   :  { %324 = vrot.lane.b32.xlu1 %v3306_v17, %s3907_s9  ;;  %322 = vrot.lane.b32.xlu0 %v3305_v18, %s3907_s9  ;;  %v3402_v17 = vld [vmem:[%s5228_s0 + $0x15b] ss:$2 sm:$0xff]  ;;  %v3401_v18 = vld [vmem:[%s5228_s0 + $0x14b] ss:$2 sm:$0xff] }
  0x22   :  { %404 = vrot.lane.b32.xlu1 %v3326_v19, %s3909_s19  ;;  %402 = vrot.lane.b32.xlu0 %v3325_v20, %s3909_s19 }
  0x26   :  { %248 = vrot.lane.b32.xlu1 %v3288_v21, %s3908_s10  ;;  %246 = vrot.lane.b32.xlu0 %v3287_v22, %s3908_s10  ;;  %v3364_v21 = vld [vmem:[%s5228_s0 + $0x179] ss:$2 sm:$0xff]  ;;  %v3363_v22 = vld [vmem:[%s5228_s0 + $0x169] ss:$2 sm:$0xff] }
  0x2a   :  { %328 = vrot.lane.b32.xlu1 %v3308_v23, %s3907_s9  ;;  %326 = vrot.lane.b32.xlu0 %v3307_v24, %s3907_s9  ;;  %v3264_v23 = vld [vmem:[%s5228_s0 + $0x30] ss:$2 sm:$0xff]  ;;  %v3263_v24 = vld [vmem:[%s5228_s0 + $0x20] ss:$2 sm:$0xff] }
  0x2e   :  { %408 = vrot.lane.b32.xlu1 %v3328_v25, %s3909_s19  ;;  %406 = vrot.lane.b32.xlu0 %v3327_v26, %s3909_s19 }
  0x32   :  { %252 = vrot.lane.b32.xlu1 %v3290_v27, %s3908_s10  ;;  %250 = vrot.lane.b32.xlu0 %v3289_v28, %s3908_s10 }
  0x36   :  { %332 = vrot.lane.b32.xlu1 %v3310_v29, %s3907_s9  ;;  %330 = vrot.lane.b32.xlu0 %v3309_v30, %s3907_s9  ;;  %v3384_v29 = vld [vmem:[%s5228_s0 + $0x17a] ss:$2 sm:$0xff]  ;;  %v3383_v30 = vld [vmem:[%s5228_s0 + $0x16a] ss:$2 sm:$0xff] }
  0x3a   :  { %412 = vrot.lane.b32.xlu1 %v3330_v31, %s3909_s19  ;;  %410 = vrot.lane.b32.xlu0 %v3329_v32, %s3909_s19 }
  0x3e   :  { %256 = vrot.lane.b32.xlu1 %v3292_v33, %s3908_s10  ;;  %254 = vrot.lane.b32.xlu0 %v3291_v34, %s3908_s10 }
  0x42   :  { %336 = vrot.lane.b32.xlu1 %v3312_v35, %s3907_s9  ;;  %334 = vrot.lane.b32.xlu0 %v3311_v36, %s3907_s9 }
  0x46   :  { %416 = vrot.lane.b32.xlu1 %v3332_v37, %s3909_s19  ;;  %414 = vrot.lane.b32.xlu0 %v3331_v38, %s3909_s19  ;;  %v3404_v37 = vld [vmem:[%s5228_s0 + $0x17b] ss:$2 sm:$0xff]  ;;  %v3403_v38 = vld [vmem:[%s5228_s0 + $0x16b] ss:$2 sm:$0xff] }
  0x4a   :  { %260 = vrot.lane.b32.xlu1 %v3294_v39, %s3908_s10  ;;  %258 = vrot.lane.b32.xlu0 %v3293_v40, %s3908_s10 }
  0x4e   :  { %340 = vrot.lane.b32.xlu1 %v3314_v41, %s3907_s9  ;;  %338 = vrot.lane.b32.xlu0 %v3313_v42, %s3907_s9  ;;  %v3366_v41 = vld [vmem:[%s5228_s0 + $0x199] ss:$2 sm:$0xff]  ;;  %v3365_v42 = vld [vmem:[%s5228_s0 + $0x189] ss:$2 sm:$0xff] }
  0x52   :  { %420 = vrot.lane.b32.xlu1 %v3334_v43, %s3909_s19  ;;  %418 = vrot.lane.b32.xlu0 %v3333_v44, %s3909_s19  ;;  %v3266_v43 = vld [vmem:[%s5228_s0 + $0x50] ss:$2 sm:$0xff]  ;;  %v3265_v44 = vld [vmem:[%s5228_s0 + $0x40] ss:$2 sm:$0xff] }
  0x56   :  { %264 = vrot.lane.b32.xlu1 %v3296_v45, %s3908_s10  ;;  %262 = vrot.lane.b32.xlu0 %v3295_v46, %s3908_s10 }
  0x5a   :  { %344 = vrot.lane.b32.xlu1 %v3316_v47, %s3907_s9  ;;  %342 = vrot.lane.b32.xlu0 %v3315_v48, %s3907_s9 }
  0x5e   :  { %424 = vrot.lane.b32.xlu1 %v3336_v49, %s3909_s19  ;;  %422 = vrot.lane.b32.xlu0 %v3335_v50, %s3909_s19  ;;  %v3386_v49 = vld [vmem:[%s5228_s0 + $0x19a] ss:$2 sm:$0xff]  ;;  %v3385_v50 = vld [vmem:[%s5228_s0 + $0x18a] ss:$2 sm:$0xff] }
  0x62   :  { %268 = vrot.lane.b32.xlu1 %v3298_v51, %s3908_s10  ;;  %266 = vrot.lane.b32.xlu0 %v3297_v52, %s3908_s10 }
  0x66   :  { %348 = vrot.lane.b32.xlu1 %v3318_v53, %s3907_s9  ;;  %346 = vrot.lane.b32.xlu0 %v3317_v54, %s3907_s9 }
  0x6a   :  { %428 = vrot.lane.b32.xlu1 %v3338_v55, %s3909_s19  ;;  %426 = vrot.lane.b32.xlu0 %v3337_v56, %s3909_s19 }
  0x6e   :  { %272 = vrot.lane.b32.xlu1 %v3300_v57, %s3908_s10  ;;  %270 = vrot.lane.b32.xlu0 %v3299_v58, %s3908_s10  ;;  %v3406_v57 = vld [vmem:[%s5228_s0 + $0x19b] ss:$2 sm:$0xff]  ;;  %v3405_v58 = vld [vmem:[%s5228_s0 + $0x18b] ss:$2 sm:$0xff] }
  0x72   :  { %352 = vrot.lane.b32.xlu1 %v3320_v59, %s3907_s9  ;;  %350 = vrot.lane.b32.xlu0 %v3319_v60, %s3907_s9 }
  0x74   :  { %v315_v63 = vpop.permute.xlu1 %314  ;;  %v235_v0 = vpop.permute.xlu0 %234 }
  0x75   :  { %v455_v7 = vsel %vm454_vm0, %v55_v1, %v235_v0  ;;  %v3267_v0 = vld [vmem:[%s5228_s0 + $0x60] ss:$2 sm:$0xff] }
  0x76   :  { %432 = vrot.lane.b32.xlu1 %v3340_v61, %s3909_s19  ;;  %430 = vrot.lane.b32.xlu0 %v3339_v62, %s3909_s19  ;;  %v476_v14 = vsel %vm475_vm1, %v455_v7, %v315_v63  ;;  %v3368_v61 = vld [vmem:[%s5228_s0 + $0x1b9] ss:$2 sm:$0xff]  ;;  %v3367_v62 = vld [vmem:[%s5228_s0 + $0x1a9] ss:$2 sm:$0xff] }
  0x77   :  { %v3268_v63 = vld [vmem:[%s5228_s0 + $0x70] ss:$2 sm:$0xff] }
  0x78   :  { %v317_v5 = vpop.permute.xlu1 %316  ;;  %v237_v6 = vpop.permute.xlu0 %236 }
  0x79   :  { %v456_v8 = vsel %vm454_vm0, %v3262_v2, %v237_v6  ;;  %v3387_v6 = vld [vmem:[%s5228_s0 + $0x1aa] ss:$2 sm:$0xff] }
  0x7a   :  { %699 = vrot.lane.b32.xlu1 %v3362_v3, %s3908_s10  ;;  %697 = vrot.lane.b32.xlu0 %v3361_v4, %s3908_s10  ;;  %v477_v12 = vsel %vm475_vm1, %v456_v8, %v317_v5  ;;  %v3388_v5 = vld [vmem:[%s5228_s0 + $0x1ba] ss:$2 sm:$0xff] }
  0x7c   :  { %v397_v11 = vpop.permute.xlu1 %396  ;;  %v395_v13 = vpop.permute.xlu0 %394 }
  0x7d   :  { %v498_v15 = vsel %vm496_vm2, %v477_v12, %v397_v11  ;;  %v497_v16 = vsel %vm496_vm2, %v476_v14, %v395_v13  ;;  %v3408_v13 = vld [vmem:[%s5228_s0 + $0x1bb] ss:$2 sm:$0xff]  ;;  %v3407_v14 = vld [vmem:[%s5228_s0 + $0x1ab] ss:$2 sm:$0xff] }
  0x7e   :  { %779 = vrot.lane.b32.xlu1 %v3382_v9, %s3907_s9  ;;  %777 = vrot.lane.b32.xlu0 %v3381_v10, %s3907_s9 }
  0x7f   :  { %3613 = vmatprep.mubr.msk.f32.mxu0 %vm40_vm3, %v497_v16 }
  0x80   :  { %3614 = vmatmul.mubr.msk.f32.vlgmr.msra.gmra.mrb[0].mxu0 %vm40_vm3, %v498_v15  ;;  %v241_v19 = vpop.permute.xlu1 %240  ;;  %v239_v20 = vpop.permute.xlu0 %238 }
  0x81   :  { %v458_v27 = vsel %vm454_vm0, %v3264_v23, %v241_v19  ;;  %v457_v28 = vsel %vm454_vm0, %v3263_v24, %v239_v20  ;;  %v3270_v19 = vld [vmem:[%s5228_s0 + $0x90] ss:$2 sm:$0xff]  ;;  %v3269_v20 = vld [vmem:[%s5228_s0 + $0x80] ss:$2 sm:$0xff] }
  0x82   :  { %859 = vrot.lane.b32.xlu1 %v3402_v17, %s3909_s19  ;;  %857 = vrot.lane.b32.xlu0 %v3401_v18, %s3909_s19  ;;  %v3370_v17 = vld [vmem:[%s5228_s0 + $0x1d9] ss:$2 sm:$0xff]  ;;  %v3369_v18 = vld [vmem:[%s5228_s0 + $0x1c9] ss:$2 sm:$0xff] }
  0x84   :  { %v321_v25 = vpop.permute.xlu1 %320  ;;  %v319_v26 = vpop.permute.xlu0 %318 }
  0x85   :  { %v479_v31 = vsel %vm475_vm1, %v458_v27, %v321_v25  ;;  %v478_v32 = vsel %vm475_vm1, %v457_v28, %v319_v26  ;;  %v3390_v25 = vld [vmem:[%s5228_s0 + $0x1da] ss:$2 sm:$0xff]  ;;  %v3389_v26 = vld [vmem:[%s5228_s0 + $0x1ca] ss:$2 sm:$0xff] }
  0x86   :  { %703 = vrot.lane.b32.xlu1 %v3364_v21, %s3908_s10  ;;  %701 = vrot.lane.b32.xlu0 %v3363_v22, %s3908_s10 }
  0x88   :  { %v401_v33 = vpop.permute.xlu1 %400  ;;  %v399_v34 = vpop.permute.xlu0 %398 }
  0x89   :  { %v500_v35 = vsel %vm496_vm2, %v479_v31, %v401_v33  ;;  %v499_v36 = vsel %vm496_vm2, %v478_v32, %v399_v34  ;;  %v3410_v33 = vld [vmem:[%s5228_s0 + $0x1db] ss:$2 sm:$0xff]  ;;  %v3409_v34 = vld [vmem:[%s5228_s0 + $0x1cb] ss:$2 sm:$0xff] }
  0x8a   :  { %783 = vrot.lane.b32.xlu1 %v3384_v29, %s3907_s9  ;;  %781 = vrot.lane.b32.xlu0 %v3383_v30, %s3907_s9 }
  0x8b   :  { %3616 = vmatprep.mubr.msk.f32.mxu0 %vm40_vm3, %v499_v36 }
  0x8c   :  { %3617 = vmatmul.mubr.msk.f32.gmra.mrb[2].mxu0 %vm40_vm3, %v500_v35  ;;  %v245_v39 = vpop.permute.xlu1 %244  ;;  %v243_v40 = vpop.permute.xlu0 %242 }
  0x8d   :  { %v460_v47 = vsel %vm454_vm0, %v3266_v43, %v245_v39  ;;  %v459_v48 = vsel %vm454_vm0, %v3265_v44, %v243_v40  ;;  %v3272_v39 = vld [vmem:[%s5228_s0 + $0xb0] ss:$2 sm:$0xff]  ;;  %v3271_v40 = vld [vmem:[%s5228_s0 + $0xa0] ss:$2 sm:$0xff] }
  0x8e   :  { %863 = vrot.lane.b32.xlu1 %v3404_v37, %s3909_s19  ;;  %861 = vrot.lane.b32.xlu0 %v3403_v38, %s3909_s19  ;;  %v3372_v37 = vld [vmem:[%s5228_s0 + $0x1f9] ss:$2 sm:$0xff]  ;;  %v3371_v38 = vld [vmem:[%s5228_s0 + $0x1e9] ss:$2 sm:$0xff] }
  0x90   :  { %v325_v45 = vpop.permute.xlu1 %324  ;;  %v323_v46 = vpop.permute.xlu0 %322 }
  0x91   :  { %v481_v51 = vsel %vm475_vm1, %v460_v47, %v325_v45  ;;  %v480_v52 = vsel %vm475_vm1, %v459_v48, %v323_v46  ;;  %v3392_v45 = vld [vmem:[%s5228_s0 + $0x1fa] ss:$2 sm:$0xff]  ;;  %v3391_v46 = vld [vmem:[%s5228_s0 + $0x1ea] ss:$2 sm:$0xff] }
  0x92   :  { %707 = vrot.lane.b32.xlu1 %v3366_v41, %s3908_s10  ;;  %705 = vrot.lane.b32.xlu0 %v3365_v42, %s3908_s10 }
  0x94   :  { %v405_v53 = vpop.permute.xlu1 %404  ;;  %v403_v54 = vpop.permute.xlu0 %402 }
  0x95   :  { %v502_v55 = vsel %vm496_vm2, %v481_v51, %v405_v53  ;;  %v501_v56 = vsel %vm496_vm2, %v480_v52, %v403_v54  ;;  %v3412_v53 = vld [vmem:[%s5228_s0 + $0x1fb] ss:$2 sm:$0xff]  ;;  %v3411_v54 = vld [vmem:[%s5228_s0 + $0x1eb] ss:$2 sm:$0xff] }
  0x96   :  { %787 = vrot.lane.b32.xlu1 %v3386_v49, %s3907_s9  ;;  %785 = vrot.lane.b32.xlu0 %v3385_v50, %s3907_s9 }
  0x97   :  { %3619 = vmatprep.mubr.msk.f32.mxu0 %vm40_vm3, %v501_v56 }
  0x98   :  { %3620 = vmatmul.mubr.msk.f32.gmra.mrb[4].mxu0 %vm40_vm3, %v502_v55  ;;  %v249_v59 = vpop.permute.xlu1 %248  ;;  %v247_v60 = vpop.permute.xlu0 %246 }
  0x99   :  { %v462_v3 = vsel %vm454_vm0, %v3268_v63, %v249_v59  ;;  %v461_v4 = vsel %vm454_vm0, %v3267_v0, %v247_v60  ;;  %v3274_v59 = vld [vmem:[%s5228_s0 + $0xd0] ss:$2 sm:$0xff]  ;;  %v3273_v60 = vld [vmem:[%s5228_s0 + $0xc0] ss:$2 sm:$0xff] }
  0x9a   :  { %867 = vrot.lane.b32.xlu1 %v3406_v57, %s3909_s19  ;;  %865 = vrot.lane.b32.xlu0 %v3405_v58, %s3909_s19  ;;  %v3374_v57 = vld [vmem:[%s5228_s0 + $0x219] ss:$2 sm:$0xff]  ;;  %v3373_v58 = vld [vmem:[%s5228_s0 + $0x209] ss:$2 sm:$0xff] }
  0x9c   :  { %v329_v1 = vpop.permute.xlu1 %328  ;;  %v327_v2 = vpop.permute.xlu0 %326 }
  0x9d   :  { %v483_v7 = vsel %vm475_vm1, %v462_v3, %v329_v1  ;;  %v482_v8 = vsel %vm475_vm1, %v461_v4, %v327_v2  ;;  %v3394_v1 = vld [vmem:[%s5228_s0 + $0x21a] ss:$2 sm:$0xff]  ;;  %v3393_v2 = vld [vmem:[%s5228_s0 + $0x20a] ss:$2 sm:$0xff] }
  0x9e   :  { %711 = vrot.lane.b32.xlu1 %v3368_v61, %s3908_s10  ;;  %709 = vrot.lane.b32.xlu0 %v3367_v62, %s3908_s10 }
  0xa0   :  { %v409_v9 = vpop.permute.xlu1 %408  ;;  %v407_v10 = vpop.permute.xlu0 %406 }
  0xa1   :  { %v504_v11 = vsel %vm496_vm2, %v483_v7, %v409_v9  ;;  %v503_v12 = vsel %vm496_vm2, %v482_v8, %v407_v10  ;;  %v3414_v9 = vld [vmem:[%s5228_s0 + $0x21b] ss:$2 sm:$0xff]  ;;  %v3413_v10 = vld [vmem:[%s5228_s0 + $0x20b] ss:$2 sm:$0xff] }
  0xa2   :  { %791 = vrot.lane.b32.xlu1 %v3388_v5, %s3907_s9  ;;  %789 = vrot.lane.b32.xlu0 %v3387_v6, %s3907_s9 }
  0xa3   :  { %3622 = vmatprep.mubr.msk.f32.mxu0 %vm40_vm3, %v503_v12 }
  0xa4   :  { %3623 = vmatmul.mubr.msk.f32.gmra.mrb[6].mxu0 %vm40_vm3, %v504_v11  ;;  %v253_v15 = vpop.permute.xlu1 %252  ;;  %v251_v16 = vpop.permute.xlu0 %250 }
  0xa5   :  { %v464_v23 = vsel %vm454_vm0, %v3270_v19, %v253_v15  ;;  %v463_v24 = vsel %vm454_vm0, %v3269_v20, %v251_v16  ;;  %v3276_v15 = vld [vmem:[%s5228_s0 + $0xf0] ss:$2 sm:$0xff]  ;;  %v3275_v16 = vld [vmem:[%s5228_s0 + $0xe0] ss:$2 sm:$0xff] }
  0xa6   :  { %871 = vrot.lane.b32.xlu1 %v3408_v13, %s3909_s19  ;;  %869 = vrot.lane.b32.xlu0 %v3407_v14, %s3909_s19  ;;  %v3377_v13 = vld [vmem:[%s5228_s0 + $0x249] ss:$2 sm:$0xff] }
  0xa7   :  { %v3375_v14 = vld [vmem:[%s5228_s0 + $0x229] ss:$2 sm:$0xff] }
  0xa8   :  { %v333_v21 = vpop.permute.xlu1 %332  ;;  %v331_v22 = vpop.permute.xlu0 %330 }
  0xa9   :  { %v485_v27 = vsel %vm475_vm1, %v464_v23, %v333_v21  ;;  %v484_v28 = vsel %vm475_vm1, %v463_v24, %v331_v22  ;;  %v3378_v21 = vld [vmem:[%s5228_s0 + $0x259] ss:$2 sm:$0xff] }
  0xaa   :  { %715 = vrot.lane.b32.xlu1 %v3370_v17, %s3908_s10  ;;  %713 = vrot.lane.b32.xlu0 %v3369_v18, %s3908_s10  ;;  %v3376_v22 = vld [vmem:[%s5228_s0 + $0x239] ss:$2 sm:$0xff] }
  0xac   :  { %v413_v29 = vpop.permute.xlu1 %412  ;;  %v411_v30 = vpop.permute.xlu0 %410 }
  0xad   :  { %v506_v31 = vsel %vm496_vm2, %v485_v27, %v413_v29  ;;  %v505_v32 = vsel %vm496_vm2, %v484_v28, %v411_v30  ;;  %v3397_v29 = vld [vmem:[%s5228_s0 + $0x24a] ss:$2 sm:$0xff] }
  0xae   :  { %795 = vrot.lane.b32.xlu1 %v3390_v25, %s3907_s9  ;;  %793 = vrot.lane.b32.xlu0 %v3389_v26, %s3907_s9  ;;  %v3395_v30 = vld [vmem:[%s5228_s0 + $0x22a] ss:$2 sm:$0xff] }
  0xaf   :  { %3625 = vmatprep.mubr.msk.f32.mxu0 %vm40_vm3, %v505_v32 }
  0xb0   :  { %3626 = vmatmul.mubr.msk.f32.gmra.mrb[8].mxu0 %vm40_vm3, %v506_v31  ;;  %v257_v35 = vpop.permute.xlu1 %256  ;;  %v255_v36 = vpop.permute.xlu0 %254 }
  0xb1   :  { %v466_v43 = vsel %vm454_vm0, %v3272_v39, %v257_v35  ;;  %v465_v44 = vsel %vm454_vm0, %v3271_v40, %v255_v36  ;;  %v3278_v35 = vld [vmem:[%s5228_s0 + $0x110] ss:$2 sm:$0xff]  ;;  %v3277_v36 = vld [vmem:[%s5228_s0 + $0x100] ss:$2 sm:$0xff]  ;;  %v3910_v39 = vmov 0.0  }
  0xb2   :  { %875 = vrot.lane.b32.xlu1 %v3410_v33, %s3909_s19  ;;  %873 = vrot.lane.b32.xlu0 %v3409_v34, %s3909_s19  ;;  %v3398_v33 = vld [vmem:[%s5228_s0 + $0x25a] ss:$2 sm:$0xff]  ;;  %29 = vst.msk [vmem:[#allocation2] sm:$0x1] %vm28_vm4, %v3910_v39  ;;  %30 = vst.msk [vmem:[#allocation2 + $0xa1] sm:$0x1] %vm28_vm4, %v3910_v39 }
  0xb3   :  { %v3396_v34 = vld [vmem:[%s5228_s0 + $0x23a] ss:$2 sm:$0xff]  ;;  %31 = vst.msk [vmem:[#allocation2 + $0xa2] sm:$0x1] %vm28_vm4, %v3910_v39  ;;  %32 = vst.msk [vmem:[#allocation2 + $0x143] sm:$0x1] %vm28_vm4, %v3910_v39 }
  0xb4   :  { %v337_v41 = vpop.permute.xlu1 %336  ;;  %v335_v42 = vpop.permute.xlu0 %334  ;;  %41 = vst.msk [vmem:[#allocation4 + $0x29] sm:$0xff] %vm40_vm3, %v3910_v39  ;;  %44 = vst.msk [vmem:[#allocation4 + $0x5b] sm:$0xff] %vm40_vm3, %v3910_v39 }
  0xb5   :  { %v487_v47 = vsel %vm475_vm1, %v466_v43, %v337_v41  ;;  %v486_v48 = vsel %vm475_vm1, %v465_v44, %v335_v42  ;;  %v3417_v42 = vld [vmem:[%s5228_s0 + $0x24b] ss:$2 sm:$0xff] }
  0xb6   :  { %719 = vrot.lane.b32.xlu1 %v3372_v37, %s3908_s10  ;;  %717 = vrot.lane.b32.xlu0 %v3371_v38, %s3908_s10  ;;  %v3415_v43 = vld [vmem:[%s5228_s0 + $0x22b] ss:$2 sm:$0xff] }
  0xb8   :  { %v417_v49 = vpop.permute.xlu1 %416  ;;  %v415_v50 = vpop.permute.xlu0 %414 }
  0xb9   :  { %v508_v51 = vsel %vm496_vm2, %v487_v47, %v417_v49  ;;  %v507_v52 = vsel %vm496_vm2, %v486_v48, %v415_v50  ;;  %v3418_v50 = vld [vmem:[%s5228_s0 + $0x25b] ss:$2 sm:$0xff] }
  0xba   :  { %799 = vrot.lane.b32.xlu1 %v3392_v45, %s3907_s9  ;;  %797 = vrot.lane.b32.xlu0 %v3391_v46, %s3907_s9 }
  0xbb   :  { %3628 = vmatprep.mubr.msk.f32.mxu0 %vm40_vm3, %v507_v52 }
  0xbc   :  { %3629 = vmatmul.mubr.msk.f32.gmra.mrb[10].mxu0 %vm40_vm3, %v508_v51  ;;  %v261_v55 = vpop.permute.xlu1 %260  ;;  %v259_v56 = vpop.permute.xlu0 %258  ;;  %v3416_v51 = vld [vmem:[%s5228_s0 + $0x23b] ss:$2 sm:$0xff] }
  0xbd   :  { %v468_v63 = vsel %vm454_vm0, %v3274_v59, %v261_v55  ;;  %v467_v0 = vsel %vm454_vm0, %v3273_v60, %v259_v56  ;;  %v3379_v55 = vld [vmem:[%s5228_s0 + $0x269] ss:$2 sm:$0xff]  ;;  %v3280_v56 = vld [vmem:[%s5228_s0 + $0x130] ss:$2 sm:$0xff] }
  0xbe   :  { %879 = vrot.lane.b32.xlu1 %v3412_v53, %s3909_s19  ;;  %877 = vrot.lane.b32.xlu0 %v3411_v54, %s3909_s19  ;;  %v3380_v54 = vld [vmem:[%s5228_s0 + $0x279] ss:$2 sm:$0xff] }
  0xc0   :  { %v341_v61 = vpop.permute.xlu1 %340  ;;  %v339_v62 = vpop.permute.xlu0 %338 }
  0xc1   :  { %v489_v3 = vsel %vm475_vm1, %v468_v63, %v341_v61  ;;  %v488_v4 = vsel %vm475_vm1, %v467_v0, %v339_v62  ;;  %v3400_v62 = vld [vmem:[%s5228_s0 + $0x27a] ss:$2 sm:$0xff]  ;;  %v3399_v63 = vld [vmem:[%s5228_s0 + $0x26a] ss:$2 sm:$0xff] }
  0xc2   :  { %723 = vrot.lane.b32.xlu1 %v3374_v57, %s3908_s10  ;;  %721 = vrot.lane.b32.xlu0 %v3373_v58, %s3908_s10  ;;  %v3279_v57 = vld [vmem:[%s5228_s0 + $0x120] ss:$2 sm:$0xff] }
  0xc4   :  { %v421_v5 = vpop.permute.xlu1 %420  ;;  %v419_v6 = vpop.permute.xlu0 %418 }
  0xc5   :  { %v510_v7 = vsel %vm496_vm2, %v489_v3, %v421_v5  ;;  %v509_v8 = vsel %vm496_vm2, %v488_v4, %v419_v6  ;;  %v3420_v6 = vld [vmem:[%s5228_s0 + $0x27b] ss:$2 sm:$0xff] }
  0xc6   :  { %803 = vrot.lane.b32.xlu1 %v3394_v1, %s3907_s9  ;;  %801 = vrot.lane.b32.xlu0 %v3393_v2, %s3907_s9 }
  0xc7   :  { %3631 = vmatprep.mubr.msk.f32.mxu0 %vm40_vm3, %v509_v8 }
  0xc8   :  { %3632 = vmatmul.mubr.msk.f32.gmra.mrb[12].mxu0 %vm40_vm3, %v510_v7  ;;  %v265_v11 = vpop.permute.xlu1 %264  ;;  %v263_v12 = vpop.permute.xlu0 %262  ;;  %v3419_v7 = vld [vmem:[%s5228_s0 + $0x26b] ss:$2 sm:$0xff] }
  0xc9   :  { %v470_v19 = vsel %vm454_vm0, %v3276_v15, %v265_v11  ;;  %v469_v20 = vsel %vm454_vm0, %v3275_v16, %v263_v12  ;;  %v3341_v11 = vld [vmem:[%s5228_s0 + $0x148] ss:$2 sm:$0xff] }
  0xca   :  { %883 = vrot.lane.b32.xlu1 %v3414_v9, %s3909_s19  ;;  %881 = vrot.lane.b32.xlu0 %v3413_v10, %s3909_s19  ;;  %v3342_v10 = vld [vmem:[%s5228_s0 + $0x158] ss:$2 sm:$0xff] }
  0xcc   :  { %v345_v17 = vpop.permute.xlu1 %344  ;;  %v343_v18 = vpop.permute.xlu0 %342 }
  0xcd   :  { %v491_v23 = vsel %vm475_vm1, %v470_v19, %v345_v17  ;;  %v490_v24 = vsel %vm475_vm1, %v469_v20, %v343_v18 }
  0xce   :  { %729 = vrot.lane.b32.xlu1 %v3377_v13, %s3908_s10  ;;  %725 = vrot.lane.b32.xlu0 %v3375_v14, %s3908_s10 }
  0xd0   :  { %v425_v25 = vpop.permute.xlu1 %424  ;;  %v423_v26 = vpop.permute.xlu0 %422 }
  0xd1   :  { %v512_v27 = vsel %vm496_vm2, %v491_v23, %v425_v25  ;;  %v511_v28 = vsel %vm496_vm2, %v490_v24, %v423_v26  ;;  %v3344_v24 = vld [vmem:[%s5228_s0 + $0x178] ss:$2 sm:$0xff]  ;;  %v3343_v25 = vld [vmem:[%s5228_s0 + $0x168] ss:$2 sm:$0xff] }
  0xd2   :  { %731 = vrot.lane.b32.xlu1 %v3378_v21, %s3908_s10  ;;  %727 = vrot.lane.b32.xlu0 %v3376_v22, %s3908_s10 }
  0xd3   :  { %3634 = vmatprep.mubr.msk.f32.mxu0 %vm40_vm3, %v511_v28 }
  0xd4   :  { %3635 = vmatmul.mubr.msk.f32.gmra.mrb[14].mxu0 %vm40_vm3, %v512_v27  ;;  %v269_v31 = vpop.permute.xlu1 %268  ;;  %v267_v32 = vpop.permute.xlu0 %266 }
  0xd5   :  { %v472_v40 = vsel %vm454_vm0, %v3278_v35, %v269_v31  ;;  %v471_v41 = vsel %vm454_vm0, %v3277_v36, %v267_v32 }
  0xd6   :  { %809 = vrot.lane.b32.xlu1 %v3397_v29, %s3907_s9  ;;  %805 = vrot.lane.b32.xlu0 %v3395_v30, %s3907_s9 }
  0xd8   :  { %v349_v37 = vpop.permute.xlu1 %348  ;;  %v347_v38 = vpop.permute.xlu0 %346 }
  0xd9   :  { %v493_v44 = vsel %vm475_vm1, %v472_v40, %v349_v37  ;;  %v492_v45 = vsel %vm475_vm1, %v471_v41, %v347_v38  ;;  %v3346_v38 = vld [vmem:[%s5228_s0 + $0x198] ss:$2 sm:$0xff]  ;;  %v3345_v40 = vld [vmem:[%s5228_s0 + $0x188] ss:$2 sm:$0xff] }
  0xda   :  { %811 = vrot.lane.b32.xlu1 %v3398_v33, %s3907_s9  ;;  %807 = vrot.lane.b32.xlu0 %v3396_v34, %s3907_s9 }
  0xdc   :  { %v429_v46 = vpop.permute.xlu1 %428  ;;  %v427_v47 = vpop.permute.xlu0 %426 }
  0xdd   :  { %v514_v48 = vsel %vm496_vm2, %v493_v44, %v429_v46  ;;  %v513_v49 = vsel %vm496_vm2, %v492_v45, %v427_v47 }
  0xde   :  { %889 = vrot.lane.b32.xlu1 %v3417_v42, %s3909_s19  ;;  %885 = vrot.lane.b32.xlu0 %v3415_v43, %s3909_s19 }
  0xdf   :  { %3637 = vmatprep.mubr.msk.f32.mxu0 %vm40_vm3, %v513_v49 }
  0xe0   :  { %3638 = vmatmul.mubr.msk.f32.gmra.mrb[16].mxu0 %vm40_vm3, %v514_v48  ;;  %v273_v52 = vpop.permute.xlu1 %272  ;;  %v271_v53 = vpop.permute.xlu0 %270 }
  0xe1   :  { %v474_v60 = vsel %vm454_vm0, %v3280_v56, %v273_v52  ;;  %v473_v61 = vsel %vm454_vm0, %v3279_v57, %v271_v53  ;;  %v3348_v53 = vld [vmem:[%s5228_s0 + $0x1b8] ss:$2 sm:$0xff] }
  0xe2   :  { %891 = vrot.lane.b32.xlu1 %v3418_v50, %s3909_s19  ;;  %887 = vrot.lane.b32.xlu0 %v3416_v51, %s3909_s19 }
  0xe4   :  { %v353_v58 = vpop.permute.xlu1 %352  ;;  %v351_v59 = vpop.permute.xlu0 %350 }
  0xe5   :  { %v495_v0 = vsel %vm475_vm1, %v474_v60, %v353_v58  ;;  %v494_v1 = vsel %vm475_vm1, %v473_v61, %v351_v59 }
  0xe6   :  { %735 = vrot.lane.b32.xlu1 %v3380_v54, %s3908_s10  ;;  %733 = vrot.lane.b32.xlu0 %v3379_v55, %s3908_s10  ;;  %v3347_v54 = vld [vmem:[%s5228_s0 + $0x1a8] ss:$2 sm:$0xff] }
  0xe8   :  { %v433_v2 = vpop.permute.xlu1 %432  ;;  %v431_v3 = vpop.permute.xlu0 %430 }
  0xe9   :  { %v516_v4 = vsel %vm496_vm2, %v495_v0, %v433_v2  ;;  %v515_v5 = vsel %vm496_vm2, %v494_v1, %v431_v3  ;;  %v3350_v3 = vld [vmem:[%s5228_s0 + $0x1d8] ss:$2 sm:$0xff] }
  0xea   :  { %815 = vrot.lane.b32.xlu1 %v3400_v62, %s3907_s9  ;;  %813 = vrot.lane.b32.xlu0 %v3399_v63, %s3907_s9 }
  0xeb   :  { %3640 = vmatprep.mubr.msk.f32.mxu0 %vm40_vm3, %v515_v5 }
  0xec   :  { %3641 = vmatmul.mubr.msk.f32.gmra.mrb[18].mxu0 %vm40_vm3, %v516_v4  ;;  %v700_v8 = vpop.permute.xlu1 %699  ;;  %v698_v9 = vpop.permute.xlu0 %697  ;;  %v3349_v4 = vld [vmem:[%s5228_s0 + $0x1c8] ss:$2 sm:$0xff] }
  0xed   :  { %v918_v14 = vsel %vm454_vm0, %v3342_v10, %v700_v8  ;;  %v917_v15 = vsel %vm454_vm0, %v3341_v11, %v698_v9 }
  0xee   :  { %895 = vrot.lane.b32.xlu1 %v3420_v6, %s3909_s19  ;;  %893 = vrot.lane.b32.xlu0 %v3419_v7, %s3909_s19 }
  0xf0   :  { %v780_v12 = vpop.permute.xlu1 %779  ;;  %v778_v13 = vpop.permute.xlu0 %777 }
  0xf1   :  { %v938_v16 = vsel %vm475_vm1, %v918_v14, %v780_v12  ;;  %v937_v17 = vsel %vm475_vm1, %v917_v15, %v778_v13 }
  0xf4   :  { %v860_v18 = vpop.permute.xlu1 %859  ;;  %v858_v19 = vpop.permute.xlu0 %857 }
  0xf5   :  { %v958_v20 = vsel %vm496_vm2, %v938_v16, %v860_v18  ;;  %v957_v21 = vsel %vm496_vm2, %v937_v17, %v858_v19  ;;  %v3352_v17 = vld [vmem:[%s5228_s0 + $0x1f8] ss:$2 sm:$0xff]  ;;  %v3351_v18 = vld [vmem:[%s5228_s0 + $0x1e8] ss:$2 sm:$0xff] }
  0xf6   :  { %3643 = vmatprep.mubr.msk.f32.mxu0 %vm40_vm3, %v957_v21 }
  0xf7   :  { %3644 = vmatmul.mubr.msk.f32.gmra.mrb[20].mxu0 %vm40_vm3, %v958_v20 }
  0xf8   :  { %v704_v22 = vpop.permute.xlu1 %703  ;;  %v702_v23 = vpop.permute.xlu0 %701 }
  0xf9   :  { %v920_v28 = vsel %vm454_vm0, %v3344_v24, %v704_v22  ;;  %v919_v29 = vsel %vm454_vm0, %v3343_v25, %v702_v23 }
  0xfc   :  { %v784_v26 = vpop.permute.xlu1 %783  ;;  %v782_v27 = vpop.permute.xlu0 %781 }
  0xfd   :  { %v940_v30 = vsel %vm475_vm1, %v920_v28, %v784_v26  ;;  %v939_v31 = vsel %vm475_vm1, %v919_v29, %v782_v27 }
 0x100   :  { %v864_v32 = vpop.permute.xlu1 %863  ;;  %v862_v33 = vpop.permute.xlu0 %861 }
 0x101   :  { %v960_v34 = vsel %vm496_vm2, %v940_v30, %v864_v32  ;;  %v959_v35 = vsel %vm496_vm2, %v939_v31, %v862_v33  ;;  %v3354_v31 = vld [vmem:[%s5228_s0 + $0x218] ss:$2 sm:$0xff]  ;;  %v3353_v32 = vld [vmem:[%s5228_s0 + $0x208] ss:$2 sm:$0xff] }
 0x102   :  { %3646 = vmatprep.mubr.msk.f32.mxu0 %vm40_vm3, %v959_v35 }
 0x103   :  { %3647 = vmatmul.mubr.msk.f32.gmra.mrb[22].mxu0 %vm40_vm3, %v960_v34 }
 0x104   :  { %v708_v36 = vpop.permute.xlu1 %707  ;;  %v706_v37 = vpop.permute.xlu0 %705 }
 0x105   :  { %v922_v43 = vsel %vm454_vm0, %v3346_v38, %v708_v36  ;;  %v921_v44 = vsel %vm454_vm0, %v3345_v40, %v706_v37 }
 0x108   :  { %v788_v41 = vpop.permute.xlu1 %787  ;;  %v786_v42 = vpop.permute.xlu0 %785 }
 0x109   :  { %v942_v45 = vsel %vm475_vm1, %v922_v43, %v788_v41  ;;  %v941_v46 = vsel %vm475_vm1, %v921_v44, %v786_v42 }
 0x10c   :  { %v868_v47 = vpop.permute.xlu1 %867  ;;  %v866_v48 = vpop.permute.xlu0 %865 }
 0x10d   :  { %v962_v49 = vsel %vm496_vm2, %v942_v45, %v868_v47  ;;  %v961_v50 = vsel %vm496_vm2, %v941_v46, %v866_v48 }
 0x10e   :  { %3649 = vmatprep.mubr.msk.f32.mxu0 %vm40_vm3, %v961_v50  ;;  %v3357_v50 = vld [vmem:[%s5228_s0 + $0x248] ss:$2 sm:$0xff] }
 0x10f   :  { %3650 = vmatmul.mubr.msk.f32.gmra.mrb[24].mxu0 %vm40_vm3, %v962_v49 }
 0x110   :  { %v712_v51 = vpop.permute.xlu1 %711  ;;  %v710_v52 = vpop.permute.xlu0 %709 }
 0x111   :  { %v924_v57 = vsel %vm454_vm0, %v3348_v53, %v712_v51  ;;  %v923_v58 = vsel %vm454_vm0, %v3347_v54, %v710_v52  ;;  %v3355_v51 = vld [vmem:[%s5228_s0 + $0x228] ss:$2 sm:$0xff] }
 0x114   :  { %v792_v55 = vpop.permute.xlu1 %791  ;;  %v790_v56 = vpop.permute.xlu0 %789 }
 0x115   :  { %v944_v59 = vsel %vm475_vm1, %v924_v57, %v792_v55  ;;  %v943_v60 = vsel %vm475_vm1, %v923_v58, %v790_v56  ;;  %v3358_v56 = vld [vmem:[%s5228_s0 + $0x258] ss:$2 sm:$0xff] }
 0x118   :  { %v872_v61 = vpop.permute.xlu1 %871  ;;  %v870_v62 = vpop.permute.xlu0 %869 }
 0x119   :  { %v964_v63 = vsel %vm496_vm2, %v944_v59, %v872_v61  ;;  %v963_v0 = vsel %vm496_vm2, %v943_v60, %v870_v62  ;;  %v3356_v61 = vld [vmem:[%s5228_s0 + $0x238] ss:$2 sm:$0xff] }
 0x11a   :  { %3652 = vmatprep.mubr.msk.f32.mxu0 %vm40_vm3, %v963_v0 }
 0x11b   :  { %3653 = vmatmul.mubr.msk.f32.gmra.mrb[26].mxu0 %vm40_vm3, %v964_v63 }
 0x11c   :  { %v716_v1 = vpop.permute.xlu1 %715  ;;  %v714_v2 = vpop.permute.xlu0 %713 }
 0x11d   :  { %v926_v7 = vsel %vm454_vm0, %v3350_v3, %v716_v1  ;;  %v925_v8 = vsel %vm454_vm0, %v3349_v4, %v714_v2 }
 0x120   :  { %v796_v5 = vpop.permute.xlu1 %795  ;;  %v794_v6 = vpop.permute.xlu0 %793 }
 0x121   :  { %v946_v9 = vsel %vm475_vm1, %v926_v7, %v796_v5  ;;  %v945_v10 = vsel %vm475_vm1, %v925_v8, %v794_v6 }
 0x124   :  { %v876_v11 = vpop.permute.xlu1 %875  ;;  %v874_v12 = vpop.permute.xlu0 %873 }
 0x125   :  { %v966_v13 = vsel %vm496_vm2, %v946_v9, %v876_v11  ;;  %v965_v14 = vsel %vm496_vm2, %v945_v10, %v874_v12 }
 0x126   :  { %3655 = vmatprep.mubr.msk.f32.mxu0 %vm40_vm3, %v965_v14 }
 0x127   :  { %3656 = vmatmul.mubr.msk.f32.gmra.mrb[28].mxu0 %vm40_vm3, %v966_v13 }
 0x128   :  { %v720_v15 = vpop.permute.xlu1 %719  ;;  %v718_v16 = vpop.permute.xlu0 %717 }
 0x129   :  { %v928_v21 = vsel %vm454_vm0, %v3352_v17, %v720_v15  ;;  %v927_v22 = vsel %vm454_vm0, %v3351_v18, %v718_v16  ;;  %v3360_v16 = vld [vmem:[%s5228_s0 + $0x278] ss:$2 sm:$0xff]  ;;  %v3359_v18 = vld [vmem:[%s5228_s0 + $0x268] ss:$2 sm:$0xff] }
 0x12c   :  { %v800_v19 = vpop.permute.xlu1 %799  ;;  %v798_v20 = vpop.permute.xlu0 %797 }
 0x12d   :  { %v948_v23 = vsel %vm475_vm1, %v928_v21, %v800_v19  ;;  %v947_v24 = vsel %vm475_vm1, %v927_v22, %v798_v20 }
 0x130   :  { %v880_v25 = vpop.permute.xlu1 %879  ;;  %v878_v26 = vpop.permute.xlu0 %877 }
 0x131   :  { %v968_v27 = vsel %vm496_vm2, %v948_v23, %v880_v25  ;;  %v967_v28 = vsel %vm496_vm2, %v947_v24, %v878_v26 }
 0x132   :  { %3658 = vmatprep.mubr.msk.f32.mxu0 %vm40_vm3, %v967_v28 }
 0x133   :  { %3659 = vmatmul.mubr.msk.f32.gmra.mrb[30].mxu0 %vm40_vm3, %v968_v27 }
 0x134   :  { %v724_v29 = vpop.permute.xlu1 %723  ;;  %v722_v30 = vpop.permute.xlu0 %721 }
 0x135   :  { %v930_v35 = vsel %vm454_vm0, %v3354_v31, %v724_v29  ;;  %v929_v36 = vsel %vm454_vm0, %v3353_v32, %v722_v30 }
 0x138   :  { %v804_v33 = vpop.permute.xlu1 %803  ;;  %v802_v34 = vpop.permute.xlu0 %801 }
 0x139   :  { %v950_v37 = vsel %vm475_vm1, %v930_v35, %v804_v33  ;;  %v949_v38 = vsel %vm475_vm1, %v929_v36, %v802_v34 }
 0x13c   :  { %v884_v40 = vpop.permute.xlu1 %883  ;;  %v882_v41 = vpop.permute.xlu0 %881 }
 0x13d   :  { %v970_v42 = vsel %vm496_vm2, %v950_v37, %v884_v40  ;;  %v969_v43 = vsel %vm496_vm2, %v949_v38, %v882_v41 }
 0x13e   :  { %3661 = vmatprep.mubr.msk.f32.mxu0 %vm40_vm3, %v969_v43 }
 0x13f   :  { %3662 = vmatmul.mubr.msk.f32.gmra.mrb[32].mxu0 %vm40_vm3, %v970_v42 }
 0x140   :  { %v730_v44 = vpop.permute.xlu1 %729  ;;  %v726_v45 = vpop.permute.xlu0 %725 }
 0x141   :  { %v933_v54 = vsel %vm454_vm0, %v3357_v50, %v730_v44  ;;  %v931_v55 = vsel %vm454_vm0, %v3355_v51, %v726_v45 }
 0x144   :  { %v732_v46 = vpop.permute.xlu1 %731  ;;  %v728_v47 = vpop.permute.xlu0 %727 }
 0x145   :  { %v934_v0 = vsel %vm454_vm0, %v3358_v56, %v732_v46  ;;  %v932_v2 = vsel %vm454_vm0, %v3356_v61, %v728_v47 }
 0x148   :  { %v810_v48 = vpop.permute.xlu1 %809  ;;  %v806_v49 = vpop.permute.xlu0 %805 }
 0x149   :  { %v953_v57 = vsel %vm475_vm1, %v933_v54, %v810_v48  ;;  %v951_v58 = vsel %vm475_vm1, %v931_v55, %v806_v49 }
 0x14c   :  { %v812_v52 = vpop.permute.xlu1 %811  ;;  %v808_v53 = vpop.permute.xlu0 %807 }
 0x14d   :  { %v954_v3 = vsel %vm475_vm1, %v934_v0, %v812_v52  ;;  %v952_v7 = vsel %vm475_vm1, %v932_v2, %v808_v53 }
 0x150   :  { %v890_v59 = vpop.permute.xlu1 %889  ;;  %v886_v60 = vpop.permute.xlu0 %885 }
 0x151   :  { %v971_v62 = vsel %vm496_vm2, %v951_v58, %v886_v60  ;;  %v973_v63 = vsel %vm496_vm2, %v953_v57, %v890_v59 }
 0x152   :  { %3664 = vmatprep.mubr.msk.f32.mxu0 %vm40_vm3, %v971_v62  ;;  %3667 = vmatprep.mubr.msk.f32.mxu1 %vm40_vm3, %v973_v63 }
 0x153   :  { %v3615_v1 = vpop.f32.mrb[0].mxu0 }
 0x154   :  { %vm1365_vm5 = vcmp.ge.f32.partialorder %v3615_v1, 0.0  ;;  %v1405_v4 = vmul.f32 0.2, %v3615_v1  ;;  %v1165_v5 = vpop.f32.mrb[1].mxu0  ;;  %v892_v6 = vpop.permute.xlu1 %891 }
 0x155   :  { %vm1364_vm6 = vcmp.ge.f32.partialorder %v1165_v5, 0.0  ;;  %v1404_v8 = vmul.f32 0.2, %v1165_v5  ;;  %v974_v9 = vsel %vm496_vm2, %v954_v3, %v892_v6  ;;  %v888_v10 = vpop.permute.xlu0 %887 }
 0x156   :  { %v1445_v11 = vsel %vm1365_vm5, %v3615_v1, %v1405_v4  ;;  %v972_v12 = vsel %vm496_vm2, %v952_v7, %v888_v10  ;;  %3668 = vmatmul.mubr.msk.f32.vlgmr.msra.gmra.mrb[0].mxu1 %vm40_vm3, %v974_v9 }
 0x157   :  { %1485 = vst.msk [vmem:[#allocation2 + $0x9] sm:$0xff] %vm454_vm0, %v1445_v11  ;;  %v1444_v13 = vsel %vm1364_vm6, %v1165_v5, %v1404_v8  ;;  %3665 = vmatmul.mubr.msk.f32.gmra.mrb[34].mxu0 %vm40_vm3, %v972_v12 }
 0x158   :  { %1484 = vst.msk [vmem:[#allocation2 + $0x1] sm:$0xff] %vm454_vm0, %v1444_v13  ;;  %v736_v14 = vpop.permute.xlu1 %735 }
 0x159   :  { %v734_v15 = vpop.permute.xlu0 %733  ;;  %v936_v20 = vsel %vm454_vm0, %v3360_v16, %v736_v14 }
 0x15a   :  { %v935_v23 = vsel %vm454_vm0, %v3359_v18, %v734_v15 }
 0x15c   :  { %v816_v17 = vpop.permute.xlu1 %815 }
 0x15d   :  { %v814_v19 = vpop.permute.xlu0 %813  ;;  %v956_v24 = vsel %vm475_vm1, %v936_v20, %v816_v17 }
 0x15e   :  { %v955_v28 = vsel %vm475_vm1, %v935_v23, %v814_v19 }
 0x15f   :  { %v3618_v21 = vpop.f32.mrb[2].mxu0  ;;  %v1544_v22 = vld [vmem:[#allocation2 + $0x1] ss:$2 sm:$0xff]  ;;  %v1564_v35 = vld [vmem:[#allocation2 + $0x2] ss:$2 sm:$0xff] }
 0x160   :  { %vm1367_vm7 = vcmp.ge.f32.partialorder %v3618_v21, 0.0  ;;  %v1407_v25 = vmul.f32 0.2, %v3618_v21  ;;  %1613 = vrot.lane.b32.xlu0 %v1544_v22, %s3908_s10  ;;  %v1175_v26 = vpop.f32.mrb[3].mxu0  ;;  %v896_v27 = vpop.permute.xlu1 %895 }
 0x161   :  { %vm1366_vm8 = vcmp.ge.f32.partialorder %v1175_v26, 0.0  ;;  %v1406_v29 = vmul.f32 0.2, %v1175_v26  ;;  %v976_v30 = vsel %vm496_vm2, %v956_v24, %v896_v27  ;;  %v894_v31 = vpop.permute.xlu0 %893 }
 0x162   :  { %v1447_v32 = vsel %vm1367_vm7, %v3618_v21, %v1407_v25  ;;  %v975_v33 = vsel %vm496_vm2, %v955_v28, %v894_v31 }
 0x163   :  { %1487 = vst.msk [vmem:[#allocation2 + $0x19] sm:$0xff] %vm454_vm0, %v1447_v32  ;;  %v1446_v34 = vsel %vm1366_vm8, %v1175_v26, %v1406_v29  ;;  %3670 = vmatprep.mubr.msk.f32.mxu1 %vm40_vm3, %v975_v33 }
 0x164   :  { %1486 = vst.msk [vmem:[#allocation2 + $0x11] sm:$0xff] %vm454_vm0, %v1446_v34  ;;  %3671 = vmatmul.mubr.msk.f32.gmra.mrb[2].mxu1 %vm40_vm3, %v976_v30  ;;  %1653 = vrot.lane.b32.xlu0 %v1564_v35, %s3907_s9 }
 0x16b   :  { %v3621_v36 = vpop.f32.mrb[4].mxu0  ;;  %v1546_v37 = vld [vmem:[#allocation2 + $0x11] ss:$2 sm:$0xff]  ;;  %v1566_v44 = vld [vmem:[#allocation2 + $0x12] ss:$2 sm:$0xff] }
 0x16c   :  { %vm1369_vm9 = vcmp.ge.f32.partialorder %v3621_v36, 0.0  ;;  %v1409_v38 = vmul.f32 0.2, %v3621_v36  ;;  %1615 = vrot.lane.b32.xlu1 %v1546_v37, %s3908_s10  ;;  %v1185_v40 = vpop.f32.mrb[5].mxu0 }
 0x16d   :  { %vm1368_vm10 = vcmp.ge.f32.partialorder %v1185_v40, 0.0  ;;  %v1408_v41 = vmul.f32 0.2, %v1185_v40 }
 0x16e   :  { %v1449_v42 = vsel %vm1369_vm9, %v3621_v36, %v1409_v38 }
 0x16f   :  { %1489 = vst.msk [vmem:[#allocation2 + $0x29] sm:$0xff] %vm454_vm0, %v1449_v42  ;;  %v1448_v43 = vsel %vm1368_vm10, %v1185_v40, %v1408_v41 }
 0x170   :  { %1488 = vst.msk [vmem:[#allocation2 + $0x21] sm:$0xff] %vm454_vm0, %v1448_v43  ;;  %1655 = vrot.lane.b32.xlu1 %v1566_v44, %s3907_s9 }
 0x177   :  { %v3624_v45 = vpop.f32.mrb[6].mxu0 }
 0x178   :  { %vm1371_vm11 = vcmp.ge.f32.partialorder %v3624_v45, 0.0  ;;  %v1411_v46 = vmul.f32 0.2, %v3624_v45  ;;  %v1195_v47 = vpop.f32.mrb[7].mxu0 }
 0x179   :  { %vm1370_vm12 = vcmp.ge.f32.partialorder %v1195_v47, 0.0  ;;  %v1410_v48 = vmul.f32 0.2, %v1195_v47 }
 0x17a   :  { %v1451_v49 = vsel %vm1371_vm11, %v3624_v45, %v1411_v46 }
 0x17b   :  { %1491 = vst.msk [vmem:[#allocation2 + $0x39] sm:$0xff] %vm454_vm0, %v1451_v49  ;;  %v1450_v50 = vsel %vm1370_vm12, %v1195_v47, %v1410_v48 }
 0x17c   :  { %1490 = vst.msk [vmem:[#allocation2 + $0x31] sm:$0xff] %vm454_vm0, %v1450_v50 }
 0x183   :  { %v3627_v51 = vpop.f32.mrb[8].mxu0 }
 0x184   :  { %vm1373_vm13 = vcmp.ge.f32.partialorder %v3627_v51, 0.0  ;;  %v1413_v52 = vmul.f32 0.2, %v3627_v51  ;;  %v1205_v53 = vpop.f32.mrb[9].mxu0 }
 0x185   :  { %vm1372_vm14 = vcmp.ge.f32.partialorder %v1205_v53, 0.0  ;;  %v1412_v54 = vmul.f32 0.2, %v1205_v53 }
 0x186   :  { %v1453_v55 = vsel %vm1373_vm13, %v3627_v51, %v1413_v52 }
 0x187   :  { %1493 = vst.msk [vmem:[#allocation2 + $0x49] sm:$0xff] %vm454_vm0, %v1453_v55  ;;  %v1452_v56 = vsel %vm1372_vm14, %v1205_v53, %v1412_v54 }
 0x188   :  { %1492 = vst.msk [vmem:[#allocation2 + $0x41] sm:$0xff] %vm454_vm0, %v1452_v56 }
 0x18f   :  { %v3630_v57 = vpop.f32.mrb[10].mxu0 }
 0x190   :  { %vm1375_vm15 = vcmp.ge.f32.partialorder %v3630_v57, 0.0  ;;  %v1415_v58 = vmul.f32 0.2, %v3630_v57  ;;  %v1215_v59 = vpop.f32.mrb[11].mxu0 }
 0x191   :  { %vm1374_vm4 = vcmp.ge.f32.partialorder %v1215_v59, 0.0  ;;  %v1414_v60 = vmul.f32 0.2, %v1215_v59 }
 0x192   :  { %v1455_v61 = vsel %vm1375_vm15, %v3630_v57, %v1415_v58 }
 0x193   :  { %1495 = vst.msk [vmem:[#allocation2 + $0x59] sm:$0xff] %vm454_vm0, %v1455_v61  ;;  %v1454_v62 = vsel %vm1374_vm4, %v1215_v59, %v1414_v60 }
 0x194   :  { %1494 = vst.msk [vmem:[#allocation2 + $0x51] sm:$0xff] %vm454_vm0, %v1454_v62 }
 0x19b   :  { %v3633_v63 = vpop.f32.mrb[12].mxu0 }
 0x19c   :  { %vm1377_vm5 = vcmp.ge.f32.partialorder %v3633_v63, 0.0  ;;  %v1417_v0 = vmul.f32 0.2, %v3633_v63  ;;  %v1225_v1 = vpop.f32.mrb[13].mxu0 }
 0x19d   :  { %vm1376_vm6 = vcmp.ge.f32.partialorder %v1225_v1, 0.0  ;;  %v1416_v2 = vmul.f32 0.2, %v1225_v1 }
 0x19e   :  { %v1457_v3 = vsel %vm1377_vm5, %v3633_v63, %v1417_v0 }
 0x19f   :  { %1497 = vst.msk [vmem:[#allocation2 + $0x69] sm:$0xff] %vm454_vm0, %v1457_v3  ;;  %v1456_v4 = vsel %vm1376_vm6, %v1225_v1, %v1416_v2 }
 0x1a0   :  { %1496 = vst.msk [vmem:[#allocation2 + $0x61] sm:$0xff] %vm454_vm0, %v1456_v4 }
 0x1a7   :  { %v3636_v5 = vpop.f32.mrb[14].mxu0 }
 0x1a8   :  { %vm1379_vm7 = vcmp.ge.f32.partialorder %v3636_v5, 0.0  ;;  %v1419_v6 = vmul.f32 0.2, %v3636_v5  ;;  %v1235_v7 = vpop.f32.mrb[15].mxu0 }
 0x1a9   :  { %vm1378_vm8 = vcmp.ge.f32.partialorder %v1235_v7, 0.0  ;;  %v1418_v8 = vmul.f32 0.2, %v1235_v7 }
 0x1aa   :  { %v1459_v9 = vsel %vm1379_vm7, %v3636_v5, %v1419_v6 }
 0x1ab   :  { %1499 = vst.msk [vmem:[#allocation2 + $0x79] sm:$0xff] %vm454_vm0, %v1459_v9  ;;  %v1458_v10 = vsel %vm1378_vm8, %v1235_v7, %v1418_v8 }
 0x1ac   :  { %1498 = vst.msk [vmem:[#allocation2 + $0x71] sm:$0xff] %vm454_vm0, %v1458_v10 }
 0x1b3   :  { %v3639_v11 = vpop.f32.mrb[16].mxu0 }
 0x1b4   :  { %vm1381_vm9 = vcmp.ge.f32.partialorder %v3639_v11, 0.0  ;;  %v1421_v12 = vmul.f32 0.2, %v3639_v11  ;;  %v1245_v13 = vpop.f32.mrb[17].mxu0 }
 0x1b5   :  { %vm1380_vm10 = vcmp.ge.f32.partialorder %v1245_v13, 0.0  ;;  %v1420_v14 = vmul.f32 0.2, %v1245_v13 }
 0x1b6   :  { %v1461_v15 = vsel %vm1381_vm9, %v3639_v11, %v1421_v12 }
 0x1b7   :  { %1501 = vst.msk [vmem:[#allocation2 + $0x89] sm:$0xff] %vm454_vm0, %v1461_v15  ;;  %v1460_v16 = vsel %vm1380_vm10, %v1245_v13, %v1420_v14 }
 0x1b8   :  { %1500 = vst.msk [vmem:[#allocation2 + $0x81] sm:$0xff] %vm454_vm0, %v1460_v16 }
 0x1bf   :  { %v3642_v17 = vpop.f32.mrb[18].mxu0 }
 0x1c0   :  { %vm1383_vm11 = vcmp.ge.f32.partialorder %v3642_v17, 0.0  ;;  %v1423_v18 = vmul.f32 0.2, %v3642_v17  ;;  %v1255_v19 = vpop.f32.mrb[19].mxu0 }
 0x1c1   :  { %vm1382_vm12 = vcmp.ge.f32.partialorder %v1255_v19, 0.0  ;;  %v1422_v20 = vmul.f32 0.2, %v1255_v19 }
 0x1c2   :  { %v1463_v21 = vsel %vm1383_vm11, %v3642_v17, %v1423_v18 }
 0x1c3   :  { %1503 = vst.msk [vmem:[#allocation2 + $0x99] sm:$0xff] %vm454_vm0, %v1463_v21  ;;  %v1462_v22 = vsel %vm1382_vm12, %v1255_v19, %v1422_v20 }
 0x1c4   :  { %1502 = vst.msk [vmem:[#allocation2 + $0x91] sm:$0xff] %vm454_vm0, %v1462_v22  ;;  %v1983_v22 = vld [vmem:[%s5230_s2] sm:$0xff] }
 0x1ca   :  { %v3645_v23 = vpop.f32.mrb[20].mxu0 }
 0x1cb   :  { %vm1385_vm13 = vcmp.ge.f32.partialorder %v3645_v23, 0.0  ;;  %v1425_v24 = vmul.f32 0.2, %v3645_v23  ;;  %v1265_v25 = vpop.f32.mrb[21].mxu0 }
 0x1cc   :  { %vm1384_vm14 = vcmp.ge.f32.partialorder %v1265_v25, 0.0  ;;  %v1424_v26 = vmul.f32 0.2, %v1265_v25 }
 0x1cd   :  { %v1465_v27 = vsel %vm1385_vm13, %v3645_v23, %v1425_v24  ;;  %v1984_v23 = vld [vmem:[%s5230_s2 + $0x8] sm:$0xff]  ;;  %s3911_s2 = smov 16  }
 0x1ce   :  { %1505 = vst.msk [vmem:[#allocation2 + $0xab] sm:$0xff] %vm454_vm0, %v1465_v27  ;;  %v1464_v28 = vsel %vm1384_vm14, %v1265_v25, %v1424_v26  ;;  %v3797_v24 = vpack.c.bf16 %v1984_v23, %v1983_v22  ;;  %v1584_v25 = vld [vmem:[#allocation2 + $0x3] ss:$2 sm:$0xff] }
 0x1cf   :  { %1504 = vst.msk [vmem:[#allocation2 + $0xa3] sm:$0xff] %vm454_vm0, %v1464_v28  ;;  %v1548_v26 = vld [vmem:[#allocation2 + $0x21] ss:$2 sm:$0xff]  ;;  %v1568_v28 = vld [vmem:[#allocation2 + $0x22] ss:$2 sm:$0xff] }
 0x1d0   :  { %3798 = vmatprep.subr.bf16.mxu1 %v3797_v24 }
 0x1d1   :  { %3800 = vmatpush3.bf16.msra.mxu1 %v3797_v24 }
 0x1d6   :  { %v3648_v29 = vpop.f32.mrb[22].mxu0 }
 0x1d7   :  { %vm1387_vm15 = vcmp.ge.f32.partialorder %v3648_v29, 0.0  ;;  %v1427_v30 = vmul.f32 0.2, %v3648_v29  ;;  %v1275_v31 = vpop.f32.mrb[23].mxu0 }
 0x1d8   :  { %vm1386_vm4 = vcmp.ge.f32.partialorder %v1275_v31, 0.0  ;;  %v1426_v32 = vmul.f32 0.2, %v1275_v31 }
 0x1d9   :  { %v1467_v33 = vsel %vm1387_vm15, %v3648_v29, %v1427_v30  ;;  %v1588_v30 = vld [vmem:[#allocation2 + $0x23] ss:$2 sm:$0xff] }
 0x1da   :  { %1507 = vst.msk [vmem:[#allocation2 + $0xbb] sm:$0xff] %vm454_vm0, %v1467_v33  ;;  %v1466_v34 = vsel %vm1386_vm4, %v1275_v31, %v1426_v32  ;;  %v1586_v31 = vld [vmem:[#allocation2 + $0x13] ss:$2 sm:$0xff] }
 0x1db   :  { %1506 = vst.msk [vmem:[#allocation2 + $0xb3] sm:$0xff] %vm454_vm0, %v1466_v34  ;;  %v1552_v32 = vld [vmem:[#allocation2 + $0x41] ss:$2 sm:$0xff]  ;;  %v1550_v33 = vld [vmem:[#allocation2 + $0x31] ss:$2 sm:$0xff] }
 0x1dc   :  { %v1572_v34 = vld [vmem:[#allocation2 + $0x42] ss:$2 sm:$0xff] }
 0x1e2   :  { %v3651_v35 = vpop.f32.mrb[24].mxu0 }
 0x1e3   :  { %vm1389_vm5 = vcmp.ge.f32.partialorder %v3651_v35, 0.0  ;;  %v1429_v36 = vmul.f32 0.2, %v3651_v35  ;;  %v1285_v37 = vpop.f32.mrb[25].mxu0 }
 0x1e4   :  { %vm1388_vm6 = vcmp.ge.f32.partialorder %v1285_v37, 0.0  ;;  %v1428_v38 = vmul.f32 0.2, %v1285_v37 }
 0x1e5   :  { %v1469_v40 = vsel %vm1389_vm5, %v3651_v35, %v1429_v36  ;;  %v1570_v35 = vld [vmem:[#allocation2 + $0x32] ss:$2 sm:$0xff]  ;;  %v1592_v36 = vld [vmem:[#allocation2 + $0x43] ss:$2 sm:$0xff] }
 0x1e6   :  { %1509 = vst.msk [vmem:[#allocation2 + $0xcb] sm:$0xff] %vm454_vm0, %v1469_v40  ;;  %v1468_v41 = vsel %vm1388_vm6, %v1285_v37, %v1428_v38  ;;  %v1590_v37 = vld [vmem:[#allocation2 + $0x33] ss:$2 sm:$0xff] }
 0x1e7   :  { %1508 = vst.msk [vmem:[#allocation2 + $0xc3] sm:$0xff] %vm454_vm0, %v1468_v41  ;;  %v1556_v38 = vld [vmem:[#allocation2 + $0x61] ss:$2 sm:$0xff]  ;;  %v1554_v40 = vld [vmem:[#allocation2 + $0x51] ss:$2 sm:$0xff] }
 0x1e8   :  { %v1576_v41 = vld [vmem:[#allocation2 + $0x62] ss:$2 sm:$0xff] }
 0x1ee   :  { %v3654_v42 = vpop.f32.mrb[26].mxu0 }
 0x1ef   :  { %vm1391_vm7 = vcmp.ge.f32.partialorder %v3654_v42, 0.0  ;;  %v1431_v43 = vmul.f32 0.2, %v3654_v42  ;;  %v1295_v44 = vpop.f32.mrb[27].mxu0 }
 0x1f0   :  { %vm1390_vm8 = vcmp.ge.f32.partialorder %v1295_v44, 0.0  ;;  %v1430_v45 = vmul.f32 0.2, %v1295_v44 }
 0x1f1   :  { %v1471_v46 = vsel %vm1391_vm7, %v3654_v42, %v1431_v43  ;;  %v1574_v42 = vld [vmem:[#allocation2 + $0x52] ss:$2 sm:$0xff]  ;;  %v1596_v43 = vld [vmem:[#allocation2 + $0x63] ss:$2 sm:$0xff] }
 0x1f2   :  { %1511 = vst.msk [vmem:[#allocation2 + $0xdb] sm:$0xff] %vm454_vm0, %v1471_v46  ;;  %v1470_v47 = vsel %vm1390_vm8, %v1295_v44, %v1430_v45  ;;  %v1594_v44 = vld [vmem:[#allocation2 + $0x53] ss:$2 sm:$0xff] }
 0x1f3   :  { %1510 = vst.msk [vmem:[#allocation2 + $0xd3] sm:$0xff] %vm454_vm0, %v1470_v47  ;;  %v1560_v45 = vld [vmem:[#allocation2 + $0x81] ss:$2 sm:$0xff]  ;;  %v1558_v46 = vld [vmem:[#allocation2 + $0x71] ss:$2 sm:$0xff] }
 0x1f4   :  { %v1580_v47 = vld [vmem:[#allocation2 + $0x82] ss:$2 sm:$0xff] }
 0x1fa   :  { %v3657_v48 = vpop.f32.mrb[28].mxu0 }
 0x1fb   :  { %vm1393_vm9 = vcmp.ge.f32.partialorder %v3657_v48, 0.0  ;;  %v1433_v49 = vmul.f32 0.2, %v3657_v48  ;;  %v1305_v50 = vpop.f32.mrb[29].mxu0 }
 0x1fc   :  { %vm1392_vm10 = vcmp.ge.f32.partialorder %v1305_v50, 0.0  ;;  %v1432_v51 = vmul.f32 0.2, %v1305_v50 }
 0x1fd   :  { %v1473_v52 = vsel %vm1393_vm9, %v3657_v48, %v1433_v49  ;;  %v1578_v48 = vld [vmem:[#allocation2 + $0x72] ss:$2 sm:$0xff]  ;;  %v1600_v49 = vld [vmem:[#allocation2 + $0x83] ss:$2 sm:$0xff]  ;;  %vm33_vm9 = vcmask 57344  }
 0x1fe   :  { %1513 = vst.msk [vmem:[#allocation2 + $0xeb] sm:$0xff] %vm454_vm0, %v1473_v52  ;;  %v1472_v53 = vsel %vm1392_vm10, %v1305_v50, %v1432_v51  ;;  %v1598_v50 = vld [vmem:[#allocation2 + $0x73] ss:$2 sm:$0xff]  ;;  %v1774_v51 = vld [vmem:[#allocation2 + $0xa3] ss:$2 sm:$0xff] }
 0x1ff   :  { %1512 = vst.msk [vmem:[#allocation2 + $0xe3] sm:$0xff] %vm454_vm0, %v1472_v53  ;;  %v1562_v52 = vld [vmem:[#allocation2 + $0x91] ss:$2 sm:$0xff]  ;;  %v1794_v53 = vld [vmem:[#allocation2 + $0xa4] ss:$2 sm:$0xff] }
 0x200   :  { %35 = vst.msk [vmem:[#allocation3 + $0x51] sm:$0x1] %vm33_vm9, %v3910_v39  ;;  %34 = vst.msk [vmem:[#allocation3] sm:$0x1] %vm33_vm9, %v3910_v39 }
 0x201   :  { %36 = vst.msk [vmem:[#allocation3 + $0x52] sm:$0x1] %vm33_vm9, %v3910_v39  ;;  %37 = vst.msk [vmem:[#allocation3 + $0xa3] sm:$0x1] %vm33_vm9, %v3910_v39 }
 0x206   :  { %v3660_v54 = vpop.f32.mrb[30].mxu0 }
 0x207   :  { %vm1395_vm11 = vcmp.ge.f32.partialorder %v3660_v54, 0.0  ;;  %v1435_v55 = vmul.f32 0.2, %v3660_v54  ;;  %v1315_v56 = vpop.f32.mrb[31].mxu0 }
 0x208   :  { %vm1394_vm12 = vcmp.ge.f32.partialorder %v1315_v56, 0.0  ;;  %v1434_v57 = vmul.f32 0.2, %v1315_v56 }
 0x209   :  { %v1475_v58 = vsel %vm1395_vm11, %v3660_v54, %v1435_v55  ;;  %v1582_v54 = vld [vmem:[#allocation2 + $0x92] ss:$2 sm:$0xff]  ;;  %v1814_v55 = vld [vmem:[#allocation2 + $0xa5] ss:$2 sm:$0xff] }
 0x20a   :  { %1515 = vst.msk [vmem:[#allocation2 + $0xfb] sm:$0xff] %vm454_vm0, %v1475_v58  ;;  %v1474_v59 = vsel %vm1394_vm12, %v1315_v56, %v1434_v57  ;;  %v1602_v56 = vld [vmem:[#allocation2 + $0x93] ss:$2 sm:$0xff]  ;;  %v1778_v57 = vld [vmem:[#allocation2 + $0xc3] ss:$2 sm:$0xff] }
 0x20b   :  { %1514 = vst.msk [vmem:[#allocation2 + $0xf3] sm:$0xff] %vm454_vm0, %v1474_v59  ;;  %v1776_v58 = vld [vmem:[#allocation2 + $0xb3] ss:$2 sm:$0xff]  ;;  %v1798_v59 = vld [vmem:[#allocation2 + $0xc4] ss:$2 sm:$0xff] }
 0x212   :  { %v3663_v60 = vpop.f32.mrb[32].mxu0 }
 0x213   :  { %vm1397_vm13 = vcmp.ge.f32.partialorder %v3663_v60, 0.0  ;;  %v1437_v61 = vmul.f32 0.2, %v3663_v60  ;;  %v1325_v62 = vpop.f32.mrb[33].mxu0 }
 0x214   :  { %vm1396_vm14 = vcmp.ge.f32.partialorder %v1325_v62, 0.0  ;;  %v1436_v63 = vmul.f32 0.2, %v1325_v62 }
 0x215   :  { %v1477_v0 = vsel %vm1397_vm13, %v3663_v60, %v1437_v61  ;;  %v1796_v60 = vld [vmem:[#allocation2 + $0xb4] ss:$2 sm:$0xff]  ;;  %v1818_v61 = vld [vmem:[#allocation2 + $0xc5] ss:$2 sm:$0xff] }
 0x216   :  { %1517 = vst.msk [vmem:[#allocation2 + $0x10b] sm:$0xff] %vm454_vm0, %v1477_v0  ;;  %v1476_v1 = vsel %vm1396_vm14, %v1325_v62, %v1436_v63  ;;  %v1816_v62 = vld [vmem:[#allocation2 + $0xb5] ss:$2 sm:$0xff] }
 0x217   :  { %1516 = vst.msk [vmem:[#allocation2 + $0x103] sm:$0xff] %vm454_vm0, %v1476_v1  ;;  %v1782_v63 = vld [vmem:[#allocation2 + $0xe3] ss:$2 sm:$0xff]  ;;  %v1780_v0 = vld [vmem:[#allocation2 + $0xd3] ss:$2 sm:$0xff] }
 0x218   :  { %v1802_v1 = vld [vmem:[#allocation2 + $0xe4] ss:$2 sm:$0xff] }
 0x229   :  { %v3669_v2 = vpop.f32.mrb[0].mxu1 }
 0x22a   :  { %v3666_v3 = vpop.f32.mrb[34].mxu0  ;;  %vm1401_vm15 = vcmp.ge.f32.partialorder %v3669_v2, 0.0  ;;  %v1441_v4 = vmul.f32 0.2, %v3669_v2  ;;  %v1345_v5 = vpop.f32.mrb[1].mxu1 }
 0x22b   :  { %vm1399_vm4 = vcmp.ge.f32.partialorder %v3666_v3, 0.0  ;;  %v1439_v6 = vmul.f32 0.2, %v3666_v3  ;;  %v1335_v7 = vpop.f32.mrb[35].mxu0  ;;  %vm1400_vm5 = vcmp.ge.f32.partialorder %v1345_v5, 0.0 }
 0x22c   :  { %v1481_v8 = vsel %vm1401_vm15, %v3669_v2, %v1441_v4  ;;  %vm1398_vm6 = vcmp.ge.f32.partialorder %v1335_v7, 0.0  ;;  %v1438_v9 = vmul.f32 0.2, %v1335_v7  ;;  %v1440_v10 = vmul.f32 0.2, %v1345_v5 }
 0x22d   :  { %v1479_v11 = vsel %vm1399_vm4, %v3666_v3, %v1439_v6  ;;  %1521 = vst.msk [vmem:[#allocation2 + $0x12b] sm:$0xff] %vm454_vm0, %v1481_v8  ;;  %v1800_v2 = vld [vmem:[#allocation2 + $0xd4] ss:$2 sm:$0xff]  ;;  %v1822_v3 = vld [vmem:[#allocation2 + $0xe5] ss:$2 sm:$0xff] }
 0x22e   :  { %1519 = vst.msk [vmem:[#allocation2 + $0x11b] sm:$0xff] %vm454_vm0, %v1479_v11  ;;  %v1478_v12 = vsel %vm1398_vm6, %v1335_v7, %v1438_v9  ;;  %v1480_v13 = vsel %vm1400_vm5, %v1345_v5, %v1440_v10  ;;  %v1820_v4 = vld [vmem:[#allocation2 + $0xd5] ss:$2 sm:$0xff]  ;;  %v1806_v7 = vld [vmem:[#allocation2 + $0x104] ss:$2 sm:$0xff]  ;;  %v1614_v10 = vpop.permute.xlu0 %1613 }
 0x22f   :  { %1518 = vst.msk [vmem:[#allocation2 + $0x113] sm:$0xff] %vm454_vm0, %v1478_v12  ;;  %1520 = vst.msk [vmem:[#allocation2 + $0x123] sm:$0xff] %vm454_vm0, %v1480_v13  ;;  %v1786_v5 = vld [vmem:[#allocation2 + $0x103] ss:$2 sm:$0xff]  ;;  %v1784_v6 = vld [vmem:[#allocation2 + $0xf3] ss:$2 sm:$0xff] }
 0x230   :  { %v1804_v8 = vld [vmem:[#allocation2 + $0xf4] ss:$2 sm:$0xff]  ;;  %v1824_v11 = vld [vmem:[#allocation2 + $0xf5] ss:$2 sm:$0xff] }
 0x236   :  { %v1790_v14 = vld [vmem:[#allocation2 + $0x123] ss:$2 sm:$0xff]  ;;  %v1810_v20 = vld [vmem:[#allocation2 + $0x124] ss:$2 sm:$0xff]  ;;  %v1788_v13 = vld [vmem:[#allocation2 + $0x113] ss:$2 sm:$0xff] }
 0x237   :  { %v3672_v15 = vpop.f32.mrb[2].mxu1  ;;  %1859 = vrot.lane.b32.xlu0 %v1790_v14, %s3908_s10  ;;  %v1826_v9 = vld [vmem:[#allocation2 + $0x105] ss:$2 sm:$0xff]  ;;  %v1654_v14 = vpop.permute.xlu0 %1653 }
 0x238   :  { %vm1403_vm7 = vcmp.ge.f32.partialorder %v3672_v15, 0.0  ;;  %v1443_v16 = vmul.f32 0.2, %v3672_v15  ;;  %v1355_v17 = vpop.f32.mrb[3].mxu1 }
 0x239   :  { %vm1402_vm8 = vcmp.ge.f32.partialorder %v1355_v17, 0.0  ;;  %v1442_v18 = vmul.f32 0.2, %v1355_v17 }
 0x23a   :  { %v1483_v19 = vsel %vm1403_vm7, %v3672_v15, %v1443_v16  ;;  %v1808_v15 = vld [vmem:[#allocation2 + $0x114] ss:$2 sm:$0xff] }
 0x23b   :  { %1523 = vst.msk [vmem:[#allocation2 + $0x13b] sm:$0xff] %vm454_vm0, %v1483_v19  ;;  %v1482_v21 = vsel %vm1402_vm8, %v1355_v17, %v1442_v18  ;;  %1899 = vrot.lane.b32.xlu0 %v1810_v20, %s3907_s9  ;;  %v1828_v17 = vld [vmem:[#allocation2 + $0x115] ss:$2 sm:$0xff]  ;;  %v1616_v18 = vpop.permute.xlu1 %1615  ;;  %v1524_v20 = vld [vmem:[#allocation2] ss:$2 sm:$0xff] }
 0x23c   :  { %1522 = vst.msk [vmem:[#allocation2 + $0x133] sm:$0xff] %vm454_vm0, %v1482_v21  ;;  %v1723_v22 = vsel %vm454_vm0, %v1524_v20, %v1614_v10  ;;  %v1538_v10 = vld [vmem:[#allocation2 + $0x70] ss:$2 sm:$0xff] }
 0x23d   :  { %v1733_v23 = vsel %vm475_vm1, %v1723_v22, %v1654_v14 }
 0x23f   :  { %1693 = vrot.lane.b32.xlu0 %v1584_v25, %s3909_s19  ;;  %v1656_v25 = vpop.permute.xlu1 %1655 }
 0x243   :  { %1617 = vrot.lane.b32.xlu0 %v1548_v26, %s3908_s10  ;;  %v1792_v27 = vld [vmem:[#allocation2 + $0x133] ss:$2 sm:$0xff]  ;;  %v1812_v29 = vld [vmem:[#allocation2 + $0x134] ss:$2 sm:$0xff] }
 0x244   :  { %1861 = vrot.lane.b32.xlu1 %v1792_v27, %s3908_s10  ;;  %v1830_v12 = vld [vmem:[#allocation2 + $0x125] ss:$2 sm:$0xff]  ;;  %v1832_v21 = vld [vmem:[#allocation2 + $0x135] ss:$2 sm:$0xff] }
 0x247   :  { %1657 = vrot.lane.b32.xlu0 %v1568_v28, %s3907_s9 }
 0x248   :  { %1901 = vrot.lane.b32.xlu1 %v1812_v29, %s3907_s9 }
 0x24b   :  { %1697 = vrot.lane.b32.xlu0 %v1588_v30, %s3909_s19 }
 0x24c   :  { %1695 = vrot.lane.b32.xlu1 %v1586_v31, %s3909_s19  ;;  %v1526_v31 = vld [vmem:[#allocation2 + $0x10] ss:$2 sm:$0xff] }
 0x24f   :  { %1621 = vrot.lane.b32.xlu0 %v1552_v32, %s3908_s10  ;;  %v1724_v32 = vsel %vm454_vm0, %v1526_v31, %v1616_v18 }
 0x250   :  { %1619 = vrot.lane.b32.xlu1 %v1550_v33, %s3908_s10  ;;  %v1528_v33 = vld [vmem:[#allocation2 + $0x20] ss:$2 sm:$0xff] }
 0x253   :  { %1661 = vrot.lane.b32.xlu0 %v1572_v34, %s3907_s9 }
 0x254   :  { %1659 = vrot.lane.b32.xlu1 %v1570_v35, %s3907_s9  ;;  %v1734_v35 = vsel %vm475_vm1, %v1724_v32, %v1656_v25 }
 0x257   :  { %1701 = vrot.lane.b32.xlu0 %v1592_v36, %s3909_s19 }
 0x258   :  { %1699 = vrot.lane.b32.xlu1 %v1590_v37, %s3909_s19 }
 0x25b   :  { %1625 = vrot.lane.b32.xlu0 %v1556_v38, %s3908_s10 }
 0x25c   :  { %1623 = vrot.lane.b32.xlu1 %v1554_v40, %s3908_s10 }
 0x25f   :  { %1665 = vrot.lane.b32.xlu0 %v1576_v41, %s3907_s9 }
 0x260   :  { %1663 = vrot.lane.b32.xlu1 %v1574_v42, %s3907_s9 }
 0x263   :  { %1705 = vrot.lane.b32.xlu0 %v1596_v43, %s3909_s19 }
 0x264   :  { %1703 = vrot.lane.b32.xlu1 %v1594_v44, %s3909_s19 }
 0x267   :  { %1629 = vrot.lane.b32.xlu0 %v1560_v45, %s3908_s10 }
 0x268   :  { %1627 = vrot.lane.b32.xlu1 %v1558_v46, %s3908_s10  ;;  %v1530_v46 = vld [vmem:[#allocation2 + $0x30] ss:$2 sm:$0xff] }
 0x26b   :  { %1669 = vrot.lane.b32.xlu0 %v1580_v47, %s3907_s9  ;;  %v1532_v47 = vld [vmem:[#allocation2 + $0x40] ss:$2 sm:$0xff] }
 0x26c   :  { %1667 = vrot.lane.b32.xlu1 %v1578_v48, %s3907_s9 }
 0x26f   :  { %1709 = vrot.lane.b32.xlu0 %v1600_v49, %s3909_s19 }
 0x270   :  { %1707 = vrot.lane.b32.xlu1 %v1598_v50, %s3909_s19 }
 0x273   :  { %1843 = vrot.lane.b32.xlu0 %v1774_v51, %s3908_s10 }
 0x274   :  { %1631 = vrot.lane.b32.xlu1 %v1562_v52, %s3908_s10 }
 0x277   :  { %1883 = vrot.lane.b32.xlu0 %v1794_v53, %s3907_s9 }
 0x278   :  { %1671 = vrot.lane.b32.xlu1 %v1582_v54, %s3907_s9 }
 0x27b   :  { %1923 = vrot.lane.b32.xlu0 %v1814_v55, %s3909_s19 }
 0x27c   :  { %1711 = vrot.lane.b32.xlu1 %v1602_v56, %s3909_s19 }
 0x27f   :  { %1847 = vrot.lane.b32.xlu0 %v1778_v57, %s3908_s10 }
 0x280   :  { %1845 = vrot.lane.b32.xlu1 %v1776_v58, %s3908_s10 }
 0x283   :  { %1887 = vrot.lane.b32.xlu0 %v1798_v59, %s3907_s9 }
 0x284   :  { %1885 = vrot.lane.b32.xlu1 %v1796_v60, %s3907_s9  ;;  %v1534_v60 = vld [vmem:[#allocation2 + $0x50] ss:$2 sm:$0xff] }
 0x287   :  { %1927 = vrot.lane.b32.xlu0 %v1818_v61, %s3909_s19  ;;  %v1536_v61 = vld [vmem:[#allocation2 + $0x60] ss:$2 sm:$0xff] }
 0x288   :  { %1925 = vrot.lane.b32.xlu1 %v1816_v62, %s3909_s19 }
 0x28b   :  { %1851 = vrot.lane.b32.xlu0 %v1782_v63, %s3908_s10 }
 0x28c   :  { %1849 = vrot.lane.b32.xlu1 %v1780_v0, %s3908_s10 }
 0x28f   :  { %1891 = vrot.lane.b32.xlu0 %v1802_v1, %s3907_s9 }
 0x290   :  { %1889 = vrot.lane.b32.xlu1 %v1800_v2, %s3907_s9 }
 0x293   :  { %1931 = vrot.lane.b32.xlu0 %v1822_v3, %s3909_s19 }
 0x294   :  { %1929 = vrot.lane.b32.xlu1 %v1820_v4, %s3909_s19 }
 0x297   :  { %1855 = vrot.lane.b32.xlu0 %v1786_v5, %s3908_s10 }
 0x298   :  { %1853 = vrot.lane.b32.xlu1 %v1784_v6, %s3908_s10 }
 0x29b   :  { %1895 = vrot.lane.b32.xlu0 %v1806_v7, %s3907_s9 }
 0x29c   :  { %1893 = vrot.lane.b32.xlu1 %v1804_v8, %s3907_s9 }
 0x29f   :  { %1935 = vrot.lane.b32.xlu0 %v1826_v9, %s3909_s19 }
 0x2a0   :  { %1933 = vrot.lane.b32.xlu1 %v1824_v11, %s3909_s19  ;;  %v1540_v11 = vld [vmem:[#allocation2 + $0x80] ss:$2 sm:$0xff] }
 0x2a3   :  { %1939 = vrot.lane.b32.xlu0 %v1830_v12, %s3909_s19 }
 0x2a4   :  { %1857 = vrot.lane.b32.xlu1 %v1788_v13, %s3908_s10 }
 0x2a8   :  { %1897 = vrot.lane.b32.xlu1 %v1808_v15, %s3907_s9 }
 0x2a9   :  { %v4840_v16 = vpop.permute.xlu0 %1859 }
 0x2ac   :  { %1937 = vrot.lane.b32.xlu1 %v1828_v17, %s3909_s19 }
 0x2ad   :  { %v4843_v19 = vpop.permute.xlu0 %1899 }
 0x2b0   :  { %1941 = vrot.lane.b32.xlu1 %v1832_v21, %s3909_s19  ;;  %s3914_s19 = smov 48  }
 0x2b1   :  { %v1694_v24 = vpop.permute.xlu0 %1693 }
 0x2b2   :  { %v1743_v26 = vsel %vm496_vm2, %v1733_v23, %v1694_v24 }
 0x2b3   :  { %3677 = vmatprep.mubr.msk.f32.mxu1 %vm40_vm3, %v1743_v26  ;;  %v1542_v26 = vld [vmem:[#allocation2 + $0x90] ss:$2 sm:$0xff] }
 0x2b5   :  { %v1618_v27 = vpop.permute.xlu0 %1617 }
 0x2b6   :  { %v4850_v28 = vpop.permute.xlu1 %1861  ;;  %v1725_v36 = vsel %vm454_vm0, %v1528_v33, %v1618_v27  ;;  %v1754_v27 = vld [vmem:[#allocation2 + $0xa2] ss:$2 sm:$0xff] }
 0x2b9   :  { %v1658_v29 = vpop.permute.xlu0 %1657 }
 0x2ba   :  { %v4852_v30 = vpop.permute.xlu1 %1901  ;;  %v1735_v38 = vsel %vm475_vm1, %v1725_v36, %v1658_v29 }
 0x2bd   :  { %v1698_v34 = vpop.permute.xlu0 %1697 }
 0x2be   :  { %v1696_v37 = vpop.permute.xlu1 %1695  ;;  %v1745_v41 = vsel %vm496_vm2, %v1735_v38, %v1698_v34 }
 0x2bf   :  { %v1744_v40 = vsel %vm496_vm2, %v1734_v35, %v1696_v37 }
 0x2c0   :  { %3678 = vmatmul.mubr.msk.f32.vlgmr.msra.gmra.mrb[4].mxu1 %vm40_vm3, %v1744_v40 }
 0x2c1   :  { %3680 = vmatprep.mubr.msk.f32.mxu1 %vm40_vm3, %v1745_v41  ;;  %v1622_v42 = vpop.permute.xlu0 %1621 }
 0x2c2   :  { %v1620_v43 = vpop.permute.xlu1 %1619  ;;  %v1727_v50 = vsel %vm454_vm0, %v1532_v47, %v1622_v42 }
 0x2c3   :  { %v1726_v48 = vsel %vm454_vm0, %v1530_v46, %v1620_v43  ;;  %v1756_v43 = vld [vmem:[#allocation2 + $0xb2] ss:$2 sm:$0xff] }
 0x2c5   :  { %v1662_v44 = vpop.permute.xlu0 %1661 }
 0x2c6   :  { %v1660_v45 = vpop.permute.xlu1 %1659  ;;  %v1737_v53 = vsel %vm475_vm1, %v1727_v50, %v1662_v44  ;;  %v1758_v44 = vld [vmem:[#allocation2 + $0xc2] ss:$2 sm:$0xff] }
 0x2c7   :  { %v1736_v51 = vsel %vm475_vm1, %v1726_v48, %v1660_v45 }
 0x2c9   :  { %v1702_v49 = vpop.permute.xlu0 %1701 }
 0x2ca   :  { %v1700_v52 = vpop.permute.xlu1 %1699  ;;  %v1747_v55 = vsel %vm496_vm2, %v1737_v53, %v1702_v49 }
 0x2cb   :  { %v1746_v54 = vsel %vm496_vm2, %v1736_v51, %v1700_v52 }
 0x2cc   :  { %3681 = vmatmul.mubr.msk.f32.gmra.mrb[6].mxu1 %vm40_vm3, %v1746_v54 }
 0x2cd   :  { %3683 = vmatprep.mubr.msk.f32.mxu1 %vm40_vm3, %v1747_v55  ;;  %v1626_v56 = vpop.permute.xlu0 %1625 }
 0x2ce   :  { %v1624_v57 = vpop.permute.xlu1 %1623  ;;  %v1729_v0 = vsel %vm454_vm0, %v1536_v61, %v1626_v56 }
 0x2cf   :  { %v1728_v62 = vsel %vm454_vm0, %v1534_v60, %v1624_v57  ;;  %v1760_v57 = vld [vmem:[#allocation2 + $0xd2] ss:$2 sm:$0xff] }
 0x2d1   :  { %v1666_v58 = vpop.permute.xlu0 %1665 }
 0x2d2   :  { %v1664_v59 = vpop.permute.xlu1 %1663  ;;  %v1739_v3 = vsel %vm475_vm1, %v1729_v0, %v1666_v58  ;;  %v1762_v58 = vld [vmem:[#allocation2 + $0xe2] ss:$2 sm:$0xff] }
 0x2d3   :  { %v1738_v1 = vsel %vm475_vm1, %v1728_v62, %v1664_v59 }
 0x2d5   :  { %v1706_v63 = vpop.permute.xlu0 %1705 }
 0x2d6   :  { %v1704_v2 = vpop.permute.xlu1 %1703  ;;  %v1749_v5 = vsel %vm496_vm2, %v1739_v3, %v1706_v63 }
 0x2d7   :  { %v1748_v4 = vsel %vm496_vm2, %v1738_v1, %v1704_v2 }
 0x2d8   :  { %3684 = vmatmul.mubr.msk.f32.gmra.mrb[8].mxu1 %vm40_vm3, %v1748_v4 }
 0x2d9   :  { %3686 = vmatprep.mubr.msk.f32.mxu1 %vm40_vm3, %v1749_v5  ;;  %v1630_v6 = vpop.permute.xlu0 %1629 }
 0x2da   :  { %v1628_v7 = vpop.permute.xlu1 %1627  ;;  %v1731_v14 = vsel %vm454_vm0, %v1540_v11, %v1630_v6 }
 0x2db   :  { %v1730_v12 = vsel %vm454_vm0, %v1538_v10, %v1628_v7  ;;  %v1764_v7 = vld [vmem:[#allocation2 + $0xf2] ss:$2 sm:$0xff] }
 0x2dd   :  { %v1670_v8 = vpop.permute.xlu0 %1669 }
 0x2de   :  { %v1668_v9 = vpop.permute.xlu1 %1667  ;;  %v1741_v18 = vsel %vm475_vm1, %v1731_v14, %v1670_v8  ;;  %v1766_v8 = vld [vmem:[#allocation2 + $0x102] ss:$2 sm:$0xff] }
 0x2df   :  { %v1740_v15 = vsel %vm475_vm1, %v1730_v12, %v1668_v9 }
 0x2e1   :  { %v1710_v13 = vpop.permute.xlu0 %1709 }
 0x2e2   :  { %v1708_v17 = vpop.permute.xlu1 %1707  ;;  %v1751_v21 = vsel %vm496_vm2, %v1741_v18, %v1710_v13 }
 0x2e3   :  { %v1750_v20 = vsel %vm496_vm2, %v1740_v15, %v1708_v17 }
 0x2e4   :  { %3687 = vmatmul.mubr.msk.f32.gmra.mrb[10].mxu1 %vm40_vm3, %v1750_v20 }
 0x2e5   :  { %3689 = vmatprep.mubr.msk.f32.mxu1 %vm40_vm3, %v1751_v21  ;;  %v1844_v22 = vpop.permute.xlu0 %1843  ;;  %v1768_v21 = vld [vmem:[#allocation2 + $0x112] ss:$2 sm:$0xff] }
 0x2e6   :  { %v1632_v23 = vpop.permute.xlu1 %1631  ;;  %v1953_v32 = vsel %vm454_vm0, %v1754_v27, %v1844_v22  ;;  %v1770_v22 = vld [vmem:[#allocation2 + $0x122] ss:$2 sm:$0xff] }
 0x2e7   :  { %v1732_v29 = vsel %vm454_vm0, %v1542_v26, %v1632_v23 }
 0x2e9   :  { %v1884_v24 = vpop.permute.xlu0 %1883 }
 0x2ea   :  { %v1672_v25 = vpop.permute.xlu1 %1671  ;;  %v1963_v35 = vsel %vm475_vm1, %v1953_v32, %v1884_v24  ;;  %v1772_v32 = vld [vmem:[#allocation2 + $0x132] ss:$2 sm:$0xff] }
 0x2eb   :  { %v1742_v33 = vsel %vm475_vm1, %v1732_v29, %v1672_v25  ;;  %v1961_v25 = vsel %vm454_vm0, %v1770_v22, %v4840_v16 }
 0x2ec   :  { %v1971_v29 = vsel %vm475_vm1, %v1961_v25, %v4843_v19 }
 0x2ed   :  { %v1924_v31 = vpop.permute.xlu0 %1923 }
 0x2ee   :  { %v1712_v34 = vpop.permute.xlu1 %1711  ;;  %v1973_v37 = vsel %vm496_vm2, %v1963_v35, %v1924_v31 }
 0x2ef   :  { %v1752_v36 = vsel %vm496_vm2, %v1742_v33, %v1712_v34  ;;  %v1962_v34 = vsel %vm454_vm0, %v1772_v32, %v4850_v28 }
 0x2f0   :  { %3690 = vmatmul.mubr.msk.f32.gmra.mrb[12].mxu1 %vm40_vm3, %v1752_v36  ;;  %v1972_v16 = vsel %vm475_vm1, %v1962_v34, %v4852_v30 }
 0x2f1   :  { %3692 = vmatprep.mubr.msk.f32.mxu1 %vm40_vm3, %v1973_v37  ;;  %v1848_v38 = vpop.permute.xlu0 %1847 }
 0x2f2   :  { %v1846_v40 = vpop.permute.xlu1 %1845  ;;  %v1955_v47 = vsel %vm454_vm0, %v1758_v44, %v1848_v38 }
 0x2f3   :  { %v1954_v45 = vsel %vm454_vm0, %v1756_v43, %v1846_v40 }
 0x2f5   :  { %v1888_v41 = vpop.permute.xlu0 %1887 }
 0x2f6   :  { %v1886_v42 = vpop.permute.xlu1 %1885  ;;  %v1965_v50 = vsel %vm475_vm1, %v1955_v47, %v1888_v41 }
 0x2f7   :  { %v1964_v48 = vsel %vm475_vm1, %v1954_v45, %v1886_v42 }
 0x2f9   :  { %v1928_v46 = vpop.permute.xlu0 %1927 }
 0x2fa   :  { %v1926_v49 = vpop.permute.xlu1 %1925  ;;  %v1975_v52 = vsel %vm496_vm2, %v1965_v50, %v1928_v46  ;;  %v2521_v50 = vld [vmem:[%s5231_s3 + $0x8] sm:$0xff] }
 0x2fb   :  { %v1974_v51 = vsel %vm496_vm2, %v1964_v48, %v1926_v49  ;;  %v2520_v49 = vld [vmem:[%s5231_s3] sm:$0xff] }
 0x2fc   :  { %3693 = vmatmul.mubr.msk.f32.gmra.mrb[14].mxu1 %vm40_vm3, %v1974_v51  ;;  %v2522_v51 = vld [vmem:[%s5231_s3 + $0x10] sm:$0xff] }
 0x2fd   :  { %3695 = vmatprep.mubr.msk.f32.mxu1 %vm40_vm3, %v1975_v52  ;;  %v1852_v53 = vpop.permute.xlu0 %1851  ;;  %v3801_v52 = vpack.c.bf16 %v2521_v50, %v2520_v49 }
 0x2fe   :  { %v1850_v54 = vpop.permute.xlu1 %1849  ;;  %v1957_v61 = vsel %vm454_vm0, %v1762_v58, %v1852_v53  ;;  %v2523_v53 = vld [vmem:[%s5231_s3 + $0x18] sm:$0xff]  ;;  %s3913_s3 = smov 32  }
 0x2ff   :  { %v1956_v59 = vsel %vm454_vm0, %v1760_v57, %v1850_v54  ;;  %v3805_v54 = vpack.c.bf16 %v2523_v53, %v2522_v51  ;;  %3802 = vmatprep.subr.bf16.mxu1 %v3801_v52 }
 0x300   :  { %3804 = vmatpush3.bf16.msra.mxu1 %v3801_v52 }
 0x301   :  { %v1892_v55 = vpop.permute.xlu0 %1891  ;;  %3806 = vmatprep.subr.bf16.mxu1 %v3805_v54 }
 0x302   :  { %v1890_v56 = vpop.permute.xlu1 %1889  ;;  %v1967_v0 = vsel %vm475_vm1, %v1957_v61, %v1892_v55 }
 0x303   :  { %v1966_v62 = vsel %vm475_vm1, %v1956_v59, %v1890_v56 }
 0x304   :  { %3808 = vmatpush3.bf16.msra.mxu1 %v3805_v54 }
 0x305   :  { %v1932_v60 = vpop.permute.xlu0 %1931 }
 0x306   :  { %v1930_v63 = vpop.permute.xlu1 %1929  ;;  %v1977_v2 = vsel %vm496_vm2, %v1967_v0, %v1932_v60 }
 0x307   :  { %v1976_v1 = vsel %vm496_vm2, %v1966_v62, %v1930_v63 }
 0x308   :  { %3696 = vmatmul.mubr.msk.f32.gmra.mrb[16].mxu1 %vm40_vm3, %v1976_v1 }
 0x309   :  { %3698 = vmatprep.mubr.msk.f32.mxu1 %vm40_vm3, %v1977_v2  ;;  %v1856_v3 = vpop.permute.xlu0 %1855 }
 0x30a   :  { %v1854_v4 = vpop.permute.xlu1 %1853  ;;  %v1959_v11 = vsel %vm454_vm0, %v1766_v8, %v1856_v3 }
 0x30b   :  { %v1958_v9 = vsel %vm454_vm0, %v1764_v7, %v1854_v4 }
 0x30d   :  { %v1896_v5 = vpop.permute.xlu0 %1895 }
 0x30e   :  { %v1894_v6 = vpop.permute.xlu1 %1893  ;;  %v1969_v14 = vsel %vm475_vm1, %v1959_v11, %v1896_v5 }
 0x30f   :  { %v1968_v12 = vsel %vm475_vm1, %v1958_v9, %v1894_v6 }
 0x311   :  { %v1936_v10 = vpop.permute.xlu0 %1935 }
 0x312   :  { %v1934_v13 = vpop.permute.xlu1 %1933  ;;  %v1979_v17 = vsel %vm496_vm2, %v1969_v14, %v1936_v10 }
 0x313   :  { %v1978_v15 = vsel %vm496_vm2, %v1968_v12, %v1934_v13 }
 0x314   :  { %3699 = vmatmul.mubr.msk.f32.gmra.mrb[18].mxu1 %vm40_vm3, %v1978_v15 }
 0x315   :  { %3701 = vmatprep.mubr.msk.f32.mxu1 %vm40_vm3, %v1979_v17  ;;  %v1940_v23 = vpop.permute.xlu0 %1939 }
 0x316   :  { %v1858_v18 = vpop.permute.xlu1 %1857  ;;  %v1981_v33 = vsel %vm496_vm2, %v1971_v29, %v1940_v23 }
 0x317   :  { %v1960_v24 = vsel %vm454_vm0, %v1768_v21, %v1858_v18  ;;  %vm48_vm0 = vcmask 261120  }
 0x318   :  { %49 = vst.msk [vmem:[#allocation5 + $0x15] sm:$0xff] %vm48_vm0, %v3910_v39  ;;  %53 = vst.msk [vmem:[#allocation5 + $0x37] sm:$0xff] %vm48_vm0, %v3910_v39 }
 0x31a   :  { %v1898_v20 = vpop.permute.xlu1 %1897 }
 0x31b   :  { %v1970_v26 = vsel %vm475_vm1, %v1960_v24, %v1898_v20 }
 0x31e   :  { %v1938_v27 = vpop.permute.xlu1 %1937 }
 0x31f   :  { %v1980_v31 = vsel %vm496_vm2, %v1970_v26, %v1938_v27 }
 0x320   :  { %3702 = vmatmul.mubr.msk.f32.gmra.mrb[20].mxu1 %vm40_vm3, %v1980_v31 }
 0x321   :  { %3704 = vmatprep.mubr.msk.f32.mxu1 %vm40_vm3, %v1981_v33 }
 0x322   :  { %v1942_v35 = vpop.permute.xlu1 %1941 }
 0x323   :  { %v1982_v36 = vsel %vm496_vm2, %v1972_v16, %v1942_v35 }
 0x324   :  { %3705 = vmatmul.mubr.msk.f32.gmra.mrb[22].mxu1 %vm40_vm3, %v1982_v36 }
 0x393   :  { %v3679_v19 = vpop.f32.mrb[4].mxu1 }
 0x394   :  { %vm2211_vm10 = vcmp.ge.f32.partialorder %v3679_v19, 0.0  ;;  %v2231_v37 = vmul.f32 0.2, %v3679_v19  ;;  %v2111_v38 = vpop.f32.mrb[5].mxu1 }
 0x395   :  { %vm2210_vm11 = vcmp.ge.f32.partialorder %v2111_v38, 0.0  ;;  %v2230_v40 = vmul.f32 0.2, %v2111_v38 }
 0x396   :  { %v2251_v41 = vsel %vm2211_vm10, %v3679_v19, %v2231_v37 }
 0x397   :  { %2271 = vst.msk [vmem:[#allocation3 + $0x9] sm:$0xff] %vm475_vm1, %v2251_v41  ;;  %v2250_v28 = vsel %vm2210_vm11, %v2111_v38, %v2230_v40 }
 0x398   :  { %2270 = vst.msk [vmem:[#allocation3 + $0x1] sm:$0xff] %vm475_vm1, %v2250_v28 }
 0x39f   :  { %v3682_v42 = vpop.f32.mrb[6].mxu1  ;;  %v2300_v43 = vld [vmem:[#allocation3 + $0x1] ss:$2 sm:$0xff]  ;;  %v2310_v48 = vld [vmem:[#allocation3 + $0x2] ss:$2 sm:$0xff] }
 0x3a0   :  { %vm2213_vm12 = vcmp.ge.f32.partialorder %v3682_v42, 0.0  ;;  %v2233_v30 = vmul.f32 0.2, %v3682_v42  ;;  %v2121_v44 = vpop.f32.mrb[7].mxu1  ;;  %2334 = vrot.lane.b32.xlu0 %v2300_v43, %s3907_s9 }
 0x3a1   :  { %vm2212_vm2 = vcmp.ge.f32.partialorder %v2121_v44, 0.0  ;;  %v2232_v45 = vmul.f32 0.2, %v2121_v44 }
 0x3a2   :  { %v2253_v46 = vsel %vm2213_vm12, %v3682_v42, %v2233_v30 }
 0x3a3   :  { %2273 = vst.msk [vmem:[#allocation3 + $0x19] sm:$0xff] %vm475_vm1, %v2253_v46  ;;  %v2252_v47 = vsel %vm2212_vm2, %v2121_v44, %v2232_v45 }
 0x3a4   :  { %2272 = vst.msk [vmem:[#allocation3 + $0x11] sm:$0xff] %vm475_vm1, %v2252_v47  ;;  %2354 = vrot.lane.b32.xlu0 %v2310_v48, %s3911_s2 }
 0x3ab   :  { %v3685_v55 = vpop.f32.mrb[8].mxu1  ;;  %v2320_v56 = vld [vmem:[#allocation3 + $0x3] ss:$2 sm:$0xff]  ;;  %v2312_v63 = vld [vmem:[#allocation3 + $0x12] ss:$2 sm:$0xff] }
 0x3ac   :  { %v2302_v57 = vld [vmem:[#allocation3 + $0x11] ss:$2 sm:$0xff]  ;;  %vm2215_vm13 = vcmp.ge.f32.partialorder %v3685_v55, 0.0  ;;  %v2235_v58 = vmul.f32 0.2, %v3685_v55  ;;  %v2131_v59 = vpop.f32.mrb[9].mxu1  ;;  %2374 = vrot.lane.b32.xlu0 %v2320_v56, %s3912_s22 }
 0x3ad   :  { %2336 = vrot.lane.b32.xlu1 %v2302_v57, %s3907_s9  ;;  %vm2214_vm14 = vcmp.ge.f32.partialorder %v2131_v59, 0.0  ;;  %v2234_v60 = vmul.f32 0.2, %v2131_v59 }
 0x3ae   :  { %v2255_v61 = vsel %vm2215_vm13, %v3685_v55, %v2235_v58 }
 0x3af   :  { %2275 = vst.msk [vmem:[#allocation3 + $0x29] sm:$0xff] %vm475_vm1, %v2255_v61  ;;  %v2254_v62 = vsel %vm2214_vm14, %v2131_v59, %v2234_v60 }
 0x3b0   :  { %2274 = vst.msk [vmem:[#allocation3 + $0x21] sm:$0xff] %vm475_vm1, %v2254_v62 }
 0x3b1   :  { %2356 = vrot.lane.b32.xlu1 %v2312_v63, %s3911_s2 }
 0x3b7   :  { %v3688_v0 = vpop.f32.mrb[10].mxu1  ;;  %v2304_v1 = vld [vmem:[#allocation3 + $0x21] ss:$2 sm:$0xff]  ;;  %v2314_v8 = vld [vmem:[#allocation3 + $0x22] ss:$2 sm:$0xff] }
 0x3b8   :  { %v2322_v2 = vld [vmem:[#allocation3 + $0x13] ss:$2 sm:$0xff]  ;;  %vm2217_vm15 = vcmp.ge.f32.partialorder %v3688_v0, 0.0  ;;  %v2237_v3 = vmul.f32 0.2, %v3688_v0  ;;  %v2141_v4 = vpop.f32.mrb[11].mxu1  ;;  %2338 = vrot.lane.b32.xlu0 %v2304_v1, %s3907_s9 }
 0x3b9   :  { %2376 = vrot.lane.b32.xlu1 %v2322_v2, %s3912_s22  ;;  %vm2216_vm4 = vcmp.ge.f32.partialorder %v2141_v4, 0.0  ;;  %v2236_v5 = vmul.f32 0.2, %v2141_v4 }
 0x3ba   :  { %v2257_v6 = vsel %vm2217_vm15, %v3688_v0, %v2237_v3 }
 0x3bb   :  { %2277 = vst.msk [vmem:[#allocation3 + $0x39] sm:$0xff] %vm475_vm1, %v2257_v6  ;;  %v2256_v7 = vsel %vm2216_vm4, %v2141_v4, %v2236_v5  ;;  %v2290_v6 = vld [vmem:[#allocation3] ss:$2 sm:$0xff]  ;;  %vm2399_vm4 = vcmask 195584  }
 0x3bc   :  { %2276 = vst.msk [vmem:[#allocation3 + $0x31] sm:$0xff] %vm475_vm1, %v2256_v7  ;;  %2358 = vrot.lane.b32.xlu0 %v2314_v8, %s3911_s2 }
 0x3c3   :  { %v3691_v9 = vpop.f32.mrb[12].mxu1  ;;  %v2324_v10 = vld [vmem:[#allocation3 + $0x23] ss:$2 sm:$0xff]  ;;  %v2316_v18 = vld [vmem:[#allocation3 + $0x32] ss:$2 sm:$0xff] }
 0x3c4   :  { %v2306_v11 = vld [vmem:[#allocation3 + $0x31] ss:$2 sm:$0xff]  ;;  %vm2219_vm5 = vcmp.ge.f32.partialorder %v3691_v9, 0.0  ;;  %v2239_v12 = vmul.f32 0.2, %v3691_v9  ;;  %v2151_v13 = vpop.f32.mrb[13].mxu1  ;;  %2378 = vrot.lane.b32.xlu0 %v2324_v10, %s3912_s22 }
 0x3c5   :  { %2340 = vrot.lane.b32.xlu1 %v2306_v11, %s3907_s9  ;;  %vm2218_vm6 = vcmp.ge.f32.partialorder %v2151_v13, 0.0  ;;  %v2238_v14 = vmul.f32 0.2, %v2151_v13 }
 0x3c6   :  { %v2259_v15 = vsel %vm2219_vm5, %v3691_v9, %v2239_v12  ;;  %vm38_vm5 = vcmask 122880  }
 0x3c7   :  { %2279 = vst.msk [vmem:[#allocation3 + $0x49] sm:$0xff] %vm475_vm1, %v2259_v15  ;;  %v2258_v17 = vsel %vm2218_vm6, %v2151_v13, %v2238_v14  ;;  %v2292_v13 = vld [vmem:[#allocation3 + $0x10] ss:$2 sm:$0xff] }
 0x3c8   :  { %2278 = vst.msk [vmem:[#allocation3 + $0x41] sm:$0xff] %vm475_vm1, %v2258_v17 }
 0x3c9   :  { %2360 = vrot.lane.b32.xlu1 %v2316_v18, %s3911_s2  ;;  %42 = vst.msk [vmem:[#allocation4 + $0x31] sm:$0x1] %vm38_vm5, %v3910_v39  ;;  %39 = vst.msk [vmem:[#allocation4] sm:$0x1] %vm38_vm5, %v3910_v39 }
 0x3ca   :  { %43 = vst.msk [vmem:[#allocation4 + $0x32] sm:$0x1] %vm38_vm5, %v3910_v39  ;;  %45 = vst.msk [vmem:[#allocation4 + $0x63] sm:$0x1] %vm38_vm5, %v3910_v39  ;;  %vm50_vm5 = vcmask 258048  }
 0x3cb   :  { %51 = vst.msk [vmem:[#allocation5 + $0x1d] sm:$0x1f] %vm50_vm5, %v3910_v39  ;;  %54 = vst.msk [vmem:[#allocation5 + $0x3f] sm:$0x1f] %vm50_vm5, %v3910_v39 }
 0x3cf   :  { %v3694_v20 = vpop.f32.mrb[14].mxu1  ;;  %v2308_v21 = vld [vmem:[#allocation3 + $0x41] ss:$2 sm:$0xff]  ;;  %v2318_v29 = vld [vmem:[#allocation3 + $0x42] ss:$2 sm:$0xff] }
 0x3d0   :  { %v2326_v22 = vld [vmem:[#allocation3 + $0x33] ss:$2 sm:$0xff]  ;;  %vm2221_vm7 = vcmp.ge.f32.partialorder %v3694_v20, 0.0  ;;  %v2241_v23 = vmul.f32 0.2, %v3694_v20  ;;  %v2161_v24 = vpop.f32.mrb[15].mxu1  ;;  %2342 = vrot.lane.b32.xlu0 %v2308_v21, %s3907_s9 }
 0x3d1   :  { %2380 = vrot.lane.b32.xlu1 %v2326_v22, %s3912_s22  ;;  %vm2220_vm8 = vcmp.ge.f32.partialorder %v2161_v24, 0.0  ;;  %v2240_v25 = vmul.f32 0.2, %v2161_v24  ;;  %v2328_v31 = vld [vmem:[#allocation3 + $0x43] ss:$2 sm:$0xff] }
 0x3d2   :  { %v2261_v26 = vsel %vm2221_vm7, %v3694_v20, %v2241_v23  ;;  %v2294_v22 = vld [vmem:[#allocation3 + $0x20] ss:$2 sm:$0xff] }
 0x3d3   :  { %2281 = vst.msk [vmem:[#allocation3 + $0x5b] sm:$0xff] %vm475_vm1, %v2261_v26  ;;  %v2260_v27 = vsel %vm2220_vm8, %v2161_v24, %v2240_v25 }
 0x3d4   :  { %2280 = vst.msk [vmem:[#allocation3 + $0x53] sm:$0xff] %vm475_vm1, %v2260_v27 }
 0x3d5   :  { %2362 = vrot.lane.b32.xlu1 %v2318_v29, %s3911_s2 }
 0x3d9   :  { %2382 = vrot.lane.b32.xlu1 %v2328_v31, %s3912_s22  ;;  %v2296_v31 = vld [vmem:[#allocation3 + $0x30] ss:$2 sm:$0xff] }
 0x3db   :  { %v3697_v32 = vpop.f32.mrb[16].mxu1  ;;  %v2416_v33 = vld [vmem:[#allocation3 + $0x53] ss:$2 sm:$0xff]  ;;  %v2426_v37 = vld [vmem:[#allocation3 + $0x54] ss:$2 sm:$0xff] }
 0x3dc   :  { %vm2223_vm9 = vcmp.ge.f32.partialorder %v3697_v32, 0.0  ;;  %v2243_v34 = vmul.f32 0.2, %v3697_v32  ;;  %v2171_v16 = vpop.f32.mrb[17].mxu1  ;;  %2450 = vrot.lane.b32.xlu0 %v2416_v33, %s3907_s9 }
 0x3dd   :  { %vm2222_vm10 = vcmp.ge.f32.partialorder %v2171_v16, 0.0  ;;  %v2242_v35 = vmul.f32 0.2, %v2171_v16 }
 0x3de   :  { %v2263_v36 = vsel %vm2223_vm9, %v3697_v32, %v2243_v34 }
 0x3df   :  { %2283 = vst.msk [vmem:[#allocation3 + $0x6b] sm:$0xff] %vm475_vm1, %v2263_v36  ;;  %v2262_v19 = vsel %vm2222_vm10, %v2171_v16, %v2242_v35 }
 0x3e0   :  { %2282 = vst.msk [vmem:[#allocation3 + $0x63] sm:$0xff] %vm475_vm1, %v2262_v19  ;;  %2470 = vrot.lane.b32.xlu0 %v2426_v37, %s3911_s2  ;;  %v2298_v19 = vld [vmem:[#allocation3 + $0x40] ss:$2 sm:$0xff] }
 0x3e7   :  { %v3700_v38 = vpop.f32.mrb[18].mxu1  ;;  %v2418_v40 = vld [vmem:[#allocation3 + $0x63] ss:$2 sm:$0xff]  ;;  %v2428_v45 = vld [vmem:[#allocation3 + $0x64] ss:$2 sm:$0xff] }
 0x3e8   :  { %v2436_v41 = vld [vmem:[#allocation3 + $0x55] ss:$2 sm:$0xff]  ;;  %vm2225_vm11 = vcmp.ge.f32.partialorder %v3700_v38, 0.0  ;;  %v2245_v28 = vmul.f32 0.2, %v3700_v38  ;;  %v2181_v42 = vpop.f32.mrb[19].mxu1  ;;  %2452 = vrot.lane.b32.xlu0 %v2418_v40, %s3907_s9 }
 0x3e9   :  { %2490 = vrot.lane.b32.xlu1 %v2436_v41, %s3912_s22  ;;  %vm2224_vm12 = vcmp.ge.f32.partialorder %v2181_v42, 0.0  ;;  %v2244_v43 = vmul.f32 0.2, %v2181_v42 }
 0x3ea   :  { %v2265_v30 = vsel %vm2225_vm11, %v3700_v38, %v2245_v28 }
 0x3eb   :  { %2285 = vst.msk [vmem:[#allocation3 + $0x7b] sm:$0xff] %vm475_vm1, %v2265_v30  ;;  %v2264_v44 = vsel %vm2224_vm12, %v2181_v42, %v2244_v43  ;;  %v2406_v43 = vld [vmem:[#allocation3 + $0x52] ss:$2 sm:$0xff] }
 0x3ec   :  { %2284 = vst.msk [vmem:[#allocation3 + $0x73] sm:$0xff] %vm475_vm1, %v2264_v44  ;;  %2472 = vrot.lane.b32.xlu0 %v2428_v45, %s3911_s2 }
 0x3f3   :  { %v3703_v46 = vpop.f32.mrb[20].mxu1  ;;  %v2438_v47 = vld [vmem:[#allocation3 + $0x65] ss:$2 sm:$0xff]  ;;  %v2430_v55 = vld [vmem:[#allocation3 + $0x74] ss:$2 sm:$0xff] }
 0x3f4   :  { %v2420_v48 = vld [vmem:[#allocation3 + $0x73] ss:$2 sm:$0xff]  ;;  %vm2227_vm2 = vcmp.ge.f32.partialorder %v3703_v46, 0.0  ;;  %v2247_v49 = vmul.f32 0.2, %v3703_v46  ;;  %2492 = vrot.lane.b32.xlu0 %v2438_v47, %s3912_s22  ;;  %v2191_v50 = vpop.f32.mrb[21].mxu1 }
 0x3f5   :  { %2454 = vrot.lane.b32.xlu1 %v2420_v48, %s3907_s9  ;;  %vm2226_vm13 = vcmp.ge.f32.partialorder %v2191_v50, 0.0  ;;  %v2246_v51 = vmul.f32 0.2, %v2191_v50 }
 0x3f6   :  { %v2267_v52 = vsel %vm2227_vm2, %v3703_v46, %v2247_v49  ;;  %v2408_v49 = vld [vmem:[#allocation3 + $0x62] ss:$2 sm:$0xff] }
 0x3f7   :  { %2287 = vst.msk [vmem:[#allocation3 + $0x8b] sm:$0xff] %vm475_vm1, %v2267_v52  ;;  %v2266_v53 = vsel %vm2226_vm13, %v2191_v50, %v2246_v51  ;;  %v3706_v54 = vpop.f32.mrb[22].mxu1 }
 0x3f8   :  { %2286 = vst.msk [vmem:[#allocation3 + $0x83] sm:$0xff] %vm475_vm1, %v2266_v53  ;;  %vm2229_vm14 = vcmp.ge.f32.partialorder %v3706_v54, 0.0  ;;  %v2249_v56 = vmul.f32 0.2, %v3706_v54  ;;  %v2201_v57 = vpop.f32.mrb[23].mxu1 }
 0x3f9   :  { %2474 = vrot.lane.b32.xlu1 %v2430_v55, %s3911_s2  ;;  %vm2228_vm15 = vcmp.ge.f32.partialorder %v2201_v57, 0.0  ;;  %v2248_v58 = vmul.f32 0.2, %v2201_v57 }
 0x3fa   :  { %v2269_v59 = vsel %vm2229_vm14, %v3706_v54, %v2249_v56  ;;  %v2410_v56 = vld [vmem:[#allocation3 + $0x72] ss:$2 sm:$0xff]  ;;  %vm2774_vm14 = vcmask 392192  }
 0x3fb   :  { %2289 = vst.msk [vmem:[#allocation3 + $0x9b] sm:$0xff] %vm475_vm1, %v2269_v59  ;;  %v2268_v60 = vsel %vm2228_vm15, %v2201_v57, %v2248_v58  ;;  %vm2855_vm15 = vcmask 523264  }
 0x3fc   :  { %2288 = vst.msk [vmem:[#allocation3 + $0x93] sm:$0xff] %vm475_vm1, %v2268_v60 }
 0x3ff   :  { %v2440_v61 = vld [vmem:[#allocation3 + $0x75] ss:$2 sm:$0xff]  ;;  %v2432_v63 = vld [vmem:[#allocation3 + $0x84] ss:$2 sm:$0xff] }
 0x400   :  { %v2422_v62 = vld [vmem:[#allocation3 + $0x83] ss:$2 sm:$0xff]  ;;  %2494 = vrot.lane.b32.xlu1 %v2440_v61, %s3912_s22 }
 0x401   :  { %2456 = vrot.lane.b32.xlu0 %v2422_v62, %s3907_s9 }
 0x403   :  { %v2424_v0 = vld [vmem:[#allocation3 + $0x93] ss:$2 sm:$0xff]  ;;  %v2434_v2 = vld [vmem:[#allocation3 + $0x94] ss:$2 sm:$0xff] }
 0x404   :  { %2458 = vrot.lane.b32.xlu1 %v2424_v0, %s3907_s9  ;;  %v2442_v1 = vld [vmem:[#allocation3 + $0x85] ss:$2 sm:$0xff]  ;;  %v2444_v3 = vld [vmem:[#allocation3 + $0x95] ss:$2 sm:$0xff]  ;;  %v2412_v0 = vld [vmem:[#allocation3 + $0x82] ss:$2 sm:$0xff] }
 0x405   :  { %2476 = vrot.lane.b32.xlu0 %v2432_v63, %s3911_s2 }
 0x408   :  { %2478 = vrot.lane.b32.xlu1 %v2434_v2, %s3911_s2 }
 0x409   :  { %2496 = vrot.lane.b32.xlu0 %v2442_v1, %s3912_s22 }
 0x40c   :  { %2498 = vrot.lane.b32.xlu1 %v2444_v3, %s3912_s22 }
 0x412   :  { %v2335_v4 = vpop.permute.xlu0 %2334 }
 0x413   :  { %v2389_v7 = vsel %vm475_vm1, %v2290_v6, %v2335_v4  ;;  %v2414_v6 = vld [vmem:[#allocation3 + $0x92] ss:$2 sm:$0xff] }
 0x416   :  { %v2355_v5 = vpop.permute.xlu0 %2354 }
 0x417   :  { %v2394_v8 = vsel %vm40_vm3, %v2389_v7, %v2355_v5 }
 0x41e   :  { %v2375_v9 = vpop.permute.xlu0 %2374 }
 0x41f   :  { %v2400_v10 = vsel %vm2399_vm4, %v2394_v8, %v2375_v9  ;;  %v2337_v11 = vpop.permute.xlu1 %2336 }
 0x420   :  { %3715 = vmatprep.mubr.msk.f32.mxu1 %vm48_vm0, %v2400_v10  ;;  %v2390_v14 = vsel %vm475_vm1, %v2292_v13, %v2337_v11 }
 0x423   :  { %v2357_v12 = vpop.permute.xlu1 %2356 }
 0x424   :  { %v2395_v15 = vsel %vm40_vm3, %v2390_v14, %v2357_v12 }
 0x42a   :  { %v2339_v20 = vpop.permute.xlu0 %2338 }
 0x42b   :  { %v2377_v17 = vpop.permute.xlu1 %2376  ;;  %v2391_v23 = vsel %vm475_vm1, %v2294_v22, %v2339_v20 }
 0x42c   :  { %v2401_v18 = vsel %vm2399_vm4, %v2395_v15, %v2377_v17 }
 0x42d   :  { %3716 = vmatmul.mubr.msk.f32.vlgmr.msra.gmra.mrb[24].mxu1 %vm48_vm0, %v2401_v18 }
 0x42e   :  { %v2359_v21 = vpop.permute.xlu0 %2358 }
 0x42f   :  { %v2396_v24 = vsel %vm40_vm3, %v2391_v23, %v2359_v21 }
 0x436   :  { %v2379_v25 = vpop.permute.xlu0 %2378 }
 0x437   :  { %v2402_v26 = vsel %vm2399_vm4, %v2396_v24, %v2379_v25  ;;  %v2341_v27 = vpop.permute.xlu1 %2340 }
 0x438   :  { %3718 = vmatprep.mubr.msk.f32.mxu1 %vm48_vm0, %v2402_v26  ;;  %v2392_v32 = vsel %vm475_vm1, %v2296_v31, %v2341_v27  ;;  %v2847_v27 = vld [vmem:[%s5232_s4] sm:$0xff]  ;;  %v2849_v31 = vld [vmem:[%s5232_s4 + $0x10] sm:$0xff] }
 0x43b   :  { %v2361_v29 = vpop.permute.xlu1 %2360 }
 0x43c   :  { %v2397_v33 = vsel %vm40_vm3, %v2392_v32, %v2361_v29  ;;  %v2848_v29 = vld [vmem:[%s5232_s4 + $0x8] sm:$0xff] }
 0x43d   :  { %v3809_v32 = vpack.c.bf16 %v2848_v29, %v2847_v27 }
 0x43f   :  { %3810 = vmatprep.subr.bf16.mxu1 %v3809_v32 }
 0x440   :  { %3812 = vmatpush3.bf16.msra.mxu1 %v3809_v32 }
 0x442   :  { %v2343_v35 = vpop.permute.xlu0 %2342 }
 0x443   :  { %v2381_v34 = vpop.permute.xlu1 %2380  ;;  %v2393_v37 = vsel %vm475_vm1, %v2298_v19, %v2343_v35  ;;  %v2852_v35 = vld [vmem:[%s5232_s4 + $0x28] sm:$0xff]  ;;  %v2853_v19 = vld [vmem:[%s5232_s4 + $0x30] sm:$0xff] }
 0x444   :  { %v2403_v16 = vsel %vm2399_vm4, %v2397_v33, %v2381_v34  ;;  %v2850_v33 = vld [vmem:[%s5232_s4 + $0x18] sm:$0xff] }
 0x445   :  { %3719 = vmatmul.mubr.msk.f32.gmra.mrb[26].mxu1 %vm48_vm0, %v2403_v16  ;;  %v3813_v34 = vpack.c.bf16 %v2850_v33, %v2849_v31  ;;  %v2851_v16 = vld [vmem:[%s5232_s4 + $0x20] sm:$0xff] }
 0x447   :  { %v2363_v36 = vpop.permute.xlu1 %2362  ;;  %3814 = vmatprep.subr.bf16.mxu1 %v3813_v34 }
 0x448   :  { %v2398_v38 = vsel %vm40_vm3, %v2393_v37, %v2363_v36  ;;  %v3817_v36 = vpack.c.bf16 %v2852_v35, %v2851_v16  ;;  %3816 = vmatpush3.bf16.msra.mxu1 %v3813_v34 }
 0x44a   :  { %3818 = vmatprep.subr.bf16.mxu1 %v3817_v36 }
 0x44b   :  { %v2383_v40 = vpop.permute.xlu1 %2382 }
 0x44c   :  { %v2404_v41 = vsel %vm2399_vm4, %v2398_v38, %v2383_v40  ;;  %v2854_v40 = vld [vmem:[%s5232_s4 + $0x38] sm:$0xff]  ;;  %3820 = vmatpush3.bf16.msra.mxu1 %v3817_v36 }
 0x44d   :  { %3721 = vmatprep.mubr.msk.f32.mxu1 %vm48_vm0, %v2404_v41  ;;  %v3821_v41 = vpack.c.bf16 %v2854_v40, %v2853_v19 }
 0x44e   :  { %v2451_v28 = vpop.permute.xlu0 %2450 }
 0x44f   :  { %v2505_v30 = vsel %vm475_vm1, %v2406_v43, %v2451_v28  ;;  %3822 = vmatprep.subr.bf16.mxu1 %v3821_v41 }
 0x450   :  { %3824 = vmatpush3.bf16.msra.mxu1 %v3821_v41 }
 0x452   :  { %v2471_v42 = vpop.permute.xlu0 %2470 }
 0x453   :  { %v2510_v44 = vsel %vm40_vm3, %v2505_v30, %v2471_v42 }
 0x45a   :  { %v2453_v47 = vpop.permute.xlu0 %2452 }
 0x45b   :  { %v2491_v45 = vpop.permute.xlu1 %2490  ;;  %v2506_v50 = vsel %vm475_vm1, %v2408_v49, %v2453_v47 }
 0x45c   :  { %v2515_v46 = vsel %vm2399_vm4, %v2510_v44, %v2491_v45 }
 0x45d   :  { %3722 = vmatmul.mubr.msk.f32.gmra.mrb[28].mxu1 %vm48_vm0, %v2515_v46 }
 0x45e   :  { %v2473_v48 = vpop.permute.xlu0 %2472 }
 0x45f   :  { %v2511_v51 = vsel %vm40_vm3, %v2506_v50, %v2473_v48 }
 0x466   :  { %v2493_v52 = vpop.permute.xlu0 %2492 }
 0x467   :  { %v2516_v53 = vsel %vm2399_vm4, %v2511_v51, %v2493_v52  ;;  %v2455_v54 = vpop.permute.xlu1 %2454 }
 0x468   :  { %3724 = vmatprep.mubr.msk.f32.mxu1 %vm48_vm0, %v2516_v53  ;;  %v2507_v57 = vsel %vm475_vm1, %v2410_v56, %v2455_v54 }
 0x46b   :  { %v2475_v55 = vpop.permute.xlu1 %2474 }
 0x46c   :  { %v2512_v58 = vsel %vm40_vm3, %v2507_v57, %v2475_v55 }
 0x472   :  { %v2495_v59 = vpop.permute.xlu1 %2494 }
 0x473   :  { %v2457_v60 = vpop.permute.xlu0 %2456  ;;  %v2517_v61 = vsel %vm2399_vm4, %v2512_v58, %v2495_v59 }
 0x474   :  { %3725 = vmatmul.mubr.msk.f32.gmra.mrb[30].mxu1 %vm48_vm0, %v2517_v61  ;;  %v2508_v1 = vsel %vm475_vm1, %v2412_v0, %v2457_v60 }
 0x476   :  { %v2459_v63 = vpop.permute.xlu1 %2458 }
 0x477   :  { %v2477_v62 = vpop.permute.xlu0 %2476  ;;  %v2509_v7 = vsel %vm475_vm1, %v2414_v6, %v2459_v63 }
 0x478   :  { %v2513_v2 = vsel %vm40_vm3, %v2508_v1, %v2477_v62 }
 0x47a   :  { %v2479_v4 = vpop.permute.xlu1 %2478 }
 0x47b   :  { %v2497_v3 = vpop.permute.xlu0 %2496  ;;  %v2514_v8 = vsel %vm40_vm3, %v2509_v7, %v2479_v4 }
 0x47c   :  { %v2518_v5 = vsel %vm2399_vm4, %v2513_v2, %v2497_v3 }
 0x47d   :  { %3727 = vmatprep.mubr.msk.f32.mxu1 %vm48_vm0, %v2518_v5 }
 0x47e   :  { %v2499_v9 = vpop.permute.xlu1 %2498 }
 0x47f   :  { %v2519_v10 = vsel %vm2399_vm4, %v2514_v8, %v2499_v9  ;;  %vm46_vm4 = vcmask 253952  }
 0x480   :  { %3728 = vmatmul.mubr.msk.f32.gmra.mrb[32].mxu1 %vm48_vm0, %v2519_v10  ;;  %47 = vst.msk [vmem:[#allocation5] sm:$0x1] %vm46_vm4, %v3910_v39  ;;  %52 = vst.msk [vmem:[#allocation5 + $0x22] sm:$0x1] %vm46_vm4, %v3910_v39  ;;  %v3090_v39 = vld [vmem:[%s5233_s5 + $0x20] sm:$0xff]  ;;  %vm3212_vm4 = vcmask 1041408  }
 0x500   :  { %v3717_v11 = vpop.f32.mrb[24].mxu1 }
 0x501   :  { %vm2670_vm6 = vcmp.ge.f32.partialorder %v3717_v11, 0.0  ;;  %v2680_v12 = vmul.f32 0.2, %v3717_v11  ;;  %v2620_v13 = vpop.f32.mrb[25].mxu1 }
 0x502   :  { %vm2669_vm1 = vcmp.ge.f32.partialorder %v2620_v13, 0.0  ;;  %v2679_v14 = vmul.f32 0.2, %v2620_v13 }
 0x503   :  { %v2690_v15 = vsel %vm2670_vm6, %v3717_v11, %v2680_v12 }
 0x504   :  { %2700 = vst.msk [vmem:[#allocation4 + $0x9] sm:$0xff] %vm40_vm3, %v2690_v15  ;;  %v2689_v17 = vsel %vm2669_vm1, %v2620_v13, %v2679_v14 }
 0x505   :  { %2699 = vst.msk [vmem:[#allocation4 + $0x1] sm:$0xff] %vm40_vm3, %v2689_v17 }
 0x50c   :  { %v2715_v18 = vld [vmem:[#allocation4 + $0x1] ss:$2 sm:$0xff]  ;;  %v2721_v20 = vld [vmem:[#allocation4 + $0x2] ss:$2 sm:$0xff] }
 0x50d   :  { %2735 = vrot.lane.b32.xlu0 %v2715_v18, %s3911_s2  ;;  %v2709_v10 = vld [vmem:[#allocation4] ss:$2 sm:$0xff] }
 0x511   :  { %2747 = vrot.lane.b32.xlu0 %v2721_v20, %s3913_s3 }
 0x518   :  { %v3720_v21 = vpop.f32.mrb[26].mxu1 }
 0x519   :  { %vm2672_vm7 = vcmp.ge.f32.partialorder %v3720_v21, 0.0  ;;  %v2682_v22 = vmul.f32 0.2, %v3720_v21  ;;  %v2630_v23 = vpop.f32.mrb[27].mxu1 }
 0x51a   :  { %vm2671_vm8 = vcmp.ge.f32.partialorder %v2630_v23, 0.0  ;;  %v2681_v24 = vmul.f32 0.2, %v2630_v23 }
 0x51b   :  { %v2692_v25 = vsel %vm2672_vm7, %v3720_v21, %v2682_v22 }
 0x51c   :  { %2702 = vst.msk [vmem:[#allocation4 + $0x19] sm:$0xff] %vm40_vm3, %v2692_v25  ;;  %v2691_v26 = vsel %vm2671_vm8, %v2630_v23, %v2681_v24  ;;  %vm2989_vm8 = vcmask 257024  }
 0x51d   :  { %2701 = vst.msk [vmem:[#allocation4 + $0x11] sm:$0xff] %vm40_vm3, %v2691_v26 }
 0x524   :  { %v2727_v37 = vld [vmem:[#allocation4 + $0x3] ss:$2 sm:$0xff]  ;;  %v2723_v28 = vld [vmem:[#allocation4 + $0x12] ss:$2 sm:$0xff] }
 0x525   :  { %v2717_v38 = vld [vmem:[#allocation4 + $0x11] ss:$2 sm:$0xff]  ;;  %2759 = vrot.lane.b32.xlu0 %v2727_v37, %s3914_s19  ;;  %v2711_v18 = vld [vmem:[#allocation4 + $0x10] ss:$2 sm:$0xff] }
 0x526   :  { %2737 = vrot.lane.b32.xlu1 %v2717_v38, %s3911_s2 }
 0x52a   :  { %2749 = vrot.lane.b32.xlu1 %v2723_v28, %s3913_s3 }
 0x530   :  { %v3723_v42 = vpop.f32.mrb[28].mxu1 }
 0x531   :  { %vm2674_vm9 = vcmp.ge.f32.partialorder %v3723_v42, 0.0  ;;  %v2684_v43 = vmul.f32 0.2, %v3723_v42  ;;  %v2640_v30 = vpop.f32.mrb[29].mxu1 }
 0x532   :  { %vm2673_vm10 = vcmp.ge.f32.partialorder %v2640_v30, 0.0  ;;  %v2683_v44 = vmul.f32 0.2, %v2640_v30 }
 0x533   :  { %v2694_v45 = vsel %vm2674_vm9, %v3723_v42, %v2684_v43 }
 0x534   :  { %2704 = vst.msk [vmem:[#allocation4 + $0x33] sm:$0xff] %vm40_vm3, %v2694_v45  ;;  %v2693_v46 = vsel %vm2673_vm10, %v2640_v30, %v2683_v44 }
 0x535   :  { %2703 = vst.msk [vmem:[#allocation4 + $0x21] sm:$0xff] %vm40_vm3, %v2693_v46 }
 0x53c   :  { %v2719_v47 = vld [vmem:[#allocation4 + $0x21] ss:$2 sm:$0xff]  ;;  %v2725_v49 = vld [vmem:[#allocation4 + $0x22] ss:$2 sm:$0xff] }
 0x53d   :  { %v2729_v48 = vld [vmem:[#allocation4 + $0x13] ss:$2 sm:$0xff]  ;;  %2739 = vrot.lane.b32.xlu0 %v2719_v47, %s3911_s2  ;;  %v2731_v50 = vld [vmem:[#allocation4 + $0x23] ss:$2 sm:$0xff]  ;;  %v2713_v26 = vld [vmem:[#allocation4 + $0x20] ss:$2 sm:$0xff] }
 0x53e   :  { %2761 = vrot.lane.b32.xlu1 %v2729_v48, %s3914_s19 }
 0x542   :  { %2751 = vrot.lane.b32.xlu1 %v2725_v49, %s3913_s3 }
 0x546   :  { %2763 = vrot.lane.b32.xlu1 %v2731_v50, %s3914_s19 }
 0x547   :  { %v3726_v51 = vpop.f32.mrb[30].mxu1 }
 0x548   :  { %vm2676_vm11 = vcmp.ge.f32.partialorder %v3726_v51, 0.0  ;;  %v2686_v52 = vmul.f32 0.2, %v3726_v51  ;;  %v2650_v53 = vpop.f32.mrb[31].mxu1 }
 0x549   :  { %vm2675_vm12 = vcmp.ge.f32.partialorder %v2650_v53, 0.0  ;;  %v2685_v54 = vmul.f32 0.2, %v2650_v53 }
 0x54a   :  { %v2696_v55 = vsel %vm2676_vm11, %v3726_v51, %v2686_v52  ;;  %v3086_v51 = vld [vmem:[%s5233_s5] sm:$0xff]  ;;  %v3087_v52 = vld [vmem:[%s5233_s5 + $0x8] sm:$0xff]  ;;  %vm3037_vm11 = vcmask 785408  }
 0x54b   :  { %2706 = vst.msk [vmem:[#allocation4 + $0x43] sm:$0xff] %vm40_vm3, %v2696_v55  ;;  %v2695_v56 = vsel %vm2675_vm12, %v2650_v53, %v2685_v54  ;;  %v3088_v53 = vld [vmem:[%s5233_s5 + $0x10] sm:$0xff]  ;;  %v3825_v54 = vpack.c.bf16 %v3087_v52, %v3086_v51  ;;  %v3089_v55 = vld [vmem:[%s5233_s5 + $0x18] sm:$0xff]  ;;  %vm3202_vm12 = vcmask 517120  }
 0x54c   :  { %2705 = vst.msk [vmem:[#allocation4 + $0x3b] sm:$0xff] %vm40_vm3, %v2695_v56  ;;  %v3829_v56 = vpack.c.bf16 %v3089_v55, %v3088_v53 }
 0x54d   :  { %3826 = vmatprep.subr.bf16.mxu0 %v3825_v54 }
 0x54e   :  { %3828 = vmatpush3.bf16.msra.mxu0 %v3825_v54 }
 0x54f   :  { %3830 = vmatprep.subr.bf16.mxu0 %v3829_v56 }
 0x552   :  { %3832 = vmatpush3.bf16.msra.mxu0 %v3829_v56 }
 0x553   :  { %v3729_v57 = vpop.f32.mrb[32].mxu1  ;;  %v2785_v58 = vld [vmem:[#allocation4 + $0x33] ss:$2 sm:$0xff]  ;;  %v2791_v1 = vld [vmem:[#allocation4 + $0x34] ss:$2 sm:$0xff] }
 0x554   :  { %v2797_v59 = vld [vmem:[#allocation4 + $0x35] ss:$2 sm:$0xff]  ;;  %vm2678_vm2 = vcmp.ge.f32.partialorder %v3729_v57, 0.0  ;;  %v2688_v60 = vmul.f32 0.2, %v3729_v57  ;;  %2805 = vrot.lane.b32.xlu0 %v2785_v58, %s3911_s2  ;;  %v2660_v61 = vpop.f32.mrb[33].mxu1 }
 0x555   :  { %2829 = vrot.lane.b32.xlu1 %v2797_v59, %s3914_s19  ;;  %vm2677_vm13 = vcmp.ge.f32.partialorder %v2660_v61, 0.0  ;;  %v2687_v62 = vmul.f32 0.2, %v2660_v61  ;;  %v2779_v34 = vld [vmem:[#allocation4 + $0x32] ss:$2 sm:$0xff] }
 0x556   :  { %v2698_v63 = vsel %vm2678_vm2, %v3729_v57, %v2688_v60  ;;  %v3091_v57 = vld [vmem:[%s5233_s5 + $0x28] sm:$0xff]  ;;  %v3092_v59 = vld [vmem:[%s5233_s5 + $0x30] sm:$0xff]  ;;  %v3093_v60 = vld [vmem:[%s5233_s5 + $0x38] sm:$0xff] }
 0x557   :  { %2708 = vst.msk [vmem:[#allocation4 + $0x53] sm:$0xff] %vm40_vm3, %v2698_v63  ;;  %v2697_v0 = vsel %vm2677_vm13, %v2660_v61, %v2687_v62  ;;  %v3833_v58 = vpack.c.bf16 %v3091_v57, %v3090_v39  ;;  %v3837_v61 = vpack.c.bf16 %v3093_v60, %v3092_v59  ;;  %v3094_v62 = vld [vmem:[%s5233_s5 + $0x40] sm:$0xff]  ;;  %v3095_v63 = vld [vmem:[%s5233_s5 + $0x48] sm:$0xff] }
 0x558   :  { %2707 = vst.msk [vmem:[#allocation4 + $0x4b] sm:$0xff] %vm40_vm3, %v2697_v0  ;;  %2817 = vrot.lane.b32.xlu0 %v2791_v1, %s3913_s3  ;;  %v3841_v0 = vpack.c.bf16 %v3095_v63, %v3094_v62  ;;  %v3096_v1 = vld [vmem:[%s5233_s5 + $0x50] sm:$0xff] }
 0x559   :  { %3834 = vmatprep.subr.bf16.mxu0 %v3833_v58 }
 0x55a   :  { %3836 = vmatpush3.bf16.msra.mxu0 %v3833_v58 }
 0x55b   :  { %3838 = vmatprep.subr.bf16.mxu0 %v3837_v61 }
 0x55e   :  { %v2789_v2 = vld [vmem:[#allocation4 + $0x53] ss:$2 sm:$0xff]  ;;  %v2795_v4 = vld [vmem:[#allocation4 + $0x54] ss:$2 sm:$0xff]  ;;  %3840 = vmatpush3.bf16.msra.mxu0 %v3837_v61 }
 0x55f   :  { %2809 = vrot.lane.b32.xlu1 %v2789_v2, %s3911_s2  ;;  %v2787_v3 = vld [vmem:[#allocation4 + $0x43] ss:$2 sm:$0xff]  ;;  %v2793_v5 = vld [vmem:[#allocation4 + $0x44] ss:$2 sm:$0xff]  ;;  %3842 = vmatprep.subr.bf16.mxu0 %v3841_v0 }
 0x560   :  { %2807 = vrot.lane.b32.xlu0 %v2787_v3, %s3911_s2  ;;  %v2801_v6 = vld [vmem:[#allocation4 + $0x55] ss:$2 sm:$0xff]  ;;  %v2799_v7 = vld [vmem:[#allocation4 + $0x45] ss:$2 sm:$0xff]  ;;  %v2781_v42 = vld [vmem:[#allocation4 + $0x42] ss:$2 sm:$0xff] }
 0x561   :  { %v2783_v43 = vld [vmem:[#allocation4 + $0x52] ss:$2 sm:$0xff]  ;;  %v3097_v2 = vld [vmem:[%s5233_s5 + $0x58] sm:$0xff] }
 0x562   :  { %v3845_v3 = vpack.c.bf16 %v3097_v2, %v3096_v1  ;;  %3844 = vmatpush3.bf16.msra.mxu0 %v3841_v0 }
 0x563   :  { %2821 = vrot.lane.b32.xlu1 %v2795_v4, %s3913_s3  ;;  %v3098_v4 = vld [vmem:[%s5233_s5 + $0x60] sm:$0xff] }
 0x564   :  { %2819 = vrot.lane.b32.xlu0 %v2793_v5, %s3913_s3  ;;  %v3099_v5 = vld [vmem:[%s5233_s5 + $0x68] sm:$0xff]  ;;  %3846 = vmatprep.subr.bf16.mxu0 %v3845_v3 }
 0x566   :  { %3848 = vmatpush3.bf16.msra.mxu0 %v3845_v3 }
 0x567   :  { %2833 = vrot.lane.b32.xlu1 %v2801_v6, %s3914_s19  ;;  %v3849_v6 = vpack.c.bf16 %v3099_v5, %v3098_v4 }
 0x568   :  { %2831 = vrot.lane.b32.xlu0 %v2799_v7, %s3914_s19 }
 0x569   :  { %3850 = vmatprep.subr.bf16.mxu0 %v3849_v6 }
 0x56a   :  { %3852 = vmatpush3.bf16.msra.mxu0 %v3849_v6 }
 0x57f   :  { %v2736_v8 = vpop.permute.xlu0 %2735 }
 0x580   :  { %v2768_v11 = vsel %vm40_vm3, %v2709_v10, %v2736_v8 }
 0x583   :  { %v2748_v9 = vpop.permute.xlu0 %2747 }
 0x584   :  { %v2771_v12 = vsel %vm48_vm0, %v2768_v11, %v2748_v9 }
 0x597   :  { %v2760_v13 = vpop.permute.xlu0 %2759 }
 0x598   :  { %v2775_v14 = vsel %vm2774_vm14, %v2771_v12, %v2760_v13  ;;  %v2738_v15 = vpop.permute.xlu1 %2737 }
 0x599   :  { %3746 = vmatprep.mubr.msk.f32.mxu1 %vm2855_vm15, %v2775_v14  ;;  %v2769_v20 = vsel %vm40_vm3, %v2711_v18, %v2738_v15 }
 0x59c   :  { %v2750_v17 = vpop.permute.xlu1 %2749 }
 0x59d   :  { %v2772_v21 = vsel %vm48_vm0, %v2769_v20, %v2750_v17 }
 0x5af   :  { %v2740_v24 = vpop.permute.xlu0 %2739 }
 0x5b0   :  { %v2762_v22 = vpop.permute.xlu1 %2761  ;;  %v2770_v27 = vsel %vm40_vm3, %v2713_v26, %v2740_v24 }
 0x5b1   :  { %v2776_v23 = vsel %vm2774_vm14, %v2772_v21, %v2762_v22  ;;  %v3100_v21 = vld [vmem:[%s5233_s5 + $0x70] sm:$0xff]  ;;  %v3101_v22 = vld [vmem:[%s5233_s5 + $0x78] sm:$0xff]  ;;  %s3916_s5 = smov 96  }
 0x5b2   :  { %3747 = vmatmul.mubr.msk.f32.vlgmr.msra.gmra.mrb[34].mxu1 %vm2855_vm15, %v2776_v23  ;;  %v3853_v23 = vpack.c.bf16 %v3101_v22, %v3100_v21  ;;  %v3200_v21 = vld [vmem:[%s5234_s6 + $0x8] sm:$0x3] }
 0x5b4   :  { %v2752_v25 = vpop.permute.xlu1 %2751  ;;  %3854 = vmatprep.subr.bf16.mxu0 %v3853_v23 }
 0x5b5   :  { %v2773_v29 = vsel %vm48_vm0, %v2770_v27, %v2752_v25  ;;  %3856 = vmatpush3.bf16.msra.mxu0 %v3853_v23 }
 0x5b8   :  { %v2764_v31 = vpop.permute.xlu1 %2763 }
 0x5b9   :  { %v2777_v32 = vsel %vm2774_vm14, %v2773_v29, %v2764_v31 }
 0x5ba   :  { %3749 = vmatprep.mubr.msk.f32.mxu1 %vm2855_vm15, %v2777_v32 }
 0x5c6   :  { %v2806_v33 = vpop.permute.xlu0 %2805 }
 0x5c7   :  { %v2838_v16 = vsel %vm40_vm3, %v2779_v34, %v2806_v33  ;;  %v2830_v36 = vpop.permute.xlu1 %2829 }
 0x5ca   :  { %v2818_v35 = vpop.permute.xlu0 %2817 }
 0x5cb   :  { %v2841_v19 = vsel %vm48_vm0, %v2838_v16, %v2818_v35 }
 0x5cc   :  { %v2844_v37 = vsel %vm2774_vm14, %v2841_v19, %v2830_v36 }
 0x5cd   :  { %3750 = vmatmul.mubr.msk.f32.gmra.mrb[36].mxu1 %vm2855_vm15, %v2844_v37 }
 0x5d1   :  { %v2810_v38 = vpop.permute.xlu1 %2809 }
 0x5d2   :  { %v2808_v40 = vpop.permute.xlu0 %2807  ;;  %v2840_v45 = vsel %vm40_vm3, %v2783_v43, %v2810_v38 }
 0x5d3   :  { %v2839_v30 = vsel %vm40_vm3, %v2781_v42, %v2808_v40 }
 0x5d5   :  { %v2822_v41 = vpop.permute.xlu1 %2821 }
 0x5d6   :  { %v2820_v28 = vpop.permute.xlu0 %2819  ;;  %v2843_v48 = vsel %vm48_vm0, %v2840_v45, %v2822_v41 }
 0x5d7   :  { %v2842_v46 = vsel %vm48_vm0, %v2839_v30, %v2820_v28 }
 0x5d9   :  { %v2834_v44 = vpop.permute.xlu1 %2833 }
 0x5da   :  { %v2832_v47 = vpop.permute.xlu0 %2831  ;;  %v2846_v50 = vsel %vm2774_vm14, %v2843_v48, %v2834_v44 }
 0x5db   :  { %v2845_v49 = vsel %vm2774_vm14, %v2842_v46, %v2832_v47 }
 0x5dc   :  { %3752 = vmatprep.mubr.msk.f32.mxu1 %vm2855_vm15, %v2845_v49 }
 0x5dd   :  { %3753 = vmatmul.mubr.msk.f32.gmra.mrb[38].mxu1 %vm2855_vm15, %v2846_v50 }
 0x685   :  { %v3748_v7 = vpop.f32.mrb[34].mxu1 }
 0x686   :  { %vm2970_vm3 = vcmp.ge.f32.partialorder %v3748_v7, 0.0  ;;  %v2976_v8 = vmul.f32 0.2, %v3748_v7  ;;  %v2940_v9 = vpop.f32.mrb[35].mxu1 }
 0x687   :  { %vm2969_vm6 = vcmp.ge.f32.partialorder %v2940_v9, 0.0  ;;  %v2975_v10 = vmul.f32 0.2, %v2940_v9 }
 0x688   :  { %v2982_v11 = vsel %vm2970_vm3, %v3748_v7, %v2976_v8 }
 0x689   :  { %2988 = vst.msk [vmem:[#allocation5 + $0x9] sm:$0xff] %vm48_vm0, %v2982_v11  ;;  %v2981_v12 = vsel %vm2969_vm6, %v2940_v9, %v2975_v10 }
 0x68a   :  { %2987 = vst.msk [vmem:[#allocation5 + $0x1] sm:$0xff] %vm48_vm0, %v2981_v12 }
 0x691   :  { %v3002_v24 = vld [vmem:[#allocation5 + $0x2] ss:$2 sm:$0xff]  ;;  %v2998_v26 = vld [vmem:[#allocation5 + $0x1] ss:$2 sm:$0xff] }
 0x692   :  { %v2994_v54 = vld [vmem:[#allocation5] ss:$2 sm:$0xff] }
 0x6a0   :  { %v3751_v13 = vpop.f32.mrb[36].mxu1 }
 0x6a1   :  { %vm2972_vm1 = vcmp.ge.f32.partialorder %v3751_v13, 0.0  ;;  %v2978_v14 = vmul.f32 0.2, %v3751_v13  ;;  %v2950_v15 = vpop.f32.mrb[37].mxu1 }
 0x6a2   :  { %vm2971_vm7 = vcmp.ge.f32.partialorder %v2950_v15, 0.0  ;;  %v2977_v17 = vmul.f32 0.2, %v2950_v15 }
 0x6a3   :  { %v2984_v18 = vsel %vm2972_vm1, %v3751_v13, %v2978_v14 }
 0x6a4   :  { %2991 = vst.msk [vmem:[#allocation5 + $0x23] sm:$0xff] %vm48_vm0, %v2984_v18  ;;  %v2983_v20 = vsel %vm2971_vm7, %v2950_v15, %v2977_v17 }
 0x6a5   :  { %2990 = vst.msk [vmem:[#allocation5 + $0x11] sm:$0xf] %vm2989_vm8, %v2983_v20 }
 0x6ac   :  { %v3004_v25 = vld [vmem:[#allocation5 + $0x12] ss:$2 sm:$0xff]  ;;  %v3000_v27 = vld [vmem:[#allocation5 + $0x11] ss:$2 sm:$0xff] }
 0x6ad   :  { %v3874_v29 = vpack.i.bf16 %v3004_v25, %v3002_v24  ;;  %v3869_v31 = vpack.i.bf16 %v3000_v27, %v2998_v26  ;;  %v3006_v32 = vld [vmem:[#allocation5 + $0x3] ss:$2 sm:$0xff]  ;;  %v3008_v33 = vld [vmem:[#allocation5 + $0x13] ss:$2 sm:$0xff]  ;;  %v2996_v53 = vld [vmem:[#allocation5 + $0x10] ss:$2 sm:$0xff] }
 0x6ae   :  { %v3879_v36 = vpack.i.bf16 %v3008_v33, %v3006_v32  ;;  %v3199_v24 = vld [vmem:[%s5234_s6] sm:$0xff] }
 0x6af   :  { %3875 = vrot.lane.b32.xlu1 %v3874_v29, %s3915_s20  ;;  %3870 = vrot.lane.b32.xlu0 %v3869_v31, %s3913_s3 }
 0x6b0   :  { %v3754_v34 = vpop.f32.mrb[38].mxu1 }
 0x6b1   :  { %vm2974_vm9 = vcmp.ge.f32.partialorder %v3754_v34, 0.0  ;;  %v2980_v16 = vmul.f32 0.2, %v3754_v34  ;;  %v2960_v35 = vpop.f32.mrb[39].mxu1 }
 0x6b2   :  { %vm2973_vm10 = vcmp.ge.f32.partialorder %v2960_v35, 0.0  ;;  %v2979_v19 = vmul.f32 0.2, %v2960_v35 }
 0x6b3   :  { %v2986_v37 = vsel %vm2974_vm9, %v3754_v34, %v2980_v16  ;;  %3880 = vrot.lane.b32.xlu0 %v3879_v36, %s3916_s5 }
 0x6b4   :  { %2993 = vst.msk [vmem:[#allocation5 + $0x33] sm:$0xf] %vm2989_vm8, %v2986_v37  ;;  %v2985_v38 = vsel %vm2973_vm10, %v2960_v35, %v2979_v19 }
 0x6b5   :  { %2992 = vst.msk [vmem:[#allocation5 + $0x2b] sm:$0xff] %vm48_vm0, %v2985_v38 }
 0x6bb   :  { %v3051_v40 = vld [vmem:[#allocation5 + $0x34] ss:$2 sm:$0xff]  ;;  %v3047_v41 = vld [vmem:[#allocation5 + $0x33] ss:$2 sm:$0xff] }
 0x6bc   :  { %v3049_v28 = vld [vmem:[#allocation5 + $0x24] ss:$2 sm:$0xff]  ;;  %v3045_v42 = vld [vmem:[#allocation5 + $0x23] ss:$2 sm:$0xff] }
 0x6bd   :  { %v3889_v43 = vpack.i.bf16 %v3051_v40, %v3049_v28  ;;  %v3884_v30 = vpack.i.bf16 %v3047_v41, %v3045_v42  ;;  %v3053_v44 = vld [vmem:[#allocation5 + $0x25] ss:$2 sm:$0xff]  ;;  %v3055_v45 = vld [vmem:[#allocation5 + $0x35] ss:$2 sm:$0xff]  ;;  %v3041_v5 = vld [vmem:[#allocation5 + $0x22] ss:$2 sm:$0xff] }
 0x6be   :  { %v3894_v46 = vpack.i.bf16 %v3055_v45, %v3053_v44  ;;  %v3043_v6 = vld [vmem:[#allocation5 + $0x32] ss:$2 sm:$0xff] }
 0x6bf   :  { %3890 = vrot.lane.b32.xlu0 %v3889_v43, %s3915_s20  ;;  %3885 = vrot.lane.b32.xlu1 %v3884_v30, %s3913_s3 }
 0x6c3   :  { %3895 = vrot.lane.b32.xlu1 %v3894_v46, %s3916_s5 }
 0x721   :  { %v3876_v47 = vpop.permute.xlu1 %3875  ;;  %v3871_v48 = vpop.permute.xlu0 %3870 }
 0x722   :  { %v3873_v49 = vunpack.i.h.bf16 %v3871_v48  ;;  %v3872_v50 = vunpack.i.l.bf16 %v3871_v48  ;;  %v3878_v51 = vunpack.i.h.bf16 %v3876_v47  ;;  %v3877_v52 = vunpack.i.l.bf16 %v3876_v47 }
 0x724   :  { %v3034_v55 = vsel %vm48_vm0, %v2996_v53, %v3873_v49  ;;  %v3033_v56 = vsel %vm48_vm0, %v2994_v54, %v3872_v50 }
 0x725   :  { %v3881_v39 = vpop.permute.xlu0 %3880  ;;  %v3035_v59 = vsel %vm2855_vm15, %v3033_v56, %v3877_v52  ;;  %v3036_v60 = vsel %vm2855_vm15, %v3034_v55, %v3878_v51 }
 0x726   :  { %v3883_v57 = vunpack.i.h.bf16 %v3881_v39  ;;  %v3882_v58 = vunpack.i.l.bf16 %v3881_v39 }
 0x728   :  { %v3038_v61 = vsel %vm3037_vm11, %v3035_v59, %v3882_v58  ;;  %v3039_v62 = vsel %vm3037_vm11, %v3036_v60, %v3883_v57 }
 0x729   :  { %3787 = vmatprep.mubr.f32.mxu0 %v3038_v61 }
 0x72a   :  { %3788 = vmatmul.mubr.f32.vlgmr.msra.gmra.mrb[36].mxu0 %v3039_v62 }
 0x731   :  { %v3891_v63 = vpop.permute.xlu0 %3890  ;;  %v3886_v0 = vpop.permute.xlu1 %3885 }
 0x732   :  { %v3888_v1 = vunpack.i.h.bf16 %v3886_v0  ;;  %v3887_v2 = vunpack.i.l.bf16 %v3886_v0  ;;  %v3893_v3 = vunpack.i.h.bf16 %v3891_v63  ;;  %v3892_v4 = vunpack.i.l.bf16 %v3891_v63 }
 0x734   :  { %v3080_v7 = vsel %vm48_vm0, %v3041_v5, %v3887_v2  ;;  %v3081_v8 = vsel %vm48_vm0, %v3043_v6, %v3888_v1 }
 0x735   :  { %v3896_v9 = vpop.permute.xlu1 %3895  ;;  %v3082_v12 = vsel %vm2855_vm15, %v3080_v7, %v3892_v4  ;;  %v3083_v13 = vsel %vm2855_vm15, %v3081_v8, %v3893_v3 }
 0x736   :  { %v3898_v10 = vunpack.i.h.bf16 %v3896_v9  ;;  %v3897_v11 = vunpack.i.l.bf16 %v3896_v9 }
 0x738   :  { %v3084_v14 = vsel %vm3037_vm11, %v3082_v12, %v3897_v11  ;;  %v3085_v15 = vsel %vm3037_vm11, %v3083_v13, %v3898_v10 }
 0x739   :  { %3790 = vmatprep.mubr.f32.mxu0 %v3084_v14 }
 0x73a   :  { %3791 = vmatmul.mubr.f32.gmra.mrb[38].mxu0 %v3085_v15 }
 0x7fd   :  { %v3789_v17 = vpop.f32.mrb[36].mxu0 }
 0x7fe   :  { %vm3188_vm2 = vcmp.ge.f32.partialorder %v3789_v17, 0.0  ;;  %v3192_v18 = vmul.f32 0.2, %v3789_v17  ;;  %v3168_v20 = vpop.f32.mrb[37].mxu0 }
 0x7ff   :  { %vm3187_vm0 = vcmp.ge.f32.partialorder %v3168_v20, 0.0  ;;  %v3191_v22 = vmul.f32 0.2, %v3168_v20 }
 0x800   :  { %v3196_v23 = vsel %vm3188_vm2, %v3789_v17, %v3192_v18 }
 0x801   :  { %3203 = vst.msk [vmem:[%s5235_s8 + $0x8] sm:$0x3] %vm3202_vm12, %v3196_v23  ;;  %v3195_v25 = vsel %vm3187_vm0, %v3168_v20, %v3191_v22  ;;  %v3205_v26 = vmul.f32 %v3200_v21, %v3196_v23 }
 0x802   :  { %3201 = vst.msk [vmem:[%s5235_s8] sm:$0xff] %vm2855_vm15, %v3195_v25  ;;  %v3204_v29 = vmul.f32 %v3199_v24, %v3195_v25 }
 0x803   :  { %v3209_v27 = vsel %vm3202_vm12, %v3205_v26, 0.0 }
 0x804   :  { %3210 = vadd.xlane.f32.xlu0 %v3209_v27  ;;  %v3206_v31 = vsel %vm2855_vm15, %v3204_v29, 0.0 }
 0x808   :  { %3207 = vadd.xlane.f32.xlu0 %v3206_v31 }
 0x80d   :  { %v3792_v32 = vpop.f32.mrb[38].mxu0 }
 0x80e   :  { %vm3190_vm13 = vcmp.ge.f32.partialorder %v3792_v32, 0.0  ;;  %v3194_v33 = vmul.f32 0.2, %v3792_v32  ;;  %v3178_v34 = vpop.f32.mrb[39].mxu0 }
 0x80f   :  { %vm3189_vm14 = vcmp.ge.f32.partialorder %v3178_v34, 0.0  ;;  %v3193_v16 = vmul.f32 0.2, %v3178_v34 }
 0x810   :  { %v3198_v35 = vsel %vm3190_vm13, %v3792_v32, %v3194_v33 }
 0x811   :  { %3230 = vst.msk [vmem:[%s5235_s8 + $0x12] sm:$0x3] %vm3202_vm12, %v3198_v35  ;;  %v3197_v36 = vsel %vm3189_vm14, %v3178_v34, %v3193_v16  ;;  %v3232_v19 = vmul.f32 %v3200_v21, %v3198_v35 }
 0x812   :  { %3229 = vst.msk [vmem:[%s5235_s8 + $0xa] sm:$0xff] %vm2855_vm15, %v3197_v36  ;;  %v3231_v37 = vmul.f32 %v3199_v24, %v3197_v36 }
 0x813   :  { %v3236_v38 = vsel %vm3202_vm12, %v3232_v19, 0.0 }
 0x814   :  { %3237 = vadd.xlane.f32.xlu1 %v3236_v38  ;;  %v3233_v40 = vsel %vm2855_vm15, %v3231_v37, 0.0  ;;  %vm3227_vm15 = vcmask 0  }
 0x815   :  { %3234 = vadd.xlane.f32.xlu0 %v3233_v40 }
 0x891   :  { %v3211_v41 = vpop.xlane.xlu0 %3210 }
 0x892   :  { %v3213_v28 = vsel %vm3212_vm4, %v3211_v41, 0.0 }
 0x895   :  { %v3208_v42 = vpop.xlane.xlu0 %3207 }
 0x896   :  { %v3214_v43 = vadd.f32 %v3213_v28, %v3208_v42 }
 0x898   :  { %v3215_v30 = vrot.slane %v3214_v43, 4 }
 0x89a   :  { %v3216_v44 = vadd.f32 %v3215_v30, %v3214_v43 }
 0x89c   :  { %v3217_v45 = vrot.slane %v3216_v44, 2 }
 0x89e   :  { %v3218_v46 = vadd.f32 %v3217_v45, %v3216_v44 }
 0x8a0   :  { %v3219_v47 = vrot.slane %v3218_v46, 1 }
 0x8a1   :  { %v3238_v48 = vpop.xlane.xlu1 %3237 }
 0x8a2   :  { %v3220_v49 = vadd.f32 %v3219_v47, %v3218_v46  ;;  %v3239_v50 = vsel %vm3212_vm4, %v3238_v48, 0.0  ;;  %v3235_v51 = vpop.xlane.xlu0 %3234 }
 0x8a3   :  { %v3240_v52 = vadd.f32 %v3239_v50, %v3235_v51 }
 0x8a4   :  { %v3221_v53 = vsub.f32 0.0, %v3220_v49 }
 0x8a5   :  { %v3241_v54 = vrot.slane %v3240_v52, 4 }
 0x8a6   :  { %v3222_v55 = vmul.f32 1.442695, %v3221_v53 }
 0x8a7   :  { %v3242_v56 = vadd.f32 %v3241_v54, %v3240_v52 }
 0x8a8   :  { %3899 = vpow2.f32 %v3222_v55 }
 0x8a9   :  { %v3243_v39 = vrot.slane %v3242_v56, 2 }
 0x8ab   :  { %v3244_v57 = vadd.f32 %v3243_v39, %v3242_v56 }
 0x8ad   :  { %v3245_v58 = vrot.slane %v3244_v57, 1 }
 0x8af   :  { %v3246_v59 = vadd.f32 %v3245_v58, %v3244_v57 }
 0x8b1   :  { %v3247_v60 = vsub.f32 0.0, %v3246_v59 }
 0x8b2   :  { %v3900_v61 = vpop.eup %3899 }
 0x8b3   :  { %v3224_v62 = vadd.f32 1.0, %v3900_v61  ;;  %v3248_v63 = vmul.f32 1.442695, %v3247_v60 }
 0x8b5   :  { %3901 = vrcp.f32 %v3224_v62 }
 0x8b6   :  { %3903 = vpow2.f32 %v3248_v63 }
 0x8bf   :  { %v3902_v0 = vpop.eup %3901 }
 0x8c0   :  { %v3904_v1 = vpop.eup %3903  ;;  %3228 = vst.msk [vmem:[%s5236_s7] sm:$0x1] %vm3227_vm15, %v3902_v0 }
 0x8c1   :  { %v3250_v2 = vadd.f32 1.0, %v3904_v1 }
 0x8c3   :  { %3905 = vrcp.f32 %v3250_v2 }
 0x8cd   :  { %v3906_v3 = vpop.eup %3905 }
 0x8ce   :  { %3253 = vst.msk [vmem:[%s5236_s7 + $0x1] sm:$0x1] %vm3227_vm15, %v3906_v3 }

</bundles_post_ra>
